<compile_context>
chip_gen: v5e
topology: v5e:2x2
jax: 0.10.0
libtpu: 0.0.40
codegen_flags: <defaults>
</compile_context>

<pallas_src>
import functools

import numpy as np
import jax
import jax.numpy as jnp
from jax.experimental import pallas as pl
from jax.experimental.pallas import tpu as pltpu


# ----------------------------- in-kernel helpers -----------------------------

def _layer_norm(x, g, b):
    # one-pass statistics: var = E[x^2] - mu^2 (independent lane reductions)
    mu = jnp.mean(x, axis=-1, keepdims=True)
    msq = jnp.mean(x * x, axis=-1, keepdims=True)
    var = jnp.maximum(msq - mu * mu, 0.0)
    return (x - mu) * jax.lax.rsqrt(var + 1e-5) * g + b


def _softmax_rows(s):
    s = s - jnp.max(s, axis=-1, keepdims=True)
    p = jnp.exp(s)
    return p / jnp.sum(p, axis=-1, keepdims=True)


def _argmax_onehot(s):
    """Row-wise argmax (first maximal lane) + one-hot over the lane dim."""
    C = s.shape[-1]
    col = jax.lax.broadcasted_iota(jnp.int32, s.shape, 1)
    mx = jnp.max(s, axis=-1, keepdims=True)
    idx = jnp.min(jnp.where(s >= mx, col.astype(jnp.float32), float(C)),
                  axis=-1, keepdims=True).astype(jnp.int32)          # [R, 1]
    return idx, (col == idx).astype(jnp.float32)                     # [R, C]


def _attn_layer_batched(x, kv, lrefs, l, H, Bb, Lq, Lk, mask_bias=None, self_attn=False):
    """Attention block: MHA + residual + LN + ReLU-FFN + residual + LN.

    x  : [Bb*Lq, E] f32 queries (batch-flattened so QKV/out-proj/FFN matmuls are fat)
    kv : [Bb*Lk, E] f32 keys/values (ignored when self_attn)
    mask_bias: None or list (len Bb) of additive [Lq, Lk] biases (0 attend / -1e9 block)
    Weight matrices are bf16 (MXU inputs); biases / LN params f32; accumulation f32.
    """
    (wqkv_r, bqkv_r, wo_r, bo_r, ln1g_r, ln1b_r,
     wff1_r, bff1_r, wff2_r, bff2_r, ln2g_r, ln2b_r) = lrefs
    E = x.shape[-1]
    Dh = E // H
    f32, bf16 = jnp.float32, jnp.bfloat16

    xb = x.astype(bf16)
    if self_attn:
        qkv = jnp.dot(xb, wqkv_r[l], preferred_element_type=f32) + bqkv_r[l]
        q, k, v = qkv[:, :E], qkv[:, E:2 * E], qkv[:, 2 * E:]
    else:
        # weight slices read straight from the ref (no [E,3E] value staging)
        q = jnp.dot(xb, wqkv_r[l, :, :E], preferred_element_type=f32) + bqkv_r[l, :, :E]
        kvp = (jnp.dot(kv.astype(bf16), wqkv_r[l, :, E:], preferred_element_type=f32)
               + bqkv_r[l, :, E:])
        k, v = kvp[:, :E], kvp[:, E:]

    q = q * (1.0 / float(np.sqrt(Dh)))          # hoisted: scale q once, not each score
    wo = wo_r[l]                                # bf16 [E, E]

    outs = []
    for b in range(Bb):
        qb = q[b * Lq:(b + 1) * Lq].astype(bf16)
        kb = k[b * Lk:(b + 1) * Lk].astype(bf16)
        vb = v[b * Lk:(b + 1) * Lk].astype(bf16)
        acc = None
        for h in range(H):
            sl = slice(h * Dh, (h + 1) * Dh)
            s = jax.lax.dot_general(qb[:, sl], kb[:, sl], (((1,), (1,)), ((), ())),
                                    preferred_element_type=f32)
            if mask_bias is not None:
                s = s + mask_bias[b]
            p = _softmax_rows(s)
            hv = jnp.dot(p.astype(bf16), vb[:, sl], preferred_element_type=f32)
            # output projection folded into the head loop (no lane concat of heads)
            c = jnp.dot(hv.astype(bf16), wo[sl, :], preferred_element_type=f32)
            acc = c if acc is None else acc + c
        outs.append(acc)
    o = (outs[0] if Bb == 1 else jnp.concatenate(outs, axis=0)) + bo_r[l]

    x1 = _layer_norm(x + o, ln1g_r[l], ln1b_r[l])
    f = jnp.maximum(jnp.dot(x1.astype(bf16), wff1_r[l], preferred_element_type=f32)
                    + bff1_r[l], 0.0)
    f = jnp.dot(f.astype(bf16), wff2_r[l], preferred_element_type=f32) + bff2_r[l]
    return _layer_norm(x1 + f, ln2g_r[l], ln2b_r[l])


def _pointer_logits_batched(xq, xk, wq_r, bq_r, wk_r, bk_r, masks01, Bb, Lq, Lk):
    """SingleHeadAttention pointer: 10*tanh(q k^T / sqrt(E)), masked to -1e9."""
    E = xq.shape[-1]
    f32, bf16 = jnp.float32, jnp.bfloat16
    q = jnp.dot(xq.astype(bf16), wq_r[...], preferred_element_type=f32) + bq_r[...]
    k = jnp.dot(xk.astype(bf16), wk_r[...], preferred_element_type=f32) + bk_r[...]
    q = q * (1.0 / float(np.sqrt(E)))
    outs = []
    for b in range(Bb):
        s = jax.lax.dot_general(q[b * Lq:(b + 1) * Lq].astype(bf16),
                                k[b * Lk:(b + 1) * Lk].astype(bf16),
                                (((1,), (1,)), ((), ())), preferred_element_type=f32)
        s = 10.0 * jnp.tanh(s)
        outs.append(jnp.where(masks01[b] > 0.0, s, -1e9))
    return outs


# ----------------------------- fused stage kernels -----------------------------

def _city_encoder_kernel(city_ref, wemb_ref, bemb_ref, *rest, num_layers, num_heads, Bb, N):
    lrefs = rest[:12]
    ce_ref, mean_ref = rest[12], rest[13]
    f32, bf16 = jnp.float32, jnp.bfloat16

    coords = [city_ref[b] for b in range(Bb)]
    cf = coords[0] if Bb == 1 else jnp.concatenate(coords, axis=0)       # [Bb*N, 2]
    x = jnp.dot(cf.astype(bf16), wemb_ref[...], preferred_element_type=f32) + bemb_ref[...]
    for l in range(num_layers):
        x = _attn_layer_batched(x, x, lrefs, l, num_heads, Bb, N, N,
                                mask_bias=None, self_attn=True)
    inv_n = 1.0 / float(N)
    for b in range(Bb):
        xb = x[b * N:(b + 1) * N]
        ce_ref[b] = xb
        mean_ref[b] = jnp.sum(xb, axis=0, keepdims=True) * inv_n         # fused graph mean


def _fused_forward_kernel(city_ref, graph_ref, agent_ref, mask_ref,
                          wdp_ref, bdp_ref, wfeat_ref, bfeat_ref,
                          wg_ref, bg_ref, wag_ref, bag_ref,
                          *rest,
                          Bb, A, N, E,
                          agent_layers, agent_heads,
                          dec_layers, dec_heads,
                          conf_layers, conf_heads):
    agent_lrefs = rest[0:12]
    wc1_ref, bc1_ref, wc2_ref, bc2_ref = rest[12:16]
    dec_lrefs = rest[16:28]
    dwq_ref, dbq_ref, dwk_ref, dbk_ref = rest[28:32]
    conf_lrefs = rest[32:44]
    cwq_ref, cbq_ref, cwk_ref, cbk_ref = rest[44:48]
    (al_ref, gl_ref, acts_ref, actsnc_ref, mout_ref, value_ref) = rest[48:54]
    f32, bf16 = jnp.float32, jnp.bfloat16

    # ---------------- agent embedding ----------------
    ce_list = [city_ref[b] for b in range(Bb)]                 # each [N, E] f32
    city_flat = ce_list[0] if Bb == 1 else jnp.concatenate(ce_list, axis=0)
    ag_list = [agent_ref[b] for b in range(Bb)]                # each [A, 13] f32
    colN = jax.lax.broadcasted_iota(jnp.int32, (A, N), 1)

    g0s, g1s = [], []
    for b in range(Bb):
        idx = ag_list[b][:, :2].astype(jnp.int32)              # [A, 2] city indices
        oh0 = (colN == idx[:, 0:1]).astype(f32)
        oh1 = (colN == idx[:, 1:2]).astype(f32)
        # gather(city_embed, idx) as exact f32 one-hot matmuls (MXU, no dynamic gather)
        g0s.append(jnp.dot(oh0, ce_list[b], preferred_element_type=f32))
        g1s.append(jnp.dot(oh1, ce_list[b], preferred_element_type=f32))
    g0 = g0s[0] if Bb == 1 else jnp.concatenate(g0s, axis=0)   # [Bb*A, E]
    g1 = g1s[0] if Bb == 1 else jnp.concatenate(g1s, axis=0)
    agent_flat = ag_list[0] if Bb == 1 else jnp.concatenate(ag_list, axis=0)

    dp = (jnp.dot(g0.astype(bf16), wdp_ref[:E], preferred_element_type=f32)
          + jnp.dot(g1.astype(bf16), wdp_ref[E:], preferred_element_type=f32)
          + bdp_ref[...])
    # distance_cost + next_cost + problem_scale embeds fused into one K=11 matmul
    feat = (jnp.dot(agent_flat[:, 2:].astype(bf16), wfeat_ref[...],
                    preferred_element_type=f32) + bfeat_ref[...])

    graph_list = [graph_ref[b] for b in range(Bb)]             # each [1, E]
    graph_flat = graph_list[0] if Bb == 1 else jnp.concatenate(graph_list, axis=0)
    gg = (jnp.dot(graph_flat.astype(bf16), wg_ref[...], preferred_element_type=f32)
          + bg_ref[...])                                       # [Bb, E]
    gterm = jnp.dot(gg.astype(bf16), wag_ref[:E], preferred_element_type=f32)
    if Bb == 1:
        gterm_full = jnp.broadcast_to(gterm, (A, E))
    else:
        gterm_full = jnp.concatenate(
            [jnp.broadcast_to(gterm[b:b + 1], (A, E)) for b in range(Bb)], axis=0)
    x = (gterm_full
         + jnp.dot((dp + feat).astype(bf16), wag_ref[E:], preferred_element_type=f32)
         + bag_ref[...])                                       # [Bb*A, E]

    # ---------------- agent self-attention encoder ----------------
    for l in range(agent_layers):
        x = _attn_layer_batched(x, x, agent_lrefs, l, agent_heads, Bb, A, A,
                                mask_bias=None, self_attn=True)
    agent_embed = x

    # ---------------- critic head ----------------
    h = jnp.maximum(jnp.dot(agent_embed.astype(bf16), wc1_ref[...],
                            preferred_element_type=f32) + bc1_ref[...], 0.0)
    val = jnp.dot(h.astype(bf16), wc2_ref[...], preferred_element_type=f32) + bc2_ref[...]
    for b in range(Bb):
        value_ref[b] = val[b * A:(b + 1) * A]

    # ---------------- action decoder (cross-attention over cities) ----------------
    mask01 = [mask_ref[b] for b in range(Bb)]                  # [A, N], 1 = allowed
    mask_bias = [jnp.where(m > 0.0, 0.0, -1e9) for m in mask01]
    aca = agent_embed
    for l in range(dec_layers):
        aca = _attn_layer_batched(aca, city_flat, dec_lrefs, l, dec_heads, Bb, A, N,
                                  mask_bias=mask_bias, self_attn=False)
    act_logits = _pointer_logits_batched(aca, city_flat, dwq_ref, dbq_ref, dwk_ref, dbk_ref,
                                         mask01, Bb, A, N)

    # greedy argmax + one-hot computed in-kernel (no XLA glue between stages)
    # TODO(synk): mode == 'sample' (Categorical) is not implemented.
    acts_idx, acts_oh = [], []
    for b in range(Bb):
        al_ref[b] = act_logits[b]
        i, oh = _argmax_onehot(act_logits[b])
        acts_idx.append(i)
        acts_oh.append(oh)

    # ---------------- conflict model ----------------
    eyeA = (jax.lax.broadcasted_iota(jnp.int32, (A, A), 0)
            == jax.lax.broadcasted_iota(jnp.int32, (A, A), 1)).astype(f32)
    sel, conf01, conf_bias = [], [], []
    for b in range(Bb):
        oh = acts_oh[b]
        sel.append(jnp.dot(oh, ce_list[b], preferred_element_type=f32))   # gather by one-hot
        cm = jax.lax.dot_general(oh, oh, (((1,), (1,)), ((), ())),
                                 preferred_element_type=f32)              # acts_i == acts_j
        cm = jnp.where(acts_idx[b] == 0, eyeA, cm)                        # depot rows -> identity
        conf01.append(cm)
        conf_bias.append(jnp.where(cm > 0.0, 0.0, -1e9))
    cac = sel[0] if Bb == 1 else jnp.concatenate(sel, axis=0)             # [Bb*A, E]
    for l in range(conf_layers):
        cac = _attn_layer_batched(cac, agent_embed, conf_lrefs, l, conf_heads, Bb, A, A,
                                  mask_bias=conf_bias, self_attn=False)
    ag_logits = _pointer_logits_batched(cac, agent_embed, cwq_ref, cbq_ref, cwk_ref, cbk_ref,
                                        conf01, Bb, A, A)

    posA = jax.lax.broadcasted_iota(jnp.int32, (A, 1), 0)
    for b in range(Bb):
        gl_ref[b] = ag_logits[b]
        agents_i, _ = _argmax_onehot(ag_logits[b])
        acts_i = acts_idx[b]
        m_out = jnp.logical_or(agents_i == posA, acts_i == 0)
        acts_ref[b] = acts_i
        mout_ref[b] = m_out.astype(jnp.int32)
        actsnc_ref[b] = jnp.where(m_out, acts_i, -1)


# ----------------------------- BlockSpec helpers -----------------------------

def _full_spec(shape):
    zeros = (0,) * len(shape)
    return pl.BlockSpec(tuple(shape), lambda b, _z=zeros: _z)


def _batch_spec(block_shape):
    rest_zeros = (0,) * (len(block_shape) - 1)
    return pl.BlockSpec(tuple(block_shape), lambda b, _z=rest_zeros: (b,) + _z)


def _pick_bb(B, cap=8):
    """Largest divisor of B (<= cap) that still leaves >= 2 grid steps when possible."""
    divs = [d for d in range(1, min(B, cap) + 1) if B % d == 0]
    multi = [d for d in divs if B // d >= 2]
    return max(multi) if multi else max(divs)


def _compiler_params():
    return pltpu.CompilerParams(dimension_semantics=("parallel",),
                                vmem_limit_bytes=32 * 1024 * 1024)


# ----------------------------- stage wrappers -----------------------------

@functools.partial(jax.jit, static_argnums=(1,))
def city_encoder_call(p, cfg, city):
    B, N, _ = city.shape
    E = cfg.embed_dim
    Bb = _pick_bb(B)
    args = (city, p["wemb"], p["bemb"]) + p["layers"]
    in_specs = ([_batch_spec((Bb,) + city.shape[1:])]
                + [_full_spec(a.shape) for a in args[1:]])
    out_shape = (jax.ShapeDtypeStruct((B, N, E), jnp.float32),
                 jax.ShapeDtypeStruct((B, 1, E), jnp.float32))
    out_specs = (_batch_spec((Bb, N, E)), _batch_spec((Bb, 1, E)))
    return pl.pallas_call(
        functools.partial(_city_encoder_kernel,
                          num_layers=cfg.city_encoder_num_layers,
                          num_heads=cfg.city_encoder_num_heads,
                          Bb=Bb, N=N),
        out_shape=out_shape,
        grid=(B // Bb,),
        in_specs=in_specs,
        out_specs=out_specs,
        compiler_params=_compiler_params(),
    )(*args)


@functools.partial(jax.jit, static_argnums=(1,))
def model_forward(packed, cfg, city_embed, city_embed_mean, agent, mask):
    """Model.forward with mode='greedy', use_conflict_model=True (single fused kernel)."""
    B, A, Fdim = agent.shape
    N = city_embed.shape[1]
    E = cfg.embed_dim
    Bb = _pick_bb(B)
    mask = mask.astype(jnp.float32)

    pa, pd, pc = packed["agent"], packed["dec"], packed["conf"]
    args = ((city_embed, city_embed_mean, agent, mask,
             pa["wdp"], pa["bdp"], pa["wfeat"], pa["bfeat"],
             pa["wg"], pa["bg"], pa["wag"], pa["bag"])
            + pa["layers"] + (pa["wc1"], pa["bc1"], pa["wc2"], pa["bc2"])
            + pd["layers"] + (pd["wq"], pd["bq"], pd["wk"], pd["bk"])
            + pc["layers"] + (pc["wq"], pc["bq"], pc["wk"], pc["bk"]))

    in_specs = ([_batch_spec((Bb, N, E)), _batch_spec((Bb, 1, E)),
                 _batch_spec((Bb, A, Fdim)), _batch_spec((Bb, A, N))]
                + [_full_spec(a.shape) for a in args[4:]])
    out_shape = (jax.ShapeDtypeStruct((B, A, N), jnp.float32),
                 jax.ShapeDtypeStruct((B, A, A), jnp.float32),
                 jax.ShapeDtypeStruct((B, A, 1), jnp.int32),
                 jax.ShapeDtypeStruct((B, A, 1), jnp.int32),
                 jax.ShapeDtypeStruct((B, A, 1), jnp.int32),
                 jax.ShapeDtypeStruct((B, A, 1), jnp.float32))
    out_specs = (_batch_spec((Bb, A, N)), _batch_spec((Bb, A, A)),
                 _batch_spec((Bb, A, 1)), _batch_spec((Bb, A, 1)),
                 _batch_spec((Bb, A, 1)), _batch_spec((Bb, A, 1)))

    kern = functools.partial(
        _fused_forward_kernel, Bb=Bb, A=A, N=N, E=E,
        agent_layers=cfg.agent_encoder_num_layers, agent_heads=cfg.agent_encoder_num_heads,
        dec_layers=cfg.action_decoder_num_layers, dec_heads=cfg.action_decoder_num_heads,
        conf_layers=cfg.conflict_deal_num_layers, conf_heads=cfg.conflict_deal_num_heads)

    al, gl, acts, acts_nc, masks_out, value = pl.pallas_call(
        kern,
        out_shape=out_shape,
        grid=(B // Bb,),
        in_specs=in_specs,
        out_specs=out_specs,
        compiler_params=_compiler_params(),
    )(*args)

    acts = acts[..., 0]
    acts_nc = acts_nc[..., 0]
    masks_out = masks_out[..., 0].astype(jnp.bool_)
    return al, gl, acts, acts_nc, masks_out, value


# ----------------------------- parameters -----------------------------

def _init_linear(key, in_dim, out_dim):
    k1, k2 = jax.random.split(key)
    bound = 1.0 / float(np.sqrt(in_dim))
    return {"w": jax.random.uniform(k1, (in_dim, out_dim), jnp.float32, -bound, bound),
            "b": jax.random.uniform(k2, (out_dim,), jnp.float32, -bound, bound)}


def _init_ln(dim):
    return {"g": jnp.ones((dim,), jnp.float32), "b": jnp.zeros((dim,), jnp.float32)}


def _init_att_block(key, E, hidden):
    ks = jax.random.split(key, 6)
    return {"q": _init_linear(ks[0], E, E), "k": _init_linear(ks[1], E, E),
            "v": _init_linear(ks[2], E, E), "o": _init_linear(ks[3], E, E),
            "ff1": _init_linear(ks[4], E, hidden), "ff2": _init_linear(ks[5], hidden, E),
            "ln1": _init_ln(E), "ln2": _init_ln(E)}


class Config:
    embed_dim = 128
    city_encoder_hidden_dim = 256
    city_encoder_num_heads = 4
    city_encoder_num_layers = 2
    agent_dim = 13
    agent_encoder_hidden_dim = 256
    agent_encoder_num_heads = 4
    agent_encoder_num_layers = 2
    action_decoder_hidden_dim = 256
    action_decoder_num_heads = 4
    action_decoder_num_layers = 2
    conflict_deal_num_heads = 4
    conflict_deal_hidden_dim = 256
    conflict_deal_num_layers = 2
    dropout = 0.0


def init_model_params(key, cfg):
    E = cfg.embed_dim
    ki = iter(jax.random.split(key, 32))
    p = {}
    p["city_embed_lin"] = _init_linear(next(ki), 2, E)
    p["city_layers"] = [_init_att_block(next(ki), E, cfg.city_encoder_hidden_dim)
                        for _ in range(cfg.city_encoder_num_layers)]
    p["depot_pos_embed"] = _init_linear(next(ki), 2 * E, E)
    p["distance_cost_embed"] = _init_linear(next(ki), 4, E)
    p["next_cost_embed"] = _init_linear(next(ki), 4, E)
    p["problem_scale_embed"] = _init_linear(next(ki), 3, E)
    p["graph_embed"] = _init_linear(next(ki), E, E)
    p["agent_embed"] = _init_linear(next(ki), 2 * E, E)
    p["agent_layers"] = [_init_att_block(next(ki), E, cfg.agent_encoder_hidden_dim)
                         for _ in range(cfg.agent_encoder_num_layers)]
    p["dec_layers"] = [_init_att_block(next(ki), E, cfg.action_decoder_hidden_dim)
                       for _ in range(cfg.action_decoder_num_layers)]
    p["action_q"] = _init_linear(next(ki), E, E)
    p["action_k"] = _init_linear(next(ki), E, E)
    p["conf_layers"] = [_init_att_block(next(ki), E, cfg.conflict_deal_hidden_dim)
                        for _ in range(cfg.conflict_deal_num_layers)]
    p["conf_q"] = _init_linear(next(ki), E, E)
    p["conf_k"] = _init_linear(next(ki), E, E)
    p["critic1"] = _init_linear(next(ki), E, cfg.action_decoder_hidden_dim)
    p["critic2"] = _init_linear(next(ki), cfg.action_decoder_hidden_dim, 1)
    return p


def pack_params(params, cfg):
    """Pack torch-style per-layer params into stacked, QKV-fused, bf16-weight arrays."""
    wdt = jnp.bfloat16

    def pack_layers(layers):
        return (
            jnp.stack([jnp.concatenate([l["q"]["w"], l["k"]["w"], l["v"]["w"]], axis=1)
                       for l in layers]).astype(wdt),                    # wqkv [L,E,3E]
            jnp.stack([jnp.concatenate([l["q"]["b"], l["k"]["b"], l["v"]["b"]])[None, :]
                       for l in layers]),                                # bqkv [L,1,3E] f32
            jnp.stack([l["o"]["w"] for l in layers]).astype(wdt),        # wo   [L,E,E]
            jnp.stack([l["o"]["b"][None, :] for l in layers]),           # bo   [L,1,E] f32
            jnp.stack([l["ln1"]["g"][None, :] for l in layers]),
            jnp.stack([l["ln1"]["b"][None, :] for l in layers]),
            jnp.stack([l["ff1"]["w"] for l in layers]).astype(wdt),
            jnp.stack([l["ff1"]["b"][None, :] for l in layers]),
            jnp.stack([l["ff2"]["w"] for l in layers]).astype(wdt),
            jnp.stack([l["ff2"]["b"][None, :] for l in layers]),
            jnp.stack([l["ln2"]["g"][None, :] for l in layers]),
            jnp.stack([l["ln2"]["b"][None, :] for l in layers]),
        )

    return {
        "city": {
            "wemb": params["city_embed_lin"]["w"].astype(wdt),
            "bemb": params["city_embed_lin"]["b"][None, :],
            "layers": pack_layers(params["city_layers"]),
        },
        "agent": {
            "wdp": params["depot_pos_embed"]["w"].astype(wdt),
            "bdp": params["depot_pos_embed"]["b"][None, :],
            # the three small feature embeds (K=4,4,3) fused into one K=11 linear
            "wfeat": jnp.concatenate([params["distance_cost_embed"]["w"],
                                      params["next_cost_embed"]["w"],
                                      params["problem_scale_embed"]["w"]],
                                     axis=0).astype(wdt),
            "bfeat": (params["distance_cost_embed"]["b"]
                      + params["next_cost_embed"]["b"]
                      + params["problem_scale_embed"]["b"])[None, :],
            "wg": params["graph_embed"]["w"].astype(wdt),
            "bg": params["graph_embed"]["b"][None, :],
            "wag": params["agent_embed"]["w"].astype(wdt),
            "bag": params["agent_embed"]["b"][None, :],
            "layers": pack_layers(params["agent_layers"]),
            "wc1": params["critic1"]["w"].astype(wdt),
            "bc1": params["critic1"]["b"][None, :],
            "wc2": params["critic2"]["w"].astype(wdt),
            "bc2": params["critic2"]["b"][None, :],
        },
        "dec": {
            "layers": pack_layers(params["dec_layers"]),
            "wq": params["action_q"]["w"].astype(wdt), "bq": params["action_q"]["b"][None, :],
            "wk": params["action_k"]["w"].astype(wdt), "bk": params["action_k"]["b"][None, :],
        },
        "conf": {
            "layers": pack_layers(params["conf_layers"]),
            "wq": params["conf_q"]["w"].astype(wdt), "bq": params["conf_q"]["b"][None, :],
            "wk": params["conf_k"]["w"].astype(wdt), "bk": params["conf_k"]["b"][None, :],
        },
    }


# ----------------------------- main -----------------------------

if __name__ == "__main__":
    cfg = Config()
    key = jax.random.PRNGKey(0)
    kp, kc, ka, km, ki = jax.random.split(key, 5)

    B, N, A = 4, 16, 8      # batch, num cities, num agents
    params = init_model_params(kp, cfg)
    packed = pack_params(params, cfg)

    # init_city(city): fused city encoder + graph mean (second output of the same kernel)
    city = jax.random.uniform(kc, (B, N, 2), jnp.float32)
    city_embed, city_embed_mean = city_encoder_call(packed["city"], cfg, city)

    # agent state [B, A, 13]: first 2 entries are city indices (as floats), rest features
    idx = jax.random.randint(ki, (B, A, 2), 0, N).astype(jnp.float32)
    feats = jax.random.uniform(ka, (B, A, 11), jnp.float32)
    agent = jnp.concatenate([idx, feats], axis=-1)

    # mask [B, A, N]: 1 = city allowed; keep depot (col 0) always allowed
    mask = (jax.random.uniform(km, (B, A, N)) > 0.3).astype(jnp.float32)
    mask = mask.at[:, :, 0].set(1.0)

    outs = model_forward(packed, cfg, city_embed, city_embed_mean, agent, mask)
    outs = jax.block_until_ready(outs)

    actions_logits, agents_logits, acts, acts_no_conflict, masks_out, value = outs
    assert actions_logits.shape == (B, A, N)
    assert agents_logits.shape == (B, A, A)
    assert acts.shape == (B, A) and acts_no_conflict.shape == (B, A)
    assert masks_out.shape == (B, A) and value.shape == (B, A, 1)
    assert bool(jnp.all(jnp.isfinite(actions_logits)))
    assert bool(jnp.all(jnp.isfinite(agents_logits)))
    assert bool(jnp.all(jnp.isfinite(value)))
    assert bool(jnp.all((acts >= 0) & (acts < N)))
    print("KERNEL_OK")
</pallas_src>

<mosaic_0001>
module attributes {stable_mosaic.version = 11 : i64} {
  func.func @_city_encoder_kernel(%arg0: i32, %arg1: memref<2x16x2xf32, #tpu.memory_space<vmem>>, %arg2: memref<2x128xbf16, #tpu.memory_space<vmem>>, %arg3: memref<1x128xf32, #tpu.memory_space<vmem>>, %arg4: memref<2x128x384xbf16, #tpu.memory_space<vmem>>, %arg5: memref<2x1x384xf32, #tpu.memory_space<vmem>>, %arg6: memref<2x128x128xbf16, #tpu.memory_space<vmem>>, %arg7: memref<2x1x128xf32, #tpu.memory_space<vmem>>, %arg8: memref<2x1x128xf32, #tpu.memory_space<vmem>>, %arg9: memref<2x1x128xf32, #tpu.memory_space<vmem>>, %arg10: memref<2x128x256xbf16, #tpu.memory_space<vmem>>, %arg11: memref<2x1x256xf32, #tpu.memory_space<vmem>>, %arg12: memref<2x256x128xbf16, #tpu.memory_space<vmem>>, %arg13: memref<2x1x128xf32, #tpu.memory_space<vmem>>, %arg14: memref<2x1x128xf32, #tpu.memory_space<vmem>>, %arg15: memref<2x1x128xf32, #tpu.memory_space<vmem>>, %arg16: memref<2x16x128xf32, #tpu.memory_space<vmem>>, %arg17: memref<2x1x128xf32, #tpu.memory_space<vmem>>) attributes {dimension_semantics = [#tpu.dimension_semantics<parallel>], iteration_bounds = array<i64: 2>, scalar_prefetch = 0 : i64, scratch_operands = 0 : i64, tpu.core_type = #tpu.core_type<tc>, window_params = [{transform_indices = @transform_0, window_bounds = array<i64: 2, 16, 2>}, {pipeline_mode = #tpu.pipeline_mode<synchronous>, transform_indices = @transform_1, window_bounds = array<i64: 2, 128>}, {pipeline_mode = #tpu.pipeline_mode<synchronous>, transform_indices = @transform_2, window_bounds = array<i64: 1, 128>}, {pipeline_mode = #tpu.pipeline_mode<synchronous>, transform_indices = @transform_3, window_bounds = array<i64: 2, 128, 384>}, {pipeline_mode = #tpu.pipeline_mode<synchronous>, transform_indices = @transform_4, window_bounds = array<i64: 2, 1, 384>}, {pipeline_mode = #tpu.pipeline_mode<synchronous>, transform_indices = @transform_5, window_bounds = array<i64: 2, 128, 128>}, {pipeline_mode = #tpu.pipeline_mode<synchronous>, transform_indices = @transform_6, window_bounds = array<i64: 2, 1, 128>}, {pipeline_mode = #tpu.pipeline_mode<synchronous>, transform_indices = @transform_7, window_bounds = array<i64: 2, 1, 128>}, {pipeline_mode = #tpu.pipeline_mode<synchronous>, transform_indices = @transform_8, window_bounds = array<i64: 2, 1, 128>}, {pipeline_mode = #tpu.pipeline_mode<synchronous>, transform_indices = @transform_9, window_bounds = array<i64: 2, 128, 256>}, {pipeline_mode = #tpu.pipeline_mode<synchronous>, transform_indices = @transform_10, window_bounds = array<i64: 2, 1, 256>}, {pipeline_mode = #tpu.pipeline_mode<synchronous>, transform_indices = @transform_11, window_bounds = array<i64: 2, 256, 128>}, {pipeline_mode = #tpu.pipeline_mode<synchronous>, transform_indices = @transform_12, window_bounds = array<i64: 2, 1, 128>}, {pipeline_mode = #tpu.pipeline_mode<synchronous>, transform_indices = @transform_13, window_bounds = array<i64: 2, 1, 128>}, {pipeline_mode = #tpu.pipeline_mode<synchronous>, transform_indices = @transform_14, window_bounds = array<i64: 2, 1, 128>}, {transform_indices = @transform_15, window_bounds = array<i64: 2, 16, 128>}, {transform_indices = @transform_16, window_bounds = array<i64: 2, 1, 128>}]} {
    %c0 = arith.constant 0 : index
    %c0_0 = arith.constant 0 : index
    %c0_1 = arith.constant 0 : index
    %0 = vector.load %arg1[%c0, %c0_0, %c0_1] : memref<2x16x2xf32, #tpu.memory_space<vmem>>, vector<1x16x2xf32>
    %1 = vector.shape_cast %0 : vector<1x16x2xf32> to vector<16x2xf32>
    %c1 = arith.constant 1 : index
    %c0_2 = arith.constant 0 : index
    %c0_3 = arith.constant 0 : index
    %2 = vector.load %arg1[%c1, %c0_2, %c0_3] : memref<2x16x2xf32, #tpu.memory_space<vmem>>, vector<1x16x2xf32>
    %3 = vector.shape_cast %2 : vector<1x16x2xf32> to vector<16x2xf32>
    %4 = tpu.concatenate %1, %3 in 0 : vector<16x2xf32>, vector<16x2xf32> -> vector<32x2xf32>
    %5 = arith.truncf %4 : vector<32x2xf32> to vector<32x2xbf16>
    %c0_4 = arith.constant 0 : index
    %c0_5 = arith.constant 0 : index
    %6 = vector.load %arg2[%c0_4, %c0_5] : memref<2x128xbf16, #tpu.memory_space<vmem>>, vector<2x128xbf16>
    %cst = arith.constant dense<0.000000e+00> : vector<32x128xf32>
    %7 = tpu.matmul %5, %6, %cst {dimension_numbers = #tpu.dot_dimension_numbers<[1], [0], [0], [1], [0, 0, 1, 1], [], []>} : vector<32x2xbf16>, vector<2x128xbf16>, vector<32x128xf32> -> vector<32x128xf32>
    %c0_6 = arith.constant 0 : index
    %c0_7 = arith.constant 0 : index
    %8 = vector.load %arg3[%c0_6, %c0_7] : memref<1x128xf32, #tpu.memory_space<vmem>>, vector<1x128xf32>
    %9 = vector.broadcast %8 : vector<1x128xf32> to vector<32x128xf32>
    %10 = arith.addf %7, %9 : vector<32x128xf32>
    %11 = arith.truncf %10 : vector<32x128xf32> to vector<32x128xbf16>
    %c0_8 = arith.constant 0 : index
    %c0_9 = arith.constant 0 : index
    %c0_10 = arith.constant 0 : index
    %12 = vector.load %arg4[%c0_8, %c0_9, %c0_10] : memref<2x128x384xbf16, #tpu.memory_space<vmem>>, vector<1x128x384xbf16>
    %13 = vector.shape_cast %12 : vector<1x128x384xbf16> to vector<128x384xbf16>
    %cst_11 = arith.constant dense<0.000000e+00> : vector<32x384xf32>
    %14 = tpu.matmul %11, %13, %cst_11 {dimension_numbers = #tpu.dot_dimension_numbers<[1], [0], [0], [1], [0, 0, 1, 1], [], []>} : vector<32x128xbf16>, vector<128x384xbf16>, vector<32x384xf32> -> vector<32x384xf32>
    %c0_12 = arith.constant 0 : index
    %c0_13 = arith.constant 0 : index
    %c0_14 = arith.constant 0 : index
    %15 = vector.load %arg5[%c0_12, %c0_13, %c0_14] : memref<2x1x384xf32, #tpu.memory_space<vmem>>, vector<1x1x384xf32>
    %16 = vector.shape_cast %15 : vector<1x1x384xf32> to vector<1x384xf32>
    %17 = vector.broadcast %16 : vector<1x384xf32> to vector<32x384xf32>
    %18 = arith.addf %14, %17 : vector<32x384xf32>
    %19 = vector.extract_strided_slice %18 {offsets = [0, 0], sizes = [32, 128], strides = [1, 1]} : vector<32x384xf32> to vector<32x128xf32>
    %20 = vector.extract_strided_slice %18 {offsets = [0, 128], sizes = [32, 128], strides = [1, 1]} : vector<32x384xf32> to vector<32x128xf32>
    %21 = vector.extract_strided_slice %18 {offsets = [0, 256], sizes = [32, 128], strides = [1, 1]} : vector<32x384xf32> to vector<32x128xf32>
    %cst_15 = arith.constant 0.176776692 : f32
    %22 = vector.broadcast %cst_15 : f32 to vector<32x128xf32>
    %23 = arith.mulf %19, %22 : vector<32x128xf32>
    %c0_16 = arith.constant 0 : index
    %c0_17 = arith.constant 0 : index
    %c0_18 = arith.constant 0 : index
    %24 = vector.load %arg6[%c0_16, %c0_17, %c0_18] : memref<2x128x128xbf16, #tpu.memory_space<vmem>>, vector<1x128x128xbf16>
    %25 = vector.shape_cast %24 : vector<1x128x128xbf16> to vector<128x128xbf16>
    %26 = vector.extract_strided_slice %23 {offsets = [0, 0], sizes = [16, 128], strides = [1, 1]} : vector<32x128xf32> to vector<16x128xf32>
    %27 = arith.truncf %26 : vector<16x128xf32> to vector<16x128xbf16>
    %28 = vector.extract_strided_slice %20 {offsets = [0, 0], sizes = [16, 128], strides = [1, 1]} : vector<32x128xf32> to vector<16x128xf32>
    %29 = arith.truncf %28 : vector<16x128xf32> to vector<16x128xbf16>
    %30 = vector.extract_strided_slice %21 {offsets = [0, 0], sizes = [16, 128], strides = [1, 1]} : vector<32x128xf32> to vector<16x128xf32>
    %31 = arith.truncf %30 : vector<16x128xf32> to vector<16x128xbf16>
    %32 = vector.extract_strided_slice %27 {offsets = [0, 0], sizes = [16, 32], strides = [1, 1]} : vector<16x128xbf16> to vector<16x32xbf16>
    %33 = vector.extract_strided_slice %29 {offsets = [0, 0], sizes = [16, 32], strides = [1, 1]} : vector<16x128xbf16> to vector<16x32xbf16>
    %cst_19 = arith.constant dense<0.000000e+00> : vector<16x16xf32>
    %34 = tpu.matmul %32, %33, %cst_19 {dimension_numbers = #tpu.dot_dimension_numbers<[1], [1], [0], [0], [0, 0, 1, 0], [], []>} : vector<16x32xbf16>, vector<16x32xbf16>, vector<16x16xf32> -> vector<16x16xf32>
    %cst_20 = arith.constant dense<0xFF800000> : vector<16xf32>
    %35 = vector.multi_reduction <maximumf>, %34, %cst_20 [1] : vector<16x16xf32> to vector<16xf32>
    %36 = vector.shape_cast %35 : vector<16xf32> to vector<16x1xf32>
    %37 = vector.broadcast %36 : vector<16x1xf32> to vector<16x16xf32>
    %38 = arith.subf %34, %37 : vector<16x16xf32>
    %39 = math.exp %38 : vector<16x16xf32>
    %cst_21 = arith.constant dense<0.000000e+00> : vector<16xf32>
    %40 = vector.multi_reduction <add>, %39, %cst_21 [1] : vector<16x16xf32> to vector<16xf32>
    %41 = vector.shape_cast %40 : vector<16xf32> to vector<16x1xf32>
    %42 = vector.broadcast %41 : vector<16x1xf32> to vector<16x16xf32>
    %43 = arith.divf %39, %42 : vector<16x16xf32>
    %44 = arith.truncf %43 : vector<16x16xf32> to vector<16x16xbf16>
    %45 = vector.extract_strided_slice %31 {offsets = [0, 0], sizes = [16, 32], strides = [1, 1]} : vector<16x128xbf16> to vector<16x32xbf16>
    %cst_22 = arith.constant dense<0.000000e+00> : vector<16x32xf32>
    %46 = tpu.matmul %44, %45, %cst_22 {dimension_numbers = #tpu.dot_dimension_numbers<[1], [0], [0], [1], [0, 0, 1, 1], [], []>} : vector<16x16xbf16>, vector<16x32xbf16>, vector<16x32xf32> -> vector<16x32xf32>
    %47 = arith.truncf %46 : vector<16x32xf32> to vector<16x32xbf16>
    %48 = vector.extract_strided_slice %25 {offsets = [0, 0], sizes = [32, 128], strides = [1, 1]} : vector<128x128xbf16> to vector<32x128xbf16>
    %cst_23 = arith.constant dense<0.000000e+00> : vector<16x128xf32>
    %49 = tpu.matmul %47, %48, %cst_23 {dimension_numbers = #tpu.dot_dimension_numbers<[1], [0], [0], [1], [0, 0, 1, 1], [], []>} : vector<16x32xbf16>, vector<32x128xbf16>, vector<16x128xf32> -> vector<16x128xf32>
    %50 = vector.extract_strided_slice %27 {offsets = [0, 32], sizes = [16, 32], strides = [1, 1]} : vector<16x128xbf16> to vector<16x32xbf16>
    %51 = vector.extract_strided_slice %29 {offsets = [0, 32], sizes = [16, 32], strides = [1, 1]} : vector<16x128xbf16> to vector<16x32xbf16>
    %cst_24 = arith.constant dense<0.000000e+00> : vector<16x16xf32>
    %52 = tpu.matmul %50, %51, %cst_24 {dimension_numbers = #tpu.dot_dimension_numbers<[1], [1], [0], [0], [0, 0, 1, 0], [], []>} : vector<16x32xbf16>, vector<16x32xbf16>, vector<16x16xf32> -> vector<16x16xf32>
    %cst_25 = arith.constant dense<0xFF800000> : vector<16xf32>
    %53 = vector.multi_reduction <maximumf>, %52, %cst_25 [1] : vector<16x16xf32> to vector<16xf32>
    %54 = vector.shape_cast %53 : vector<16xf32> to vector<16x1xf32>
    %55 = vector.broadcast %54 : vector<16x1xf32> to vector<16x16xf32>
    %56 = arith.subf %52, %55 : vector<16x16xf32>
    %57 = math.exp %56 : vector<16x16xf32>
    %cst_26 = arith.constant dense<0.000000e+00> : vector<16xf32>
    %58 = vector.multi_reduction <add>, %57, %cst_26 [1] : vector<16x16xf32> to vector<16xf32>
    %59 = vector.shape_cast %58 : vector<16xf32> to vector<16x1xf32>
    %60 = vector.broadcast %59 : vector<16x1xf32> to vector<16x16xf32>
    %61 = arith.divf %57, %60 : vector<16x16xf32>
    %62 = arith.truncf %61 : vector<16x16xf32> to vector<16x16xbf16>
    %63 = vector.extract_strided_slice %31 {offsets = [0, 32], sizes = [16, 32], strides = [1, 1]} : vector<16x128xbf16> to vector<16x32xbf16>
    %cst_27 = arith.constant dense<0.000000e+00> : vector<16x32xf32>
    %64 = tpu.matmul %62, %63, %cst_27 {dimension_numbers = #tpu.dot_dimension_numbers<[1], [0], [0], [1], [0, 0, 1, 1], [], []>} : vector<16x16xbf16>, vector<16x32xbf16>, vector<16x32xf32> -> vector<16x32xf32>
    %65 = arith.truncf %64 : vector<16x32xf32> to vector<16x32xbf16>
    %66 = vector.extract_strided_slice %25 {offsets = [32, 0], sizes = [32, 128], strides = [1, 1]} : vector<128x128xbf16> to vector<32x128xbf16>
    %cst_28 = arith.constant dense<0.000000e+00> : vector<16x128xf32>
    %67 = tpu.matmul %65, %66, %cst_28 {dimension_numbers = #tpu.dot_dimension_numbers<[1], [0], [0], [1], [0, 0, 1, 1], [], []>} : vector<16x32xbf16>, vector<32x128xbf16>, vector<16x128xf32> -> vector<16x128xf32>
    %68 = arith.addf %49, %67 : vector<16x128xf32>
    %69 = vector.extract_strided_slice %27 {offsets = [0, 64], sizes = [16, 32], strides = [1, 1]} : vector<16x128xbf16> to vector<16x32xbf16>
    %70 = vector.extract_strided_slice %29 {offsets = [0, 64], sizes = [16, 32], strides = [1, 1]} : vector<16x128xbf16> to vector<16x32xbf16>
    %cst_29 = arith.constant dense<0.000000e+00> : vector<16x16xf32>
    %71 = tpu.matmul %69, %70, %cst_29 {dimension_numbers = #tpu.dot_dimension_numbers<[1], [1], [0], [0], [0, 0, 1, 0], [], []>} : vector<16x32xbf16>, vector<16x32xbf16>, vector<16x16xf32> -> vector<16x16xf32>
    %cst_30 = arith.constant dense<0xFF800000> : vector<16xf32>
    %72 = vector.multi_reduction <maximumf>, %71, %cst_30 [1] : vector<16x16xf32> to vector<16xf32>
    %73 = vector.shape_cast %72 : vector<16xf32> to vector<16x1xf32>
    %74 = vector.broadcast %73 : vector<16x1xf32> to vector<16x16xf32>
    %75 = arith.subf %71, %74 : vector<16x16xf32>
    %76 = math.exp %75 : vector<16x16xf32>
    %cst_31 = arith.constant dense<0.000000e+00> : vector<16xf32>
    %77 = vector.multi_reduction <add>, %76, %cst_31 [1] : vector<16x16xf32> to vector<16xf32>
    %78 = vector.shape_cast %77 : vector<16xf32> to vector<16x1xf32>
    %79 = vector.broadcast %78 : vector<16x1xf32> to vector<16x16xf32>
    %80 = arith.divf %76, %79 : vector<16x16xf32>
    %81 = arith.truncf %80 : vector<16x16xf32> to vector<16x16xbf16>
    %82 = vector.extract_strided_slice %31 {offsets = [0, 64], sizes = [16, 32], strides = [1, 1]} : vector<16x128xbf16> to vector<16x32xbf16>
    %cst_32 = arith.constant dense<0.000000e+00> : vector<16x32xf32>
    %83 = tpu.matmul %81, %82, %cst_32 {dimension_numbers = #tpu.dot_dimension_numbers<[1], [0], [0], [1], [0, 0, 1, 1], [], []>} : vector<16x16xbf16>, vector<16x32xbf16>, vector<16x32xf32> -> vector<16x32xf32>
    %84 = arith.truncf %83 : vector<16x32xf32> to vector<16x32xbf16>
    %85 = vector.extract_strided_slice %25 {offsets = [64, 0], sizes = [32, 128], strides = [1, 1]} : vector<128x128xbf16> to vector<32x128xbf16>
    %cst_33 = arith.constant dense<0.000000e+00> : vector<16x128xf32>
    %86 = tpu.matmul %84, %85, %cst_33 {dimension_numbers = #tpu.dot_dimension_numbers<[1], [0], [0], [1], [0, 0, 1, 1], [], []>} : vector<16x32xbf16>, vector<32x128xbf16>, vector<16x128xf32> -> vector<16x128xf32>
    %87 = arith.addf %68, %86 : vector<16x128xf32>
    %88 = vector.extract_strided_slice %27 {offsets = [0, 96], sizes = [16, 32], strides = [1, 1]} : vector<16x128xbf16> to vector<16x32xbf16>
    %89 = vector.extract_strided_slice %29 {offsets = [0, 96], sizes = [16, 32], strides = [1, 1]} : vector<16x128xbf16> to vector<16x32xbf16>
    %cst_34 = arith.constant dense<0.000000e+00> : vector<16x16xf32>
    %90 = tpu.matmul %88, %89, %cst_34 {dimension_numbers = #tpu.dot_dimension_numbers<[1], [1], [0], [0], [0, 0, 1, 0], [], []>} : vector<16x32xbf16>, vector<16x32xbf16>, vector<16x16xf32> -> vector<16x16xf32>
    %cst_35 = arith.constant dense<0xFF800000> : vector<16xf32>
    %91 = vector.multi_reduction <maximumf>, %90, %cst_35 [1] : vector<16x16xf32> to vector<16xf32>
    %92 = vector.shape_cast %91 : vector<16xf32> to vector<16x1xf32>
    %93 = vector.broadcast %92 : vector<16x1xf32> to vector<16x16xf32>
    %94 = arith.subf %90, %93 : vector<16x16xf32>
    %95 = math.exp %94 : vector<16x16xf32>
    %cst_36 = arith.constant dense<0.000000e+00> : vector<16xf32>
    %96 = vector.multi_reduction <add>, %95, %cst_36 [1] : vector<16x16xf32> to vector<16xf32>
    %97 = vector.shape_cast %96 : vector<16xf32> to vector<16x1xf32>
    %98 = vector.broadcast %97 : vector<16x1xf32> to vector<16x16xf32>
    %99 = arith.divf %95, %98 : vector<16x16xf32>
    %100 = arith.truncf %99 : vector<16x16xf32> to vector<16x16xbf16>
    %101 = vector.extract_strided_slice %31 {offsets = [0, 96], sizes = [16, 32], strides = [1, 1]} : vector<16x128xbf16> to vector<16x32xbf16>
    %cst_37 = arith.constant dense<0.000000e+00> : vector<16x32xf32>
    %102 = tpu.matmul %100, %101, %cst_37 {dimension_numbers = #tpu.dot_dimension_numbers<[1], [0], [0], [1], [0, 0, 1, 1], [], []>} : vector<16x16xbf16>, vector<16x32xbf16>, vector<16x32xf32> -> vector<16x32xf32>
    %103 = arith.truncf %102 : vector<16x32xf32> to vector<16x32xbf16>
    %104 = vector.extract_strided_slice %25 {offsets = [96, 0], sizes = [32, 128], strides = [1, 1]} : vector<128x128xbf16> to vector<32x128xbf16>
    %cst_38 = arith.constant dense<0.000000e+00> : vector<16x128xf32>
    %105 = tpu.matmul %103, %104, %cst_38 {dimension_numbers = #tpu.dot_dimension_numbers<[1], [0], [0], [1], [0, 0, 1, 1], [], []>} : vector<16x32xbf16>, vector<32x128xbf16>, vector<16x128xf32> -> vector<16x128xf32>
    %106 = arith.addf %87, %105 : vector<16x128xf32>
    %107 = vector.extract_strided_slice %23 {offsets = [16, 0], sizes = [16, 128], strides = [1, 1]} : vector<32x128xf32> to vector<16x128xf32>
    %108 = arith.truncf %107 : vector<16x128xf32> to vector<16x128xbf16>
    %109 = vector.extract_strided_slice %20 {offsets = [16, 0], sizes = [16, 128], strides = [1, 1]} : vector<32x128xf32> to vector<16x128xf32>
    %110 = arith.truncf %109 : vector<16x128xf32> to vector<16x128xbf16>
    %111 = vector.extract_strided_slice %21 {offsets = [16, 0], sizes = [16, 128], strides = [1, 1]} : vector<32x128xf32> to vector<16x128xf32>
    %112 = arith.truncf %111 : vector<16x128xf32> to vector<16x128xbf16>
    %113 = vector.extract_strided_slice %108 {offsets = [0, 0], sizes = [16, 32], strides = [1, 1]} : vector<16x128xbf16> to vector<16x32xbf16>
    %114 = vector.extract_strided_slice %110 {offsets = [0, 0], sizes = [16, 32], strides = [1, 1]} : vector<16x128xbf16> to vector<16x32xbf16>
    %cst_39 = arith.constant dense<0.000000e+00> : vector<16x16xf32>
    %115 = tpu.matmul %113, %114, %cst_39 {dimension_numbers = #tpu.dot_dimension_numbers<[1], [1], [0], [0], [0, 0, 1, 0], [], []>} : vector<16x32xbf16>, vector<16x32xbf16>, vector<16x16xf32> -> vector<16x16xf32>
    %cst_40 = arith.constant dense<0xFF800000> : vector<16xf32>
    %116 = vector.multi_reduction <maximumf>, %115, %cst_40 [1] : vector<16x16xf32> to vector<16xf32>
    %117 = vector.shape_cast %116 : vector<16xf32> to vector<16x1xf32>
    %118 = vector.broadcast %117 : vector<16x1xf32> to vector<16x16xf32>
    %119 = arith.subf %115, %118 : vector<16x16xf32>
    %120 = math.exp %119 : vector<16x16xf32>
    %cst_41 = arith.constant dense<0.000000e+00> : vector<16xf32>
    %121 = vector.multi_reduction <add>, %120, %cst_41 [1] : vector<16x16xf32> to vector<16xf32>
    %122 = vector.shape_cast %121 : vector<16xf32> to vector<16x1xf32>
    %123 = vector.broadcast %122 : vector<16x1xf32> to vector<16x16xf32>
    %124 = arith.divf %120, %123 : vector<16x16xf32>
    %125 = arith.truncf %124 : vector<16x16xf32> to vector<16x16xbf16>
    %126 = vector.extract_strided_slice %112 {offsets = [0, 0], sizes = [16, 32], strides = [1, 1]} : vector<16x128xbf16> to vector<16x32xbf16>
    %cst_42 = arith.constant dense<0.000000e+00> : vector<16x32xf32>
    %127 = tpu.matmul %125, %126, %cst_42 {dimension_numbers = #tpu.dot_dimension_numbers<[1], [0], [0], [1], [0, 0, 1, 1], [], []>} : vector<16x16xbf16>, vector<16x32xbf16>, vector<16x32xf32> -> vector<16x32xf32>
    %128 = arith.truncf %127 : vector<16x32xf32> to vector<16x32xbf16>
    %129 = vector.extract_strided_slice %25 {offsets = [0, 0], sizes = [32, 128], strides = [1, 1]} : vector<128x128xbf16> to vector<32x128xbf16>
    %cst_43 = arith.constant dense<0.000000e+00> : vector<16x128xf32>
    %130 = tpu.matmul %128, %129, %cst_43 {dimension_numbers = #tpu.dot_dimension_numbers<[1], [0], [0], [1], [0, 0, 1, 1], [], []>} : vector<16x32xbf16>, vector<32x128xbf16>, vector<16x128xf32> -> vector<16x128xf32>
    %131 = vector.extract_strided_slice %108 {offsets = [0, 32], sizes = [16, 32], strides = [1, 1]} : vector<16x128xbf16> to vector<16x32xbf16>
    %132 = vector.extract_strided_slice %110 {offsets = [0, 32], sizes = [16, 32], strides = [1, 1]} : vector<16x128xbf16> to vector<16x32xbf16>
    %cst_44 = arith.constant dense<0.000000e+00> : vector<16x16xf32>
    %133 = tpu.matmul %131, %132, %cst_44 {dimension_numbers = #tpu.dot_dimension_numbers<[1], [1], [0], [0], [0, 0, 1, 0], [], []>} : vector<16x32xbf16>, vector<16x32xbf16>, vector<16x16xf32> -> vector<16x16xf32>
    %cst_45 = arith.constant dense<0xFF800000> : vector<16xf32>
    %134 = vector.multi_reduction <maximumf>, %133, %cst_45 [1] : vector<16x16xf32> to vector<16xf32>
    %135 = vector.shape_cast %134 : vector<16xf32> to vector<16x1xf32>
    %136 = vector.broadcast %135 : vector<16x1xf32> to vector<16x16xf32>
    %137 = arith.subf %133, %136 : vector<16x16xf32>
    %138 = math.exp %137 : vector<16x16xf32>
    %cst_46 = arith.constant dense<0.000000e+00> : vector<16xf32>
    %139 = vector.multi_reduction <add>, %138, %cst_46 [1] : vector<16x16xf32> to vector<16xf32>
    %140 = vector.shape_cast %139 : vector<16xf32> to vector<16x1xf32>
    %141 = vector.broadcast %140 : vector<16x1xf32> to vector<16x16xf32>
    %142 = arith.divf %138, %141 : vector<16x16xf32>
    %143 = arith.truncf %142 : vector<16x16xf32> to vector<16x16xbf16>
    %144 = vector.extract_strided_slice %112 {offsets = [0, 32], sizes = [16, 32], strides = [1, 1]} : vector<16x128xbf16> to vector<16x32xbf16>
    %cst_47 = arith.constant dense<0.000000e+00> : vector<16x32xf32>
    %145 = tpu.matmul %143, %144, %cst_47 {dimension_numbers = #tpu.dot_dimension_numbers<[1], [0], [0], [1], [0, 0, 1, 1], [], []>} : vector<16x16xbf16>, vector<16x32xbf16>, vector<16x32xf32> -> vector<16x32xf32>
    %146 = arith.truncf %145 : vector<16x32xf32> to vector<16x32xbf16>
    %147 = vector.extract_strided_slice %25 {offsets = [32, 0], sizes = [32, 128], strides = [1, 1]} : vector<128x128xbf16> to vector<32x128xbf16>
    %cst_48 = arith.constant dense<0.000000e+00> : vector<16x128xf32>
    %148 = tpu.matmul %146, %147, %cst_48 {dimension_numbers = #tpu.dot_dimension_numbers<[1], [0], [0], [1], [0, 0, 1, 1], [], []>} : vector<16x32xbf16>, vector<32x128xbf16>, vector<16x128xf32> -> vector<16x128xf32>
    %149 = arith.addf %130, %148 : vector<16x128xf32>
    %150 = vector.extract_strided_slice %108 {offsets = [0, 64], sizes = [16, 32], strides = [1, 1]} : vector<16x128xbf16> to vector<16x32xbf16>
    %151 = vector.extract_strided_slice %110 {offsets = [0, 64], sizes = [16, 32], strides = [1, 1]} : vector<16x128xbf16> to vector<16x32xbf16>
    %cst_49 = arith.constant dense<0.000000e+00> : vector<16x16xf32>
    %152 = tpu.matmul %150, %151, %cst_49 {dimension_numbers = #tpu.dot_dimension_numbers<[1], [1], [0], [0], [0, 0, 1, 0], [], []>} : vector<16x32xbf16>, vector<16x32xbf16>, vector<16x16xf32> -> vector<16x16xf32>
    %cst_50 = arith.constant dense<0xFF800000> : vector<16xf32>
    %153 = vector.multi_reduction <maximumf>, %152, %cst_50 [1] : vector<16x16xf32> to vector<16xf32>
    %154 = vector.shape_cast %153 : vector<16xf32> to vector<16x1xf32>
    %155 = vector.broadcast %154 : vector<16x1xf32> to vector<16x16xf32>
    %156 = arith.subf %152, %155 : vector<16x16xf32>
    %157 = math.exp %156 : vector<16x16xf32>
    %cst_51 = arith.constant dense<0.000000e+00> : vector<16xf32>
    %158 = vector.multi_reduction <add>, %157, %cst_51 [1] : vector<16x16xf32> to vector<16xf32>
    %159 = vector.shape_cast %158 : vector<16xf32> to vector<16x1xf32>
    %160 = vector.broadcast %159 : vector<16x1xf32> to vector<16x16xf32>
    %161 = arith.divf %157, %160 : vector<16x16xf32>
    %162 = arith.truncf %161 : vector<16x16xf32> to vector<16x16xbf16>
    %163 = vector.extract_strided_slice %112 {offsets = [0, 64], sizes = [16, 32], strides = [1, 1]} : vector<16x128xbf16> to vector<16x32xbf16>
    %cst_52 = arith.constant dense<0.000000e+00> : vector<16x32xf32>
    %164 = tpu.matmul %162, %163, %cst_52 {dimension_numbers = #tpu.dot_dimension_numbers<[1], [0], [0], [1], [0, 0, 1, 1], [], []>} : vector<16x16xbf16>, vector<16x32xbf16>, vector<16x32xf32> -> vector<16x32xf32>
    %165 = arith.truncf %164 : vector<16x32xf32> to vector<16x32xbf16>
    %166 = vector.extract_strided_slice %25 {offsets = [64, 0], sizes = [32, 128], strides = [1, 1]} : vector<128x128xbf16> to vector<32x128xbf16>
    %cst_53 = arith.constant dense<0.000000e+00> : vector<16x128xf32>
    %167 = tpu.matmul %165, %166, %cst_53 {dimension_numbers = #tpu.dot_dimension_numbers<[1], [0], [0], [1], [0, 0, 1, 1], [], []>} : vector<16x32xbf16>, vector<32x128xbf16>, vector<16x128xf32> -> vector<16x128xf32>
    %168 = arith.addf %149, %167 : vector<16x128xf32>
    %169 = vector.extract_strided_slice %108 {offsets = [0, 96], sizes = [16, 32], strides = [1, 1]} : vector<16x128xbf16> to vector<16x32xbf16>
    %170 = vector.extract_strided_slice %110 {offsets = [0, 96], sizes = [16, 32], strides = [1, 1]} : vector<16x128xbf16> to vector<16x32xbf16>
    %cst_54 = arith.constant dense<0.000000e+00> : vector<16x16xf32>
    %171 = tpu.matmul %169, %170, %cst_54 {dimension_numbers = #tpu.dot_dimension_numbers<[1], [1], [0], [0], [0, 0, 1, 0], [], []>} : vector<16x32xbf16>, vector<16x32xbf16>, vector<16x16xf32> -> vector<16x16xf32>
    %cst_55 = arith.constant dense<0xFF800000> : vector<16xf32>
    %172 = vector.multi_reduction <maximumf>, %171, %cst_55 [1] : vector<16x16xf32> to vector<16xf32>
    %173 = vector.shape_cast %172 : vector<16xf32> to vector<16x1xf32>
    %174 = vector.broadcast %173 : vector<16x1xf32> to vector<16x16xf32>
    %175 = arith.subf %171, %174 : vector<16x16xf32>
    %176 = math.exp %175 : vector<16x16xf32>
    %cst_56 = arith.constant dense<0.000000e+00> : vector<16xf32>
    %177 = vector.multi_reduction <add>, %176, %cst_56 [1] : vector<16x16xf32> to vector<16xf32>
    %178 = vector.shape_cast %177 : vector<16xf32> to vector<16x1xf32>
    %179 = vector.broadcast %178 : vector<16x1xf32> to vector<16x16xf32>
    %180 = arith.divf %176, %179 : vector<16x16xf32>
    %181 = arith.truncf %180 : vector<16x16xf32> to vector<16x16xbf16>
    %182 = vector.extract_strided_slice %112 {offsets = [0, 96], sizes = [16, 32], strides = [1, 1]} : vector<16x128xbf16> to vector<16x32xbf16>
    %cst_57 = arith.constant dense<0.000000e+00> : vector<16x32xf32>
    %183 = tpu.matmul %181, %182, %cst_57 {dimension_numbers = #tpu.dot_dimension_numbers<[1], [0], [0], [1], [0, 0, 1, 1], [], []>} : vector<16x16xbf16>, vector<16x32xbf16>, vector<16x32xf32> -> vector<16x32xf32>
    %184 = arith.truncf %183 : vector<16x32xf32> to vector<16x32xbf16>
    %185 = vector.extract_strided_slice %25 {offsets = [96, 0], sizes = [32, 128], strides = [1, 1]} : vector<128x128xbf16> to vector<32x128xbf16>
    %cst_58 = arith.constant dense<0.000000e+00> : vector<16x128xf32>
    %186 = tpu.matmul %184, %185, %cst_58 {dimension_numbers = #tpu.dot_dimension_numbers<[1], [0], [0], [1], [0, 0, 1, 1], [], []>} : vector<16x32xbf16>, vector<32x128xbf16>, vector<16x128xf32> -> vector<16x128xf32>
    %187 = arith.addf %168, %186 : vector<16x128xf32>
    %188 = tpu.concatenate %106, %187 in 0 : vector<16x128xf32>, vector<16x128xf32> -> vector<32x128xf32>
    %c0_59 = arith.constant 0 : index
    %c0_60 = arith.constant 0 : index
    %c0_61 = arith.constant 0 : index
    %189 = vector.load %arg7[%c0_59, %c0_60, %c0_61] : memref<2x1x128xf32, #tpu.memory_space<vmem>>, vector<1x1x128xf32>
    %190 = vector.shape_cast %189 : vector<1x1x128xf32> to vector<1x128xf32>
    %191 = vector.broadcast %190 : vector<1x128xf32> to vector<32x128xf32>
    %192 = arith.addf %188, %191 : vector<32x128xf32>
    %193 = arith.addf %10, %192 : vector<32x128xf32>
    %c0_62 = arith.constant 0 : index
    %c0_63 = arith.constant 0 : index
    %c0_64 = arith.constant 0 : index
    %194 = vector.load %arg8[%c0_62, %c0_63, %c0_64] : memref<2x1x128xf32, #tpu.memory_space<vmem>>, vector<1x1x128xf32>
    %195 = vector.shape_cast %194 : vector<1x1x128xf32> to vector<1x128xf32>
    %c0_65 = arith.constant 0 : index
    %c0_66 = arith.constant 0 : index
    %c0_67 = arith.constant 0 : index
    %196 = vector.load %arg9[%c0_65, %c0_66, %c0_67] : memref<2x1x128xf32, #tpu.memory_space<vmem>>, vector<1x1x128xf32>
    %197 = vector.shape_cast %196 : vector<1x1x128xf32> to vector<1x128xf32>
    %cst_68 = arith.constant dense<0.000000e+00> : vector<32xf32>
    %198 = vector.multi_reduction <add>, %193, %cst_68 [1] : vector<32x128xf32> to vector<32xf32>
    %199 = vector.shape_cast %198 : vector<32xf32> to vector<32x1xf32>
    %cst_69 = arith.constant 1.280000e+02 : f32
    %200 = vector.broadcast %cst_69 : f32 to vector<32x1xf32>
    %201 = arith.divf %199, %200 : vector<32x1xf32>
    %202 = arith.mulf %193, %193 : vector<32x128xf32>
    %cst_70 = arith.constant dense<0.000000e+00> : vector<32xf32>
    %203 = vector.multi_reduction <add>, %202, %cst_70 [1] : vector<32x128xf32> to vector<32xf32>
    %204 = vector.shape_cast %203 : vector<32xf32> to vector<32x1xf32>
    %cst_71 = arith.constant 1.280000e+02 : f32
    %205 = vector.broadcast %cst_71 : f32 to vector<32x1xf32>
    %206 = arith.divf %204, %205 : vector<32x1xf32>
    %207 = arith.mulf %201, %201 : vector<32x1xf32>
    %208 = arith.subf %206, %207 : vector<32x1xf32>
    %cst_72 = arith.constant 0.000000e+00 : f32
    %209 = vector.broadcast %cst_72 : f32 to vector<32x1xf32>
    %210 = arith.maximumf %208, %209 : vector<32x1xf32>
    %211 = vector.broadcast %201 : vector<32x1xf32> to vector<32x128xf32>
    %212 = arith.subf %193, %211 : vector<32x128xf32>
    %cst_73 = arith.constant 9.99999974E-6 : f32
    %213 = vector.broadcast %cst_73 : f32 to vector<32x1xf32>
    %214 = arith.addf %210, %213 : vector<32x1xf32>
    %215 = math.rsqrt %214 : vector<32x1xf32>
    %216 = vector.broadcast %215 : vector<32x1xf32> to vector<32x128xf32>
    %217 = arith.mulf %212, %216 : vector<32x128xf32>
    %218 = vector.broadcast %195 : vector<1x128xf32> to vector<32x128xf32>
    %219 = arith.mulf %217, %218 : vector<32x128xf32>
    %220 = vector.broadcast %197 : vector<1x128xf32> to vector<32x128xf32>
    %221 = arith.addf %219, %220 : vector<32x128xf32>
    %222 = arith.truncf %221 : vector<32x128xf32> to vector<32x128xbf16>
    %c0_74 = arith.constant 0 : index
    %c0_75 = arith.constant 0 : index
    %c0_76 = arith.constant 0 : index
    %223 = vector.load %arg10[%c0_74, %c0_75, %c0_76] : memref<2x128x256xbf16, #tpu.memory_space<vmem>>, vector<1x128x256xbf16>
    %224 = vector.shape_cast %223 : vector<1x128x256xbf16> to vector<128x256xbf16>
    %cst_77 = arith.constant dense<0.000000e+00> : vector<32x256xf32>
    %225 = tpu.matmul %222, %224, %cst_77 {dimension_numbers = #tpu.dot_dimension_numbers<[1], [0], [0], [1], [0, 0, 1, 1], [], []>} : vector<32x128xbf16>, vector<128x256xbf16>, vector<32x256xf32> -> vector<32x256xf32>
    %c0_78 = arith.constant 0 : index
    %c0_79 = arith.constant 0 : index
    %c0_80 = arith.constant 0 : index
    %226 = vector.load %arg11[%c0_78, %c0_79, %c0_80] : memref<2x1x256xf32, #tpu.memory_space<vmem>>, vector<1x1x256xf32>
    %227 = vector.shape_cast %226 : vector<1x1x256xf32> to vector<1x256xf32>
    %228 = vector.broadcast %227 : vector<1x256xf32> to vector<32x256xf32>
    %229 = arith.addf %225, %228 : vector<32x256xf32>
    %cst_81 = arith.constant 0.000000e+00 : f32
    %230 = vector.broadcast %cst_81 : f32 to vector<32x256xf32>
    %231 = arith.maximumf %229, %230 : vector<32x256xf32>
    %232 = arith.truncf %231 : vector<32x256xf32> to vector<32x256xbf16>
    %c0_82 = arith.constant 0 : index
    %c0_83 = arith.constant 0 : index
    %c0_84 = arith.constant 0 : index
    %233 = vector.load %arg12[%c0_82, %c0_83, %c0_84] : memref<2x256x128xbf16, #tpu.memory_space<vmem>>, vector<1x256x128xbf16>
    %234 = vector.shape_cast %233 : vector<1x256x128xbf16> to vector<256x128xbf16>
    %cst_85 = arith.constant dense<0.000000e+00> : vector<32x128xf32>
    %235 = tpu.matmul %232, %234, %cst_85 {dimension_numbers = #tpu.dot_dimension_numbers<[1], [0], [0], [1], [0, 0, 1, 1], [], []>} : vector<32x256xbf16>, vector<256x128xbf16>, vector<32x128xf32> -> vector<32x128xf32>
    %c0_86 = arith.constant 0 : index
    %c0_87 = arith.constant 0 : index
    %c0_88 = arith.constant 0 : index
    %236 = vector.load %arg13[%c0_86, %c0_87, %c0_88] : memref<2x1x128xf32, #tpu.memory_space<vmem>>, vector<1x1x128xf32>
    %237 = vector.shape_cast %236 : vector<1x1x128xf32> to vector<1x128xf32>
    %238 = vector.broadcast %237 : vector<1x128xf32> to vector<32x128xf32>
    %239 = arith.addf %235, %238 : vector<32x128xf32>
    %240 = arith.addf %221, %239 : vector<32x128xf32>
    %c0_89 = arith.constant 0 : index
    %c0_90 = arith.constant 0 : index
    %c0_91 = arith.constant 0 : index
    %241 = vector.load %arg14[%c0_89, %c0_90, %c0_91] : memref<2x1x128xf32, #tpu.memory_space<vmem>>, vector<1x1x128xf32>
    %242 = vector.shape_cast %241 : vector<1x1x128xf32> to vector<1x128xf32>
    %c0_92 = arith.constant 0 : index
    %c0_93 = arith.constant 0 : index
    %c0_94 = arith.constant 0 : index
    %243 = vector.load %arg15[%c0_92, %c0_93, %c0_94] : memref<2x1x128xf32, #tpu.memory_space<vmem>>, vector<1x1x128xf32>
    %244 = vector.shape_cast %243 : vector<1x1x128xf32> to vector<1x128xf32>
    %cst_95 = arith.constant dense<0.000000e+00> : vector<32xf32>
    %245 = vector.multi_reduction <add>, %240, %cst_95 [1] : vector<32x128xf32> to vector<32xf32>
    %246 = vector.shape_cast %245 : vector<32xf32> to vector<32x1xf32>
    %cst_96 = arith.constant 1.280000e+02 : f32
    %247 = vector.broadcast %cst_96 : f32 to vector<32x1xf32>
    %248 = arith.divf %246, %247 : vector<32x1xf32>
    %249 = arith.mulf %240, %240 : vector<32x128xf32>
    %cst_97 = arith.constant dense<0.000000e+00> : vector<32xf32>
    %250 = vector.multi_reduction <add>, %249, %cst_97 [1] : vector<32x128xf32> to vector<32xf32>
    %251 = vector.shape_cast %250 : vector<32xf32> to vector<32x1xf32>
    %cst_98 = arith.constant 1.280000e+02 : f32
    %252 = vector.broadcast %cst_98 : f32 to vector<32x1xf32>
    %253 = arith.divf %251, %252 : vector<32x1xf32>
    %254 = arith.mulf %248, %248 : vector<32x1xf32>
    %255 = arith.subf %253, %254 : vector<32x1xf32>
    %cst_99 = arith.constant 0.000000e+00 : f32
    %256 = vector.broadcast %cst_99 : f32 to vector<32x1xf32>
    %257 = arith.maximumf %255, %256 : vector<32x1xf32>
    %258 = vector.broadcast %248 : vector<32x1xf32> to vector<32x128xf32>
    %259 = arith.subf %240, %258 : vector<32x128xf32>
    %cst_100 = arith.constant 9.99999974E-6 : f32
    %260 = vector.broadcast %cst_100 : f32 to vector<32x1xf32>
    %261 = arith.addf %257, %260 : vector<32x1xf32>
    %262 = math.rsqrt %261 : vector<32x1xf32>
    %263 = vector.broadcast %262 : vector<32x1xf32> to vector<32x128xf32>
    %264 = arith.mulf %259, %263 : vector<32x128xf32>
    %265 = vector.broadcast %242 : vector<1x128xf32> to vector<32x128xf32>
    %266 = arith.mulf %264, %265 : vector<32x128xf32>
    %267 = vector.broadcast %244 : vector<1x128xf32> to vector<32x128xf32>
    %268 = arith.addf %266, %267 : vector<32x128xf32>
    %269 = arith.truncf %268 : vector<32x128xf32> to vector<32x128xbf16>
    %c1_101 = arith.constant 1 : index
    %c0_102 = arith.constant 0 : index
    %c0_103 = arith.constant 0 : index
    %270 = vector.load %arg4[%c1_101, %c0_102, %c0_103] : memref<2x128x384xbf16, #tpu.memory_space<vmem>>, vector<1x128x384xbf16>
    %271 = vector.shape_cast %270 : vector<1x128x384xbf16> to vector<128x384xbf16>
    %cst_104 = arith.constant dense<0.000000e+00> : vector<32x384xf32>
    %272 = tpu.matmul %269, %271, %cst_104 {dimension_numbers = #tpu.dot_dimension_numbers<[1], [0], [0], [1], [0, 0, 1, 1], [], []>} : vector<32x128xbf16>, vector<128x384xbf16>, vector<32x384xf32> -> vector<32x384xf32>
    %c1_105 = arith.constant 1 : index
    %c0_106 = arith.constant 0 : index
    %c0_107 = arith.constant 0 : index
    %273 = vector.load %arg5[%c1_105, %c0_106, %c0_107] : memref<2x1x384xf32, #tpu.memory_space<vmem>>, vector<1x1x384xf32>
    %274 = vector.shape_cast %273 : vector<1x1x384xf32> to vector<1x384xf32>
    %275 = vector.broadcast %274 : vector<1x384xf32> to vector<32x384xf32>
    %276 = arith.addf %272, %275 : vector<32x384xf32>
    %277 = vector.extract_strided_slice %276 {offsets = [0, 0], sizes = [32, 128], strides = [1, 1]} : vector<32x384xf32> to vector<32x128xf32>
    %278 = vector.extract_strided_slice %276 {offsets = [0, 128], sizes = [32, 128], strides = [1, 1]} : vector<32x384xf32> to vector<32x128xf32>
    %279 = vector.extract_strided_slice %276 {offsets = [0, 256], sizes = [32, 128], strides = [1, 1]} : vector<32x384xf32> to vector<32x128xf32>
    %cst_108 = arith.constant 0.176776692 : f32
    %280 = vector.broadcast %cst_108 : f32 to vector<32x128xf32>
    %281 = arith.mulf %277, %280 : vector<32x128xf32>
    %c1_109 = arith.constant 1 : index
    %c0_110 = arith.constant 0 : index
    %c0_111 = arith.constant 0 : index
    %282 = vector.load %arg6[%c1_109, %c0_110, %c0_111] : memref<2x128x128xbf16, #tpu.memory_space<vmem>>, vector<1x128x128xbf16>
    %283 = vector.shape_cast %282 : vector<1x128x128xbf16> to vector<128x128xbf16>
    %284 = vector.extract_strided_slice %281 {offsets = [0, 0], sizes = [16, 128], strides = [1, 1]} : vector<32x128xf32> to vector<16x128xf32>
    %285 = arith.truncf %284 : vector<16x128xf32> to vector<16x128xbf16>
    %286 = vector.extract_strided_slice %278 {offsets = [0, 0], sizes = [16, 128], strides = [1, 1]} : vector<32x128xf32> to vector<16x128xf32>
    %287 = arith.truncf %286 : vector<16x128xf32> to vector<16x128xbf16>
    %288 = vector.extract_strided_slice %279 {offsets = [0, 0], sizes = [16, 128], strides = [1, 1]} : vector<32x128xf32> to vector<16x128xf32>
    %289 = arith.truncf %288 : vector<16x128xf32> to vector<16x128xbf16>
    %290 = vector.extract_strided_slice %285 {offsets = [0, 0], sizes = [16, 32], strides = [1, 1]} : vector<16x128xbf16> to vector<16x32xbf16>
    %291 = vector.extract_strided_slice %287 {offsets = [0, 0], sizes = [16, 32], strides = [1, 1]} : vector<16x128xbf16> to vector<16x32xbf16>
    %cst_112 = arith.constant dense<0.000000e+00> : vector<16x16xf32>
    %292 = tpu.matmul %290, %291, %cst_112 {dimension_numbers = #tpu.dot_dimension_numbers<[1], [1], [0], [0], [0, 0, 1, 0], [], []>} : vector<16x32xbf16>, vector<16x32xbf16>, vector<16x16xf32> -> vector<16x16xf32>
    %cst_113 = arith.constant dense<0xFF800000> : vector<16xf32>
    %293 = vector.multi_reduction <maximumf>, %292, %cst_113 [1] : vector<16x16xf32> to vector<16xf32>
    %294 = vector.shape_cast %293 : vector<16xf32> to vector<16x1xf32>
    %295 = vector.broadcast %294 : vector<16x1xf32> to vector<16x16xf32>
    %296 = arith.subf %292, %295 : vector<16x16xf32>
    %297 = math.exp %296 : vector<16x16xf32>
    %cst_114 = arith.constant dense<0.000000e+00> : vector<16xf32>
    %298 = vector.multi_reduction <add>, %297, %cst_114 [1] : vector<16x16xf32> to vector<16xf32>
    %299 = vector.shape_cast %298 : vector<16xf32> to vector<16x1xf32>
    %300 = vector.broadcast %299 : vector<16x1xf32> to vector<16x16xf32>
    %301 = arith.divf %297, %300 : vector<16x16xf32>
    %302 = arith.truncf %301 : vector<16x16xf32> to vector<16x16xbf16>
    %303 = vector.extract_strided_slice %289 {offsets = [0, 0], sizes = [16, 32], strides = [1, 1]} : vector<16x128xbf16> to vector<16x32xbf16>
    %cst_115 = arith.constant dense<0.000000e+00> : vector<16x32xf32>
    %304 = tpu.matmul %302, %303, %cst_115 {dimension_numbers = #tpu.dot_dimension_numbers<[1], [0], [0], [1], [0, 0, 1, 1], [], []>} : vector<16x16xbf16>, vector<16x32xbf16>, vector<16x32xf32> -> vector<16x32xf32>
    %305 = arith.truncf %304 : vector<16x32xf32> to vector<16x32xbf16>
    %306 = vector.extract_strided_slice %283 {offsets = [0, 0], sizes = [32, 128], strides = [1, 1]} : vector<128x128xbf16> to vector<32x128xbf16>
    %cst_116 = arith.constant dense<0.000000e+00> : vector<16x128xf32>
    %307 = tpu.matmul %305, %306, %cst_116 {dimension_numbers = #tpu.dot_dimension_numbers<[1], [0], [0], [1], [0, 0, 1, 1], [], []>} : vector<16x32xbf16>, vector<32x128xbf16>, vector<16x128xf32> -> vector<16x128xf32>
    %308 = vector.extract_strided_slice %285 {offsets = [0, 32], sizes = [16, 32], strides = [1, 1]} : vector<16x128xbf16> to vector<16x32xbf16>
    %309 = vector.extract_strided_slice %287 {offsets = [0, 32], sizes = [16, 32], strides = [1, 1]} : vector<16x128xbf16> to vector<16x32xbf16>
    %cst_117 = arith.constant dense<0.000000e+00> : vector<16x16xf32>
    %310 = tpu.matmul %308, %309, %cst_117 {dimension_numbers = #tpu.dot_dimension_numbers<[1], [1], [0], [0], [0, 0, 1, 0], [], []>} : vector<16x32xbf16>, vector<16x32xbf16>, vector<16x16xf32> -> vector<16x16xf32>
    %cst_118 = arith.constant dense<0xFF800000> : vector<16xf32>
    %311 = vector.multi_reduction <maximumf>, %310, %cst_118 [1] : vector<16x16xf32> to vector<16xf32>
    %312 = vector.shape_cast %311 : vector<16xf32> to vector<16x1xf32>
    %313 = vector.broadcast %312 : vector<16x1xf32> to vector<16x16xf32>
    %314 = arith.subf %310, %313 : vector<16x16xf32>
    %315 = math.exp %314 : vector<16x16xf32>
    %cst_119 = arith.constant dense<0.000000e+00> : vector<16xf32>
    %316 = vector.multi_reduction <add>, %315, %cst_119 [1] : vector<16x16xf32> to vector<16xf32>
    %317 = vector.shape_cast %316 : vector<16xf32> to vector<16x1xf32>
    %318 = vector.broadcast %317 : vector<16x1xf32> to vector<16x16xf32>
    %319 = arith.divf %315, %318 : vector<16x16xf32>
    %320 = arith.truncf %319 : vector<16x16xf32> to vector<16x16xbf16>
    %321 = vector.extract_strided_slice %289 {offsets = [0, 32], sizes = [16, 32], strides = [1, 1]} : vector<16x128xbf16> to vector<16x32xbf16>
    %cst_120 = arith.constant dense<0.000000e+00> : vector<16x32xf32>
    %322 = tpu.matmul %320, %321, %cst_120 {dimension_numbers = #tpu.dot_dimension_numbers<[1], [0], [0], [1], [0, 0, 1, 1], [], []>} : vector<16x16xbf16>, vector<16x32xbf16>, vector<16x32xf32> -> vector<16x32xf32>
    %323 = arith.truncf %322 : vector<16x32xf32> to vector<16x32xbf16>
    %324 = vector.extract_strided_slice %283 {offsets = [32, 0], sizes = [32, 128], strides = [1, 1]} : vector<128x128xbf16> to vector<32x128xbf16>
    %cst_121 = arith.constant dense<0.000000e+00> : vector<16x128xf32>
    %325 = tpu.matmul %323, %324, %cst_121 {dimension_numbers = #tpu.dot_dimension_numbers<[1], [0], [0], [1], [0, 0, 1, 1], [], []>} : vector<16x32xbf16>, vector<32x128xbf16>, vector<16x128xf32> -> vector<16x128xf32>
    %326 = arith.addf %307, %325 : vector<16x128xf32>
    %327 = vector.extract_strided_slice %285 {offsets = [0, 64], sizes = [16, 32], strides = [1, 1]} : vector<16x128xbf16> to vector<16x32xbf16>
    %328 = vector.extract_strided_slice %287 {offsets = [0, 64], sizes = [16, 32], strides = [1, 1]} : vector<16x128xbf16> to vector<16x32xbf16>
    %cst_122 = arith.constant dense<0.000000e+00> : vector<16x16xf32>
    %329 = tpu.matmul %327, %328, %cst_122 {dimension_numbers = #tpu.dot_dimension_numbers<[1], [1], [0], [0], [0, 0, 1, 0], [], []>} : vector<16x32xbf16>, vector<16x32xbf16>, vector<16x16xf32> -> vector<16x16xf32>
    %cst_123 = arith.constant dense<0xFF800000> : vector<16xf32>
    %330 = vector.multi_reduction <maximumf>, %329, %cst_123 [1] : vector<16x16xf32> to vector<16xf32>
    %331 = vector.shape_cast %330 : vector<16xf32> to vector<16x1xf32>
    %332 = vector.broadcast %331 : vector<16x1xf32> to vector<16x16xf32>
    %333 = arith.subf %329, %332 : vector<16x16xf32>
    %334 = math.exp %333 : vector<16x16xf32>
    %cst_124 = arith.constant dense<0.000000e+00> : vector<16xf32>
    %335 = vector.multi_reduction <add>, %334, %cst_124 [1] : vector<16x16xf32> to vector<16xf32>
    %336 = vector.shape_cast %335 : vector<16xf32> to vector<16x1xf32>
    %337 = vector.broadcast %336 : vector<16x1xf32> to vector<16x16xf32>
    %338 = arith.divf %334, %337 : vector<16x16xf32>
    %339 = arith.truncf %338 : vector<16x16xf32> to vector<16x16xbf16>
    %340 = vector.extract_strided_slice %289 {offsets = [0, 64], sizes = [16, 32], strides = [1, 1]} : vector<16x128xbf16> to vector<16x32xbf16>
    %cst_125 = arith.constant dense<0.000000e+00> : vector<16x32xf32>
    %341 = tpu.matmul %339, %340, %cst_125 {dimension_numbers = #tpu.dot_dimension_numbers<[1], [0], [0], [1], [0, 0, 1, 1], [], []>} : vector<16x16xbf16>, vector<16x32xbf16>, vector<16x32xf32> -> vector<16x32xf32>
    %342 = arith.truncf %341 : vector<16x32xf32> to vector<16x32xbf16>
    %343 = vector.extract_strided_slice %283 {offsets = [64, 0], sizes = [32, 128], strides = [1, 1]} : vector<128x128xbf16> to vector<32x128xbf16>
    %cst_126 = arith.constant dense<0.000000e+00> : vector<16x128xf32>
    %344 = tpu.matmul %342, %343, %cst_126 {dimension_numbers = #tpu.dot_dimension_numbers<[1], [0], [0], [1], [0, 0, 1, 1], [], []>} : vector<16x32xbf16>, vector<32x128xbf16>, vector<16x128xf32> -> vector<16x128xf32>
    %345 = arith.addf %326, %344 : vector<16x128xf32>
    %346 = vector.extract_strided_slice %285 {offsets = [0, 96], sizes = [16, 32], strides = [1, 1]} : vector<16x128xbf16> to vector<16x32xbf16>
    %347 = vector.extract_strided_slice %287 {offsets = [0, 96], sizes = [16, 32], strides = [1, 1]} : vector<16x128xbf16> to vector<16x32xbf16>
    %cst_127 = arith.constant dense<0.000000e+00> : vector<16x16xf32>
    %348 = tpu.matmul %346, %347, %cst_127 {dimension_numbers = #tpu.dot_dimension_numbers<[1], [1], [0], [0], [0, 0, 1, 0], [], []>} : vector<16x32xbf16>, vector<16x32xbf16>, vector<16x16xf32> -> vector<16x16xf32>
    %cst_128 = arith.constant dense<0xFF800000> : vector<16xf32>
    %349 = vector.multi_reduction <maximumf>, %348, %cst_128 [1] : vector<16x16xf32> to vector<16xf32>
    %350 = vector.shape_cast %349 : vector<16xf32> to vector<16x1xf32>
    %351 = vector.broadcast %350 : vector<16x1xf32> to vector<16x16xf32>
    %352 = arith.subf %348, %351 : vector<16x16xf32>
    %353 = math.exp %352 : vector<16x16xf32>
    %cst_129 = arith.constant dense<0.000000e+00> : vector<16xf32>
    %354 = vector.multi_reduction <add>, %353, %cst_129 [1] : vector<16x16xf32> to vector<16xf32>
    %355 = vector.shape_cast %354 : vector<16xf32> to vector<16x1xf32>
    %356 = vector.broadcast %355 : vector<16x1xf32> to vector<16x16xf32>
    %357 = arith.divf %353, %356 : vector<16x16xf32>
    %358 = arith.truncf %357 : vector<16x16xf32> to vector<16x16xbf16>
    %359 = vector.extract_strided_slice %289 {offsets = [0, 96], sizes = [16, 32], strides = [1, 1]} : vector<16x128xbf16> to vector<16x32xbf16>
    %cst_130 = arith.constant dense<0.000000e+00> : vector<16x32xf32>
    %360 = tpu.matmul %358, %359, %cst_130 {dimension_numbers = #tpu.dot_dimension_numbers<[1], [0], [0], [1], [0, 0, 1, 1], [], []>} : vector<16x16xbf16>, vector<16x32xbf16>, vector<16x32xf32> -> vector<16x32xf32>
    %361 = arith.truncf %360 : vector<16x32xf32> to vector<16x32xbf16>
    %362 = vector.extract_strided_slice %283 {offsets = [96, 0], sizes = [32, 128], strides = [1, 1]} : vector<128x128xbf16> to vector<32x128xbf16>
    %cst_131 = arith.constant dense<0.000000e+00> : vector<16x128xf32>
    %363 = tpu.matmul %361, %362, %cst_131 {dimension_numbers = #tpu.dot_dimension_numbers<[1], [0], [0], [1], [0, 0, 1, 1], [], []>} : vector<16x32xbf16>, vector<32x128xbf16>, vector<16x128xf32> -> vector<16x128xf32>
    %364 = arith.addf %345, %363 : vector<16x128xf32>
    %365 = vector.extract_strided_slice %281 {offsets = [16, 0], sizes = [16, 128], strides = [1, 1]} : vector<32x128xf32> to vector<16x128xf32>
    %366 = arith.truncf %365 : vector<16x128xf32> to vector<16x128xbf16>
    %367 = vector.extract_strided_slice %278 {offsets = [16, 0], sizes = [16, 128], strides = [1, 1]} : vector<32x128xf32> to vector<16x128xf32>
    %368 = arith.truncf %367 : vector<16x128xf32> to vector<16x128xbf16>
    %369 = vector.extract_strided_slice %279 {offsets = [16, 0], sizes = [16, 128], strides = [1, 1]} : vector<32x128xf32> to vector<16x128xf32>
    %370 = arith.truncf %369 : vector<16x128xf32> to vector<16x128xbf16>
    %371 = vector.extract_strided_slice %366 {offsets = [0, 0], sizes = [16, 32], strides = [1, 1]} : vector<16x128xbf16> to vector<16x32xbf16>
    %372 = vector.extract_strided_slice %368 {offsets = [0, 0], sizes = [16, 32], strides = [1, 1]} : vector<16x128xbf16> to vector<16x32xbf16>
    %cst_132 = arith.constant dense<0.000000e+00> : vector<16x16xf32>
    %373 = tpu.matmul %371, %372, %cst_132 {dimension_numbers = #tpu.dot_dimension_numbers<[1], [1], [0], [0], [0, 0, 1, 0], [], []>} : vector<16x32xbf16>, vector<16x32xbf16>, vector<16x16xf32> -> vector<16x16xf32>
    %cst_133 = arith.constant dense<0xFF800000> : vector<16xf32>
    %374 = vector.multi_reduction <maximumf>, %373, %cst_133 [1] : vector<16x16xf32> to vector<16xf32>
    %375 = vector.shape_cast %374 : vector<16xf32> to vector<16x1xf32>
    %376 = vector.broadcast %375 : vector<16x1xf32> to vector<16x16xf32>
    %377 = arith.subf %373, %376 : vector<16x16xf32>
    %378 = math.exp %377 : vector<16x16xf32>
    %cst_134 = arith.constant dense<0.000000e+00> : vector<16xf32>
    %379 = vector.multi_reduction <add>, %378, %cst_134 [1] : vector<16x16xf32> to vector<16xf32>
    %380 = vector.shape_cast %379 : vector<16xf32> to vector<16x1xf32>
    %381 = vector.broadcast %380 : vector<16x1xf32> to vector<16x16xf32>
    %382 = arith.divf %378, %381 : vector<16x16xf32>
    %383 = arith.truncf %382 : vector<16x16xf32> to vector<16x16xbf16>
    %384 = vector.extract_strided_slice %370 {offsets = [0, 0], sizes = [16, 32], strides = [1, 1]} : vector<16x128xbf16> to vector<16x32xbf16>
    %cst_135 = arith.constant dense<0.000000e+00> : vector<16x32xf32>
    %385 = tpu.matmul %383, %384, %cst_135 {dimension_numbers = #tpu.dot_dimension_numbers<[1], [0], [0], [1], [0, 0, 1, 1], [], []>} : vector<16x16xbf16>, vector<16x32xbf16>, vector<16x32xf32> -> vector<16x32xf32>
    %386 = arith.truncf %385 : vector<16x32xf32> to vector<16x32xbf16>
    %387 = vector.extract_strided_slice %283 {offsets = [0, 0], sizes = [32, 128], strides = [1, 1]} : vector<128x128xbf16> to vector<32x128xbf16>
    %cst_136 = arith.constant dense<0.000000e+00> : vector<16x128xf32>
    %388 = tpu.matmul %386, %387, %cst_136 {dimension_numbers = #tpu.dot_dimension_numbers<[1], [0], [0], [1], [0, 0, 1, 1], [], []>} : vector<16x32xbf16>, vector<32x128xbf16>, vector<16x128xf32> -> vector<16x128xf32>
    %389 = vector.extract_strided_slice %366 {offsets = [0, 32], sizes = [16, 32], strides = [1, 1]} : vector<16x128xbf16> to vector<16x32xbf16>
    %390 = vector.extract_strided_slice %368 {offsets = [0, 32], sizes = [16, 32], strides = [1, 1]} : vector<16x128xbf16> to vector<16x32xbf16>
    %cst_137 = arith.constant dense<0.000000e+00> : vector<16x16xf32>
    %391 = tpu.matmul %389, %390, %cst_137 {dimension_numbers = #tpu.dot_dimension_numbers<[1], [1], [0], [0], [0, 0, 1, 0], [], []>} : vector<16x32xbf16>, vector<16x32xbf16>, vector<16x16xf32> -> vector<16x16xf32>
    %cst_138 = arith.constant dense<0xFF800000> : vector<16xf32>
    %392 = vector.multi_reduction <maximumf>, %391, %cst_138 [1] : vector<16x16xf32> to vector<16xf32>
    %393 = vector.shape_cast %392 : vector<16xf32> to vector<16x1xf32>
    %394 = vector.broadcast %393 : vector<16x1xf32> to vector<16x16xf32>
    %395 = arith.subf %391, %394 : vector<16x16xf32>
    %396 = math.exp %395 : vector<16x16xf32>
    %cst_139 = arith.constant dense<0.000000e+00> : vector<16xf32>
    %397 = vector.multi_reduction <add>, %396, %cst_139 [1] : vector<16x16xf32> to vector<16xf32>
    %398 = vector.shape_cast %397 : vector<16xf32> to vector<16x1xf32>
    %399 = vector.broadcast %398 : vector<16x1xf32> to vector<16x16xf32>
    %400 = arith.divf %396, %399 : vector<16x16xf32>
    %401 = arith.truncf %400 : vector<16x16xf32> to vector<16x16xbf16>
    %402 = vector.extract_strided_slice %370 {offsets = [0, 32], sizes = [16, 32], strides = [1, 1]} : vector<16x128xbf16> to vector<16x32xbf16>
    %cst_140 = arith.constant dense<0.000000e+00> : vector<16x32xf32>
    %403 = tpu.matmul %401, %402, %cst_140 {dimension_numbers = #tpu.dot_dimension_numbers<[1], [0], [0], [1], [0, 0, 1, 1], [], []>} : vector<16x16xbf16>, vector<16x32xbf16>, vector<16x32xf32> -> vector<16x32xf32>
    %404 = arith.truncf %403 : vector<16x32xf32> to vector<16x32xbf16>
    %405 = vector.extract_strided_slice %283 {offsets = [32, 0], sizes = [32, 128], strides = [1, 1]} : vector<128x128xbf16> to vector<32x128xbf16>
    %cst_141 = arith.constant dense<0.000000e+00> : vector<16x128xf32>
    %406 = tpu.matmul %404, %405, %cst_141 {dimension_numbers = #tpu.dot_dimension_numbers<[1], [0], [0], [1], [0, 0, 1, 1], [], []>} : vector<16x32xbf16>, vector<32x128xbf16>, vector<16x128xf32> -> vector<16x128xf32>
    %407 = arith.addf %388, %406 : vector<16x128xf32>
    %408 = vector.extract_strided_slice %366 {offsets = [0, 64], sizes = [16, 32], strides = [1, 1]} : vector<16x128xbf16> to vector<16x32xbf16>
    %409 = vector.extract_strided_slice %368 {offsets = [0, 64], sizes = [16, 32], strides = [1, 1]} : vector<16x128xbf16> to vector<16x32xbf16>
    %cst_142 = arith.constant dense<0.000000e+00> : vector<16x16xf32>
    %410 = tpu.matmul %408, %409, %cst_142 {dimension_numbers = #tpu.dot_dimension_numbers<[1], [1], [0], [0], [0, 0, 1, 0], [], []>} : vector<16x32xbf16>, vector<16x32xbf16>, vector<16x16xf32> -> vector<16x16xf32>
    %cst_143 = arith.constant dense<0xFF800000> : vector<16xf32>
    %411 = vector.multi_reduction <maximumf>, %410, %cst_143 [1] : vector<16x16xf32> to vector<16xf32>
    %412 = vector.shape_cast %411 : vector<16xf32> to vector<16x1xf32>
    %413 = vector.broadcast %412 : vector<16x1xf32> to vector<16x16xf32>
    %414 = arith.subf %410, %413 : vector<16x16xf32>
    %415 = math.exp %414 : vector<16x16xf32>
    %cst_144 = arith.constant dense<0.000000e+00> : vector<16xf32>
    %416 = vector.multi_reduction <add>, %415, %cst_144 [1] : vector<16x16xf32> to vector<16xf32>
    %417 = vector.shape_cast %416 : vector<16xf32> to vector<16x1xf32>
    %418 = vector.broadcast %417 : vector<16x1xf32> to vector<16x16xf32>
    %419 = arith.divf %415, %418 : vector<16x16xf32>
    %420 = arith.truncf %419 : vector<16x16xf32> to vector<16x16xbf16>
    %421 = vector.extract_strided_slice %370 {offsets = [0, 64], sizes = [16, 32], strides = [1, 1]} : vector<16x128xbf16> to vector<16x32xbf16>
    %cst_145 = arith.constant dense<0.000000e+00> : vector<16x32xf32>
    %422 = tpu.matmul %420, %421, %cst_145 {dimension_numbers = #tpu.dot_dimension_numbers<[1], [0], [0], [1], [0, 0, 1, 1], [], []>} : vector<16x16xbf16>, vector<16x32xbf16>, vector<16x32xf32> -> vector<16x32xf32>
    %423 = arith.truncf %422 : vector<16x32xf32> to vector<16x32xbf16>
    %424 = vector.extract_strided_slice %283 {offsets = [64, 0], sizes = [32, 128], strides = [1, 1]} : vector<128x128xbf16> to vector<32x128xbf16>
    %cst_146 = arith.constant dense<0.000000e+00> : vector<16x128xf32>
    %425 = tpu.matmul %423, %424, %cst_146 {dimension_numbers = #tpu.dot_dimension_numbers<[1], [0], [0], [1], [0, 0, 1, 1], [], []>} : vector<16x32xbf16>, vector<32x128xbf16>, vector<16x128xf32> -> vector<16x128xf32>
    %426 = arith.addf %407, %425 : vector<16x128xf32>
    %427 = vector.extract_strided_slice %366 {offsets = [0, 96], sizes = [16, 32], strides = [1, 1]} : vector<16x128xbf16> to vector<16x32xbf16>
    %428 = vector.extract_strided_slice %368 {offsets = [0, 96], sizes = [16, 32], strides = [1, 1]} : vector<16x128xbf16> to vector<16x32xbf16>
    %cst_147 = arith.constant dense<0.000000e+00> : vector<16x16xf32>
    %429 = tpu.matmul %427, %428, %cst_147 {dimension_numbers = #tpu.dot_dimension_numbers<[1], [1], [0], [0], [0, 0, 1, 0], [], []>} : vector<16x32xbf16>, vector<16x32xbf16>, vector<16x16xf32> -> vector<16x16xf32>
    %cst_148 = arith.constant dense<0xFF800000> : vector<16xf32>
    %430 = vector.multi_reduction <maximumf>, %429, %cst_148 [1] : vector<16x16xf32> to vector<16xf32>
    %431 = vector.shape_cast %430 : vector<16xf32> to vector<16x1xf32>
    %432 = vector.broadcast %431 : vector<16x1xf32> to vector<16x16xf32>
    %433 = arith.subf %429, %432 : vector<16x16xf32>
    %434 = math.exp %433 : vector<16x16xf32>
    %cst_149 = arith.constant dense<0.000000e+00> : vector<16xf32>
    %435 = vector.multi_reduction <add>, %434, %cst_149 [1] : vector<16x16xf32> to vector<16xf32>
    %436 = vector.shape_cast %435 : vector<16xf32> to vector<16x1xf32>
    %437 = vector.broadcast %436 : vector<16x1xf32> to vector<16x16xf32>
    %438 = arith.divf %434, %437 : vector<16x16xf32>
    %439 = arith.truncf %438 : vector<16x16xf32> to vector<16x16xbf16>
    %440 = vector.extract_strided_slice %370 {offsets = [0, 96], sizes = [16, 32], strides = [1, 1]} : vector<16x128xbf16> to vector<16x32xbf16>
    %cst_150 = arith.constant dense<0.000000e+00> : vector<16x32xf32>
    %441 = tpu.matmul %439, %440, %cst_150 {dimension_numbers = #tpu.dot_dimension_numbers<[1], [0], [0], [1], [0, 0, 1, 1], [], []>} : vector<16x16xbf16>, vector<16x32xbf16>, vector<16x32xf32> -> vector<16x32xf32>
    %442 = arith.truncf %441 : vector<16x32xf32> to vector<16x32xbf16>
    %443 = vector.extract_strided_slice %283 {offsets = [96, 0], sizes = [32, 128], strides = [1, 1]} : vector<128x128xbf16> to vector<32x128xbf16>
    %cst_151 = arith.constant dense<0.000000e+00> : vector<16x128xf32>
    %444 = tpu.matmul %442, %443, %cst_151 {dimension_numbers = #tpu.dot_dimension_numbers<[1], [0], [0], [1], [0, 0, 1, 1], [], []>} : vector<16x32xbf16>, vector<32x128xbf16>, vector<16x128xf32> -> vector<16x128xf32>
    %445 = arith.addf %426, %444 : vector<16x128xf32>
    %446 = tpu.concatenate %364, %445 in 0 : vector<16x128xf32>, vector<16x128xf32> -> vector<32x128xf32>
    %c1_152 = arith.constant 1 : index
    %c0_153 = arith.constant 0 : index
    %c0_154 = arith.constant 0 : index
    %447 = vector.load %arg7[%c1_152, %c0_153, %c0_154] : memref<2x1x128xf32, #tpu.memory_space<vmem>>, vector<1x1x128xf32>
    %448 = vector.shape_cast %447 : vector<1x1x128xf32> to vector<1x128xf32>
    %449 = vector.broadcast %448 : vector<1x128xf32> to vector<32x128xf32>
    %450 = arith.addf %446, %449 : vector<32x128xf32>
    %451 = arith.addf %268, %450 : vector<32x128xf32>
    %c1_155 = arith.constant 1 : index
    %c0_156 = arith.constant 0 : index
    %c0_157 = arith.constant 0 : index
    %452 = vector.load %arg8[%c1_155, %c0_156, %c0_157] : memref<2x1x128xf32, #tpu.memory_space<vmem>>, vector<1x1x128xf32>
    %453 = vector.shape_cast %452 : vector<1x1x128xf32> to vector<1x128xf32>
    %c1_158 = arith.constant 1 : index
    %c0_159 = arith.constant 0 : index
    %c0_160 = arith.constant 0 : index
    %454 = vector.load %arg9[%c1_158, %c0_159, %c0_160] : memref<2x1x128xf32, #tpu.memory_space<vmem>>, vector<1x1x128xf32>
    %455 = vector.shape_cast %454 : vector<1x1x128xf32> to vector<1x128xf32>
    %cst_161 = arith.constant dense<0.000000e+00> : vector<32xf32>
    %456 = vector.multi_reduction <add>, %451, %cst_161 [1] : vector<32x128xf32> to vector<32xf32>
    %457 = vector.shape_cast %456 : vector<32xf32> to vector<32x1xf32>
    %cst_162 = arith.constant 1.280000e+02 : f32
    %458 = vector.broadcast %cst_162 : f32 to vector<32x1xf32>
    %459 = arith.divf %457, %458 : vector<32x1xf32>
    %460 = arith.mulf %451, %451 : vector<32x128xf32>
    %cst_163 = arith.constant dense<0.000000e+00> : vector<32xf32>
    %461 = vector.multi_reduction <add>, %460, %cst_163 [1] : vector<32x128xf32> to vector<32xf32>
    %462 = vector.shape_cast %461 : vector<32xf32> to vector<32x1xf32>
    %cst_164 = arith.constant 1.280000e+02 : f32
    %463 = vector.broadcast %cst_164 : f32 to vector<32x1xf32>
    %464 = arith.divf %462, %463 : vector<32x1xf32>
    %465 = arith.mulf %459, %459 : vector<32x1xf32>
    %466 = arith.subf %464, %465 : vector<32x1xf32>
    %cst_165 = arith.constant 0.000000e+00 : f32
    %467 = vector.broadcast %cst_165 : f32 to vector<32x1xf32>
    %468 = arith.maximumf %466, %467 : vector<32x1xf32>
    %469 = vector.broadcast %459 : vector<32x1xf32> to vector<32x128xf32>
    %470 = arith.subf %451, %469 : vector<32x128xf32>
    %cst_166 = arith.constant 9.99999974E-6 : f32
    %471 = vector.broadcast %cst_166 : f32 to vector<32x1xf32>
    %472 = arith.addf %468, %471 : vector<32x1xf32>
    %473 = math.rsqrt %472 : vector<32x1xf32>
    %474 = vector.broadcast %473 : vector<32x1xf32> to vector<32x128xf32>
    %475 = arith.mulf %470, %474 : vector<32x128xf32>
    %476 = vector.broadcast %453 : vector<1x128xf32> to vector<32x128xf32>
    %477 = arith.mulf %475, %476 : vector<32x128xf32>
    %478 = vector.broadcast %455 : vector<1x128xf32> to vector<32x128xf32>
    %479 = arith.addf %477, %478 : vector<32x128xf32>
    %480 = arith.truncf %479 : vector<32x128xf32> to vector<32x128xbf16>
    %c1_167 = arith.constant 1 : index
    %c0_168 = arith.constant 0 : index
    %c0_169 = arith.constant 0 : index
    %481 = vector.load %arg10[%c1_167, %c0_168, %c0_169] : memref<2x128x256xbf16, #tpu.memory_space<vmem>>, vector<1x128x256xbf16>
    %482 = vector.shape_cast %481 : vector<1x128x256xbf16> to vector<128x256xbf16>
    %cst_170 = arith.constant dense<0.000000e+00> : vector<32x256xf32>
    %483 = tpu.matmul %480, %482, %cst_170 {dimension_numbers = #tpu.dot_dimension_numbers<[1], [0], [0], [1], [0, 0, 1, 1], [], []>} : vector<32x128xbf16>, vector<128x256xbf16>, vector<32x256xf32> -> vector<32x256xf32>
    %c1_171 = arith.constant 1 : index
    %c0_172 = arith.constant 0 : index
    %c0_173 = arith.constant 0 : index
    %484 = vector.load %arg11[%c1_171, %c0_172, %c0_173] : memref<2x1x256xf32, #tpu.memory_space<vmem>>, vector<1x1x256xf32>
    %485 = vector.shape_cast %484 : vector<1x1x256xf32> to vector<1x256xf32>
    %486 = vector.broadcast %485 : vector<1x256xf32> to vector<32x256xf32>
    %487 = arith.addf %483, %486 : vector<32x256xf32>
    %cst_174 = arith.constant 0.000000e+00 : f32
    %488 = vector.broadcast %cst_174 : f32 to vector<32x256xf32>
    %489 = arith.maximumf %487, %488 : vector<32x256xf32>
    %490 = arith.truncf %489 : vector<32x256xf32> to vector<32x256xbf16>
    %c1_175 = arith.constant 1 : index
    %c0_176 = arith.constant 0 : index
    %c0_177 = arith.constant 0 : index
    %491 = vector.load %arg12[%c1_175, %c0_176, %c0_177] : memref<2x256x128xbf16, #tpu.memory_space<vmem>>, vector<1x256x128xbf16>
    %492 = vector.shape_cast %491 : vector<1x256x128xbf16> to vector<256x128xbf16>
    %cst_178 = arith.constant dense<0.000000e+00> : vector<32x128xf32>
    %493 = tpu.matmul %490, %492, %cst_178 {dimension_numbers = #tpu.dot_dimension_numbers<[1], [0], [0], [1], [0, 0, 1, 1], [], []>} : vector<32x256xbf16>, vector<256x128xbf16>, vector<32x128xf32> -> vector<32x128xf32>
    %c1_179 = arith.constant 1 : index
    %c0_180 = arith.constant 0 : index
    %c0_181 = arith.constant 0 : index
    %494 = vector.load %arg13[%c1_179, %c0_180, %c0_181] : memref<2x1x128xf32, #tpu.memory_space<vmem>>, vector<1x1x128xf32>
    %495 = vector.shape_cast %494 : vector<1x1x128xf32> to vector<1x128xf32>
    %496 = vector.broadcast %495 : vector<1x128xf32> to vector<32x128xf32>
    %497 = arith.addf %493, %496 : vector<32x128xf32>
    %498 = arith.addf %479, %497 : vector<32x128xf32>
    %c1_182 = arith.constant 1 : index
    %c0_183 = arith.constant 0 : index
    %c0_184 = arith.constant 0 : index
    %499 = vector.load %arg14[%c1_182, %c0_183, %c0_184] : memref<2x1x128xf32, #tpu.memory_space<vmem>>, vector<1x1x128xf32>
    %500 = vector.shape_cast %499 : vector<1x1x128xf32> to vector<1x128xf32>
    %c1_185 = arith.constant 1 : index
    %c0_186 = arith.constant 0 : index
    %c0_187 = arith.constant 0 : index
    %501 = vector.load %arg15[%c1_185, %c0_186, %c0_187] : memref<2x1x128xf32, #tpu.memory_space<vmem>>, vector<1x1x128xf32>
    %502 = vector.shape_cast %501 : vector<1x1x128xf32> to vector<1x128xf32>
    %cst_188 = arith.constant dense<0.000000e+00> : vector<32xf32>
    %503 = vector.multi_reduction <add>, %498, %cst_188 [1] : vector<32x128xf32> to vector<32xf32>
    %504 = vector.shape_cast %503 : vector<32xf32> to vector<32x1xf32>
    %cst_189 = arith.constant 1.280000e+02 : f32
    %505 = vector.broadcast %cst_189 : f32 to vector<32x1xf32>
    %506 = arith.divf %504, %505 : vector<32x1xf32>
    %507 = arith.mulf %498, %498 : vector<32x128xf32>
    %cst_190 = arith.constant dense<0.000000e+00> : vector<32xf32>
    %508 = vector.multi_reduction <add>, %507, %cst_190 [1] : vector<32x128xf32> to vector<32xf32>
    %509 = vector.shape_cast %508 : vector<32xf32> to vector<32x1xf32>
    %cst_191 = arith.constant 1.280000e+02 : f32
    %510 = vector.broadcast %cst_191 : f32 to vector<32x1xf32>
    %511 = arith.divf %509, %510 : vector<32x1xf32>
    %512 = arith.mulf %506, %506 : vector<32x1xf32>
    %513 = arith.subf %511, %512 : vector<32x1xf32>
    %cst_192 = arith.constant 0.000000e+00 : f32
    %514 = vector.broadcast %cst_192 : f32 to vector<32x1xf32>
    %515 = arith.maximumf %513, %514 : vector<32x1xf32>
    %516 = vector.broadcast %506 : vector<32x1xf32> to vector<32x128xf32>
    %517 = arith.subf %498, %516 : vector<32x128xf32>
    %cst_193 = arith.constant 9.99999974E-6 : f32
    %518 = vector.broadcast %cst_193 : f32 to vector<32x1xf32>
    %519 = arith.addf %515, %518 : vector<32x1xf32>
    %520 = math.rsqrt %519 : vector<32x1xf32>
    %521 = vector.broadcast %520 : vector<32x1xf32> to vector<32x128xf32>
    %522 = arith.mulf %517, %521 : vector<32x128xf32>
    %523 = vector.broadcast %500 : vector<1x128xf32> to vector<32x128xf32>
    %524 = arith.mulf %522, %523 : vector<32x128xf32>
    %525 = vector.broadcast %502 : vector<1x128xf32> to vector<32x128xf32>
    %526 = arith.addf %524, %525 : vector<32x128xf32>
    %527 = vector.extract_strided_slice %526 {offsets = [0, 0], sizes = [16, 128], strides = [1, 1]} : vector<32x128xf32> to vector<16x128xf32>
    %c0_194 = arith.constant 0 : index
    %c0_195 = arith.constant 0 : index
    %c0_196 = arith.constant 0 : index
    %528 = vector.load %arg16[%c0_194, %c0_195, %c0_196] : memref<2x16x128xf32, #tpu.memory_space<vmem>>, vector<1x16x128xf32>
    %529 = vector.shape_cast %528 : vector<1x16x128xf32> to vector<16x128xf32>
    %530 = vector.shape_cast %527 : vector<16x128xf32> to vector<1x16x128xf32>
    tpu.vector_store %arg16[%c0_194, %c0_195, %c0_196], %530 {strides = array<i32>} : memref<2x16x128xf32, #tpu.memory_space<vmem>>, vector<1x16x128xf32>,
    %cst_197 = arith.constant dense<0.000000e+00> : vector<128xf32>
    %531 = vector.multi_reduction <add>, %527, %cst_197 [0] : vector<16x128xf32> to vector<128xf32>
    %532 = vector.shape_cast %531 : vector<128xf32> to vector<1x128xf32>
    %cst_198 = arith.constant 6.250000e-02 : f32
    %533 = vector.broadcast %cst_198 : f32 to vector<1x128xf32>
    %534 = arith.mulf %532, %533 : vector<1x128xf32>
    %c0_199 = arith.constant 0 : index
    %c0_200 = arith.constant 0 : index
    %c0_201 = arith.constant 0 : index
    %535 = vector.load %arg17[%c0_199, %c0_200, %c0_201] : memref<2x1x128xf32, #tpu.memory_space<vmem>>, vector<1x1x128xf32>
    %536 = vector.shape_cast %535 : vector<1x1x128xf32> to vector<1x128xf32>
    %537 = vector.shape_cast %534 : vector<1x128xf32> to vector<1x1x128xf32>
    tpu.vector_store %arg17[%c0_199, %c0_200, %c0_201], %537 {strides = array<i32>} : memref<2x1x128xf32, #tpu.memory_space<vmem>>, vector<1x1x128xf32>,
    %538 = vector.extract_strided_slice %526 {offsets = [16, 0], sizes = [16, 128], strides = [1, 1]} : vector<32x128xf32> to vector<16x128xf32>
    %c1_202 = arith.constant 1 : index
    %c0_203 = arith.constant 0 : index
    %c0_204 = arith.constant 0 : index
    %539 = vector.load %arg16[%c1_202, %c0_203, %c0_204] : memref<2x16x128xf32, #tpu.memory_space<vmem>>, vector<1x16x128xf32>
    %540 = vector.shape_cast %539 : vector<1x16x128xf32> to vector<16x128xf32>
    %541 = vector.shape_cast %538 : vector<16x128xf32> to vector<1x16x128xf32>
    tpu.vector_store %arg16[%c1_202, %c0_203, %c0_204], %541 {strides = array<i32>} : memref<2x16x128xf32, #tpu.memory_space<vmem>>, vector<1x16x128xf32>,
    %cst_205 = arith.constant dense<0.000000e+00> : vector<128xf32>
    %542 = vector.multi_reduction <add>, %538, %cst_205 [0] : vector<16x128xf32> to vector<128xf32>
    %543 = vector.shape_cast %542 : vector<128xf32> to vector<1x128xf32>
    %cst_206 = arith.constant 6.250000e-02 : f32
    %544 = vector.broadcast %cst_206 : f32 to vector<1x128xf32>
    %545 = arith.mulf %543, %544 : vector<1x128xf32>
    %c1_207 = arith.constant 1 : index
    %c0_208 = arith.constant 0 : index
    %c0_209 = arith.constant 0 : index
    %546 = vector.load %arg17[%c1_207, %c0_208, %c0_209] : memref<2x1x128xf32, #tpu.memory_space<vmem>>, vector<1x1x128xf32>
    %547 = vector.shape_cast %546 : vector<1x1x128xf32> to vector<1x128xf32>
    %548 = vector.shape_cast %545 : vector<1x128xf32> to vector<1x1x128xf32>
    tpu.vector_store %arg17[%c1_207, %c0_208, %c0_209], %548 {strides = array<i32>} : memref<2x1x128xf32, #tpu.memory_space<vmem>>, vector<1x1x128xf32>,
    return
  }
  func.func @transform_0(%arg0: i32) -> (i32, i32, i32) {
    %c0_i32 = arith.constant 0 : i32
    %c0_i32_0 = arith.constant 0 : i32
    %c0_i32_1 = arith.constant 0 : i32
    return %arg0, %c0_i32, %c0_i32_0 : i32, i32, i32
  }
  func.func @transform_1(%arg0: i32) -> (i32, i32) {
    %c0_i32 = arith.constant 0 : i32
    %c0_i32_0 = arith.constant 0 : i32
    %c0_i32_1 = arith.constant 0 : i32
    return %c0_i32, %c0_i32_0 : i32, i32
  }
  func.func @transform_2(%arg0: i32) -> (i32, i32) {
    %c0_i32 = arith.constant 0 : i32
    %c0_i32_0 = arith.constant 0 : i32
    %c0_i32_1 = arith.constant 0 : i32
    return %c0_i32, %c0_i32_0 : i32, i32
  }
  func.func @transform_3(%arg0: i32) -> (i32, i32, i32) {
    %c0_i32 = arith.constant 0 : i32
    %c0_i32_0 = arith.constant 0 : i32
    %c0_i32_1 = arith.constant 0 : i32
    %c0_i32_2 = arith.constant 0 : i32
    return %c0_i32, %c0_i32_0, %c0_i32_1 : i32, i32, i32
  }
  func.func @transform_4(%arg0: i32) -> (i32, i32, i32) {
    %c0_i32 = arith.constant 0 : i32
    %c0_i32_0 = arith.constant 0 : i32
    %c0_i32_1 = arith.constant 0 : i32
    %c0_i32_2 = arith.constant 0 : i32
    return %c0_i32, %c0_i32_0, %c0_i32_1 : i32, i32, i32
  }
  func.func @transform_5(%arg0: i32) -> (i32, i32, i32) {
    %c0_i32 = arith.constant 0 : i32
    %c0_i32_0 = arith.constant 0 : i32
    %c0_i32_1 = arith.constant 0 : i32
    %c0_i32_2 = arith.constant 0 : i32
    return %c0_i32, %c0_i32_0, %c0_i32_1 : i32, i32, i32
  }
  func.func @transform_6(%arg0: i32) -> (i32, i32, i32) {
    %c0_i32 = arith.constant 0 : i32
    %c0_i32_0 = arith.constant 0 : i32
    %c0_i32_1 = arith.constant 0 : i32
    %c0_i32_2 = arith.constant 0 : i32
    return %c0_i32, %c0_i32_0, %c0_i32_1 : i32, i32, i32
  }
  func.func @transform_7(%arg0: i32) -> (i32, i32, i32) {
    %c0_i32 = arith.constant 0 : i32
    %c0_i32_0 = arith.constant 0 : i32
    %c0_i32_1 = arith.constant 0 : i32
    %c0_i32_2 = arith.constant 0 : i32
    return %c0_i32, %c0_i32_0, %c0_i32_1 : i32, i32, i32
  }
  func.func @transform_8(%arg0: i32) -> (i32, i32, i32) {
    %c0_i32 = arith.constant 0 : i32
    %c0_i32_0 = arith.constant 0 : i32
    %c0_i32_1 = arith.constant 0 : i32
    %c0_i32_2 = arith.constant 0 : i32
    return %c0_i32, %c0_i32_0, %c0_i32_1 : i32, i32, i32
  }
  func.func @transform_9(%arg0: i32) -> (i32, i32, i32) {
    %c0_i32 = arith.constant 0 : i32
    %c0_i32_0 = arith.constant 0 : i32
    %c0_i32_1 = arith.constant 0 : i32
    %c0_i32_2 = arith.constant 0 : i32
    return %c0_i32, %c0_i32_0, %c0_i32_1 : i32, i32, i32
  }
  func.func @transform_10(%arg0: i32) -> (i32, i32, i32) {
    %c0_i32 = arith.constant 0 : i32
    %c0_i32_0 = arith.constant 0 : i32
    %c0_i32_1 = arith.constant 0 : i32
    %c0_i32_2 = arith.constant 0 : i32
    return %c0_i32, %c0_i32_0, %c0_i32_1 : i32, i32, i32
  }
  func.func @transform_11(%arg0: i32) -> (i32, i32, i32) {
    %c0_i32 = arith.constant 0 : i32
    %c0_i32_0 = arith.constant 0 : i32
    %c0_i32_1 = arith.constant 0 : i32
    %c0_i32_2 = arith.constant 0 : i32
    return %c0_i32, %c0_i32_0, %c0_i32_1 : i32, i32, i32
  }
  func.func @transform_12(%arg0: i32) -> (i32, i32, i32) {
    %c0_i32 = arith.constant 0 : i32
    %c0_i32_0 = arith.constant 0 : i32
    %c0_i32_1 = arith.constant 0 : i32
    %c0_i32_2 = arith.constant 0 : i32
    return %c0_i32, %c0_i32_0, %c0_i32_1 : i32, i32, i32
  }
  func.func @transform_13(%arg0: i32) -> (i32, i32, i32) {
    %c0_i32 = arith.constant 0 : i32
    %c0_i32_0 = arith.constant 0 : i32
    %c0_i32_1 = arith.constant 0 : i32
    %c0_i32_2 = arith.constant 0 : i32
    return %c0_i32, %c0_i32_0, %c0_i32_1 : i32, i32, i32
  }
  func.func @transform_14(%arg0: i32) -> (i32, i32, i32) {
    %c0_i32 = arith.constant 0 : i32
    %c0_i32_0 = arith.constant 0 : i32
    %c0_i32_1 = arith.constant 0 : i32
    %c0_i32_2 = arith.constant 0 : i32
    return %c0_i32, %c0_i32_0, %c0_i32_1 : i32, i32, i32
  }
  func.func @transform_15(%arg0: i32) -> (i32, i32, i32) {
    %c0_i32 = arith.constant 0 : i32
    %c0_i32_0 = arith.constant 0 : i32
    %c0_i32_1 = arith.constant 0 : i32
    return %arg0, %c0_i32, %c0_i32_0 : i32, i32, i32
  }
  func.func @transform_16(%arg0: i32) -> (i32, i32, i32) {
    %c0_i32 = arith.constant 0 : i32
    %c0_i32_0 = arith.constant 0 : i32
    %c0_i32_1 = arith.constant 0 : i32
    return %arg0, %c0_i32, %c0_i32_0 : i32, i32, i32
  }
}

</mosaic_0001>

<bundles_post_ra>
// kernel: city_encoder_call.1
= control target key start
LH: loop header
LB: loop body
LE: loop exit
PB: predicated region body
PF: predicated region fallthrough
CT: control target
= control target key end

     0   :  { %s6795_s0 = inlined_call_operand.vmem [shape: f32[4,16,2], index: 0, kind: input, shape index: {}]   ;;  %s6796_s1 = inlined_call_operand.vmem [shape: bf16[2,128], index: 1, kind: input, shape index: {}]   ;;  %s6797_s2 = inlined_call_operand.vmem [shape: f32[1,128], index: 2, kind: input, shape index: {}]   ;;  %s6798_s3 = inlined_call_operand.hbm [shape: bf16[2,128,384], index: 3, kind: input, shape index: {}]   ;;  %s6799_s4 = inlined_call_operand.vmem [shape: f32[2,1,384], index: 4, kind: input, shape index: {}]   ;;  %s6800_s5 = inlined_call_operand.hbm [shape: bf16[2,128,128], index: 5, kind: input, shape index: {}]   ;;  %s6801_s6 = inlined_call_operand.vmem [shape: f32[2,1,128], index: 6, kind: input, shape index: {}]   ;;  %s6802_s7 = inlined_call_operand.vmem [shape: f32[2,1,128], index: 7, kind: input, shape index: {}]   ;;  %s6803_s8 = inlined_call_operand.vmem [shape: f32[2,1,128], index: 8, kind: input, shape index: {}]   ;;  %s6804_s9 = inlined_call_operand.hbm [shape: bf16[2,128,256], index: 9, kind: input, shape index: {}]   ;;  %s6805_s10 = inlined_call_operand.vmem [shape: f32[2,1,256], index: 10, kind: input, shape index: {}]   ;;  %s6806_s11 = inlined_call_operand.hbm [shape: bf16[2,256,128], index: 11, kind: input, shape index: {}]   ;;  %s6807_s12 = inlined_call_operand.vmem [shape: f32[2,1,128], index: 12, kind: input, shape index: {}]   ;;  %s6808_s13 = inlined_call_operand.vmem [shape: f32[2,1,128], index: 13, kind: input, shape index: {}]   ;;  %s6809_s14 = inlined_call_operand.vmem [shape: f32[2,1,128], index: 14, kind: input, shape index: {}]   ;;  %s6810_s15 = inlined_call_operand.hbm [shape: f32[4,16,128], index: 15, kind: output, shape index: {0}]   ;;  %s6811_s16 = inlined_call_operand.hbm [shape: f32[4,1,128], index: 16, kind: output, shape index: {1}]  }
   0x1   :  { %6825 = sst [smem:[#allocation26_spill]] %s6795_s0 }
   0x2   :  { %6826 = sst [smem:[#allocation27_spill]] %s6798_s3 }
   0x3   :  { %6827 = sst [smem:[#allocation28_spill]] %s6800_s5 }
   0x4   :  { %6828 = sst [smem:[#allocation29_spill]] %s6808_s13 }
   0x5   :  { %6829 = sst [smem:[#allocation30_spill]] %s6809_s14 }
   0x6   :  { %6830 = sst [smem:[#allocation31_spill]] %s6810_s15 }
   0x7   :  { %6831 = sst [smem:[#allocation32_spill]] %s6811_s16 }
   0x8   :  { %22 = vsyncpa [#allocation3], 0 }
   0x9   :  { %23 = vsyncpa [#allocation6], 0 }
   0xa   :  { %24 = vsyncpa [#allocation9], 0 }
   0xb   :  { %25 = vsyncpa [#allocation4], 0 }
   0xc   :  { %27 = vsyncpa [#allocation4 + $0x1], 0 }
   0xd   :  { %28 = vsyncpa [#allocation12], 0 }
   0xe   :  { %30 = vsyncpa [#allocation12 + $0x1], 0  ;;  %s5757_s21 = smov 0   ;;  %s5759_s22 = smov 0  }
   0xf   :  { %s5761_s23 = smov 0   ;;  %s5763_s24 = smov 0  }
  0x10 LB: > { %6832 = sst [smem:[#allocation18_spill]] %s5640_s21  ;;  %s5778_s25 = sadd.s32 4294967295, %s5652_s24   ;;  %s5652_s24 = sphi %s5763_s24, %s6867_s24   ;;  %s5648_s23 = sphi %s5761_s23, %s6870_s23   ;;  %s5644_s22 = sphi %s5759_s22, %s6869_s22   ;;  %s5640_s21 = sphi %s5757_s21, %s6868_s21  }
  0x11   : > { %6833 = sst [smem:[#allocation19_spill]] %s5644_s22  ;;  %s4421_s26 = sadd.s32 4294967294, %s5652_s24  }
  0x12   : > { %6834 = sst [smem:[#allocation20_spill]] %s5648_s23  ;;  %s5782_s27 = sadd.s32 1, %s5652_s24  }
  0x13   : > { %6835 = sst [smem:[#allocation21_spill]] %s5652_s24  ;;  %s363_s28 = sadd.s32 1, %s5648_s23 }
  0x14   : > { %6836 = sst [smem:[#allocation22_spill]] %s5782_s27  ;;  %s360_s29 = ssub.s32 %s5652_s24, %s5782_s27 }
  0x15   : > { %p373_p0 = scmp.ne.s32.totalorder %s5648_s23, %s5644_s22  ;;  %p361_p1 = scmp.eq.s32.totalorder %s360_s29, 0 }
  0x16   : > { %p374_p2 = scmp.eq.s32.totalorder %s5778_s25, 1  ;;  %p379_p3 = scmp.ne.s32.totalorder %s5644_s22, %s5640_s21 }
  0x17   : > { %p380_p4 = scmp.eq.s32.totalorder %s4421_s26, 1  ;;  %p4422_p7 = scmp.ge.s32.totalorder %s5652_s24, 1 }
  0x18   : > { %s5793_s30 = scalar_select %p361_p1, %s5648_s23, %s363_s28  }
  0x19   : > { %p5795_p5 = por %p374_p2, %p373_p0  ;;  %p5799_p6 = por %p380_p4, %p379_p3 }
  0x1a   : > { %6837 = sst [smem:[#allocation23_spill]] %s5793_s30  ;;  %p413_p8 = scmp.lt.s32.totalorder %s5652_s24, 3 }
  0x1b   : > { %s6838_s0 = scalar_select %p5795_p5, 1, 0 }
  0x1c   : > { %s6840_s17 = scalar_select %p5799_p6, 1, 0 }
  0x1d   : > { %6839 = sst [smem:[#allocation24_spill]] %s6838_s0  ;;  %p5192_p9 = scmp.eq.s32.totalorder %s5778_s25, 0 }
  0x1e   : > { %6841 = sst [smem:[#allocation25_spill]] %s6840_s17  ;;  %p5806_p10 = pnand %p4422_p7, %p413_p8 }
  0x1f   : > { %s6843_s5 = sld [smem:[#allocation28_spill]]  ;;  %s5654_s28 = smov [#allocation5]  }
  0x20   : > { %p5172_p11 = pneg %p5806_p10  ;;  %s449_s29 = sshll.u32 %s5654_s28, 4  ;;  %s450_s29 = int_to_ptr.vmem [resolvable:$true] %s449_s29 }
  0x21   : > { %s6845_s3 = sld [smem:[#allocation27_spill]]  ;;  %s5655_s19 = smov 64  }
  0x22   : > { %p5817_p12 = pnand %p5192_p9, %p5172_p11  ;;  %s5656_s20 = smov 4  }
  0x23   : > { %s5658_s21 = smov 192   ;;  %s5659_s24 = smov 12  }
  0x24   : > { %s470_s23 = sshll.u32 %s6804_s9, 4  ;;  %s5660_s27 = smov [#allocation7]   ;;  %s471_s23 = int_to_ptr.hbm [resolvable:$true] %s470_s23 }
  0x25   : > { %s447_s26 = sshll.u32 %s6843_s5, 4  ;;  %s5657_s5 = smov [#allocation2]   ;;  %s448_s26 = int_to_ptr.hbm [resolvable:$true] %s447_s26 }
  0x26   : > { %5178 = dma.hbm_to_vmem [thread:$0]  (!%p5817_p12), %s448_s26, 2048, %s450_s29, [#allocation6], %s5655_s19, %s5655_s19, %s5656_s20  }
  0x27   : > { %s430_s17 = sshll.u32 %s6845_s3, 4  ;;  %s432_s28 = sshll.u32 %s5657_s5, 4  ;;  %s431_s17 = int_to_ptr.hbm [resolvable:$true] %s430_s17  ;;  %s433_s28 = int_to_ptr.vmem [resolvable:$true] %s432_s28 }
  0x28   : > { %5175 = dma.hbm_to_vmem [thread:$0]  (!%p5817_p12), %s431_s17, 6144, %s433_s28, [#allocation3], %s5658_s21, %s5658_s21, %s5659_s24  }
  0x29   : > { %s472_s3 = sshll.u32 %s5660_s27, 4  ;;  %s487_s26 = sshll.u32 %s6806_s11, 4  ;;  %s473_s3 = int_to_ptr.vmem [resolvable:$true] %s472_s3  ;;  %s488_s26 = int_to_ptr.hbm [resolvable:$true] %s487_s26 }
  0x2a   : > { %s5661_s29 = smov 128   ;;  %s5662_s5 = smov 8  }
  0x2b   : > { %5181 = dma.hbm_to_vmem [thread:$0]  (!%p5817_p12), %s471_s23, 4096, %s473_s3, [#allocation6], %s5661_s29, %s5661_s29, %s5662_s5  }
  0x2c   : > { %s5663_s14 = smov [#allocation8]   ;;  %524 = sbr.rel (%p5806_p10) target bundleno = 5409 (0x1521), region = 80 }
  0x2d   : > { %s489_s13 = sshll.u32 %s5663_s14, 4  ;;  %s490_s13 = int_to_ptr.vmem [resolvable:$true] %s489_s13 }
  0x2e   : > { %5184 = dma.hbm_to_vmem [thread:$0]  (!%p5817_p12), %s488_s26, 4096, %s490_s13, [#allocation9], %s5655_s19, %s5655_s19, %s5656_s20  }
  0x31   : > { %5619 = dma.done.wait (%p5192_p9), [#allocation3], 6144  }
  0x32   : > { %5621 = vsyncadd (%p5192_p9), [#allocation3], 4294961152 }
  0x33   : > { %5623 = dma.done.wait (%p5192_p9), [#allocation6], 6144  }
  0x34   : > { %5625 = vsyncadd (%p5192_p9), [#allocation6], 4294961152 }
  0x35   : > { %5627 = dma.done.wait (%p5192_p9), [#allocation9], 4096  }
  0x36   : > { %5629 = vsyncadd (%p5192_p9), [#allocation9], 4294963200  ;;  %s5853_s3 = sshll.u32 %s5778_s25, 1  ;;  %vm625_vm0 = vcmask 1040384   ;;  %s6846_s21 = sld [smem:[#allocation26_spill]]  ;;  %vm618_vm1 = vcmask 15360  }
  0x37   : > { %p597_p13 = scmp.lt.s32.totalorder %s5853_s3, 3  ;;  %v613_v0 = vld [vmem:[%s6796_s1] sm:$0x1]  ;;  %v4528_v5 = vld [vmem:[#allocation2 + $0xa8] sm:$0xf]  ;;  %vm911_vm2 = vcmask 261120  }
  0x38   : > { %v627_v3 = vsel %vm625_vm0, %v613_v0, 0  ;;  %v5044_v6 = vld [vmem:[#allocation2 + $0xb0] sm:$0xf0]  ;;  %v5043_v8 = vld [vmem:[#allocation2 + $0xac] sm:$0xf]  ;;  %s5664_s20 = smov 64  }
  0x39   : > { %s598_s13 = scalar_select %p597_p13, %s5853_s3, 3  ;;  %636 = vmatpush.bf16.msra.mxu0 %v627_v3  ;;  %v4529_v7 = vor.u32 %v5044_v6, %v4528_v5  ;;  %v4530_v9 = vld [vmem:[#allocation2 + $0xb4] sm:$0xf0]  ;;  %v4536_v10 = vld [vmem:[#allocation2 + $0xb0] sm:$0xf]  ;;  %vm932_vm3 = vcmask 130048  }
  0x3a   : > { %v4533_v11 = vor.u32 %v5043_v8, %v4530_v9  ;;  %v5045_v12 = vld [vmem:[#allocation2 + $0xb8] sm:$0xf0]  ;;  %v4516_v13 = vld [vmem:[#allocation2 + $0x90] sm:$0xf]  ;;  %v5040_v17 = vld [vmem:[#allocation2 + $0x94] sm:$0xf] }
  0x3b   : > { %s5021_s14 = sshll.u32 %s598_s13, 4  ;;  %v5041_v14 = vld [vmem:[#allocation2 + $0x98] sm:$0xf0]  ;;  %818 = vmatpush.bf16.msra.mxu1 %v4529_v7  ;;  %v4537_v15 = vor.u32 %v5045_v12, %v4536_v10  ;;  %v4518_v18 = vld [vmem:[#allocation2 + $0x9c] sm:$0xf0]  ;;  %s5665_s28 = smov 96  }
  0x3c   : > { %s5860_s22 = scalar_lea.vmem %s6846_s21, %s5021_s14  ;;  %v4517_v16 = vor.u32 %v5041_v14, %v4516_v13  ;;  %v4524_v19 = vld [vmem:[#allocation2 + $0x98] sm:$0xf]  ;;  %837 = vmatpush.bf16.msra.mxu2 %v4533_v11  ;;  %v4521_v20 = vor.u32 %v5040_v17, %v4518_v18  ;;  %v5042_v21 = vld [vmem:[#allocation2 + $0xa0] sm:$0xf0]  ;;  %v5037_v25 = vld [vmem:[#allocation2 + $0x7c] sm:$0xf] }
  0x3d   : > { %v606_v1 = vld [vmem:[%s5860_s22] sm:$0xff]  ;;  %v607_v2 = vld [vmem:[%s5860_s22 + $0x8] sm:$0xff]  ;;  %v4504_v22 = vld [vmem:[#allocation2 + $0x78] sm:$0xf]  ;;  %856 = vmatpush.bf16.msra.mxu3 %v4537_v15  ;;  %v4525_v24 = vor.u32 %v5042_v21, %v4524_v19  ;;  %s5666_s23 = smov 32   ;;  %s6851_s0 = sld [smem:[#allocation29_spill]] }
  0x3e   : > { %v611_v4 = vpack.c.bf16 %v607_v2, %v606_v1  ;;  %v5038_v23 = vld [vmem:[#allocation2 + $0x80] sm:$0xf0]  ;;  %v4506_v26 = vld [vmem:[#allocation2 + $0x84] sm:$0xf0]  ;;  %v4512_v27 = vld [vmem:[#allocation2 + $0x80] sm:$0xf] }
  0x3f   : > { %v5039_v28 = vld [vmem:[#allocation2 + $0x88] sm:$0xf0]  ;;  %819 = vmatpush.bf16.msra.mxu1 %v4517_v16  ;;  %v4505_v29 = vor.u32 %v5038_v23, %v4504_v22  ;;  %v4509_v30 = vor.u32 %v5037_v25, %v4506_v26  ;;  %v4492_v31 = vld [vmem:[#allocation2 + $0x60] sm:$0xf]  ;;  %v5034_v33 = vld [vmem:[#allocation2 + $0x64] sm:$0xf] }
  0x40   : > { %4440 = vmatmul.msk.bf16.vlgmr.msra.gmra.mxu0 %vm618_vm1, %v611_v4  ;;  %838 = vmatpush.bf16.msra.mxu2 %v4521_v20  ;;  %v5035_v32 = vld [vmem:[#allocation2 + $0x68] sm:$0xf0]  ;;  %v4513_v34 = vor.u32 %v5039_v28, %v4512_v27  ;;  %v4494_v35 = vld [vmem:[#allocation2 + $0x6c] sm:$0xf0]  ;;  %v4500_v36 = vld [vmem:[#allocation2 + $0x68] sm:$0xf] }
  0x41   : > { %857 = vmatpush.bf16.msra.mxu3 %v4525_v24  ;;  %v5036_v37 = vld [vmem:[#allocation2 + $0x70] sm:$0xf0]  ;;  %v4480_v38 = vld [vmem:[#allocation2 + $0x48] sm:$0xf]  ;;  %v4493_v40 = vor.u32 %v5035_v32, %v4492_v31  ;;  %v5031_v41 = vld [vmem:[#allocation2 + $0x4c] sm:$0xf]  ;;  %v4497_v43 = vor.u32 %v5034_v33, %v4494_v35 }
  0x42   : > { %v5032_v39 = vld [vmem:[#allocation2 + $0x50] sm:$0xf0]  ;;  %v4482_v42 = vld [vmem:[#allocation2 + $0x54] sm:$0xf0]  ;;  %v4488_v44 = vld [vmem:[#allocation2 + $0x50] sm:$0xf]  ;;  %v4501_v46 = vor.u32 %v5036_v37, %v4500_v36 }
  0x43   : > { %820 = vmatpush.bf16.msra.mxu1 %v4505_v29  ;;  %v5033_v45 = vld [vmem:[#allocation2 + $0x58] sm:$0xf0]  ;;  %v4481_v47 = vor.u32 %v5032_v39, %v4480_v38  ;;  %v4485_v48 = vor.u32 %v5031_v41, %v4482_v42  ;;  %v4468_v50 = vld [vmem:[#allocation2 + $0x30] sm:$0xf]  ;;  %v5028_v52 = vld [vmem:[#allocation2 + $0x34] sm:$0xf] }
  0x44   : > { %839 = vmatpush.bf16.msra.mxu2 %v4509_v30  ;;  %v4489_v49 = vor.u32 %v5033_v45, %v4488_v44  ;;  %v5029_v51 = vld [vmem:[#allocation2 + $0x38] sm:$0xf0]  ;;  %v4470_v54 = vld [vmem:[#allocation2 + $0x3c] sm:$0xf0]  ;;  %v4476_v55 = vld [vmem:[#allocation2 + $0x38] sm:$0xf] }
  0x45   : > { %858 = vmatpush.bf16.msra.mxu3 %v4513_v34  ;;  %v4469_v53 = vor.u32 %v5029_v51, %v4468_v50  ;;  %v5030_v56 = vld [vmem:[#allocation2 + $0x40] sm:$0xf0]  ;;  %v4473_v57 = vor.u32 %v5028_v52, %v4470_v54  ;;  %v4456_v59 = vld [vmem:[#allocation2 + $0x18] sm:$0xf]  ;;  %v5025_v61 = vld [vmem:[#allocation2 + $0x1c] sm:$0xf] }
  0x46   : > { %v4477_v58 = vor.u32 %v5030_v56, %v4476_v55  ;;  %v5026_v60 = vld [vmem:[#allocation2 + $0x20] sm:$0xf0]  ;;  %v4458_v63 = vld [vmem:[#allocation2 + $0x24] sm:$0xf0]  ;;  %v4464_v0 = vld [vmem:[#allocation2 + $0x20] sm:$0xf] }
  0x47   : > { %821 = vmatpush.bf16.msra.mxu1 %v4493_v40  ;;  %v4457_v62 = vor.u32 %v5026_v60, %v4456_v59  ;;  %v5027_v1 = vld [vmem:[#allocation2 + $0x28] sm:$0xf0]  ;;  %v4461_v2 = vor.u32 %v5025_v61, %v4458_v63  ;;  %v4444_v4 = vld [vmem:[#allocation2] sm:$0xf]  ;;  %v5022_v6 = vld [vmem:[#allocation2 + $0x4] sm:$0xf] }
  0x48   : > { %840 = vmatpush.bf16.msra.mxu2 %v4497_v43  ;;  %v4465_v3 = vor.u32 %v5027_v1, %v4464_v0  ;;  %v5023_v5 = vld [vmem:[#allocation2 + $0x8] sm:$0xf0]  ;;  %v4446_v8 = vld [vmem:[#allocation2 + $0xc] sm:$0xf0]  ;;  %v4452_v9 = vld [vmem:[#allocation2 + $0x8] sm:$0xf] }
  0x49   : > { %859 = vmatpush.bf16.msra.mxu3 %v4501_v46  ;;  %v4445_v7 = vor.u32 %v5023_v5, %v4444_v4  ;;  %v5024_v10 = vld [vmem:[#allocation2 + $0x10] sm:$0xf0]  ;;  %v4449_v11 = vor.u32 %v5022_v6, %v4446_v8  ;;  %v4439_v14 = vld [vmem:[%s5860_s22 + $0x18] sm:$0xff]  ;;  %v5251_v17 = vld [vmem:[%s6797_s2] ss:$0 sm:$0xff]  ;;  %s6852_s19 = sld [smem:[#allocation30_spill]] }
  0x4a   : > { %v4453_v12 = vor.u32 %v5024_v10, %v4452_v9  ;;  %v4438_v13 = vld [vmem:[%s5860_s22 + $0x10] sm:$0xff]  ;;  %v682_v24 = vld [vmem:[%s6799_s4] sm:$0x7]  ;;  %s6859_s22 = sld [smem:[#allocation19_spill]]  ;;  %s5151_s29 = sshll.u32 %s5778_s25, 5 }
  0x4b   : > { %822 = vmatpush.bf16.msra.mxu1 %v4481_v47  ;;  %v612_v15 = vpack.c.bf16 %v4439_v14, %v4438_v13  ;;  %v5883_v26 = vperm.slane %v682_v24, 1  ;;  %v5887_v30 = vperm.slane %v682_v24, 2  ;;  %v5891_v33 = vperm.slane %v682_v24, 0  ;;  %s6860_s5 = sld [smem:[#allocation31_spill]] }
  0x4c   : > { %841 = vmatpush.bf16.msra.mxu2 %v4485_v48 }
  0x4d   : > { %860 = vmatpush.bf16.msra.mxu3 %v4489_v49 }
  0x4f   : > { %823 = vmatpush.bf16.msra.mxu1 %v4469_v53 }
  0x50   : > { %842 = vmatpush.bf16.msra.mxu2 %v4473_v57  ;;  %4441 = vmatmul.msk.bf16.gmra.mxu0 %vm618_vm1, %v612_v15  ;;  %s6689_s24 = sand.u32 1, %s6859_s22  }
  0x51   : > { %861 = vmatpush.bf16.msra.mxu3 %v4477_v58  ;;  %s4433_s18 = sshll.u32 %s6689_s24, 5  ;;  %s4265_s13 = scalar_lea.hbm %s6860_s5, %s5151_s29 }
  0x52   : > { %s4268_s15 = sshll.u32 %s4265_s13, 4  ;;  %s4248_s16 = scalar_lea.sflag [#allocation4], %s6689_s24  ;;  %s4269_s15 = int_to_ptr.hbm [resolvable:$true] %s4268_s15 }
  0x53   : > { %824 = vmatpush.bf16.msra.mxu1 %v4457_v62  ;;  %s5560_s21 = sshra.s32 %s4269_s15, 4  ;;  %s5561_s21 = int_to_ptr.hbm [resolvable:$true] %s5560_s21 }
  0x54   : > { %843 = vmatpush.bf16.msra.mxu2 %v4461_v2  ;;  %s5562_s22 = scalar_lea.hbm %s5561_s21, 32  ;;  %p5567_p3 = scmp.lt.s32.totalorder %s5561_s21, %s6860_s5 }
  0x55   : > { %862 = vmatpush.bf16.msra.mxu3 %v4465_v3  ;;  %p5563_p0 = scmp.ne.s32.totalorder %s5561_s21, %s5562_s22 }
  0x57   : > { %825 = vmatpush.bf16.msra.mxu1 %v4445_v7  ;;  %p5564_p1 = pnand %p5563_p0, %p5795_p5 }
  0x58   : > { %844 = vmatpush.bf16.msra.mxu2 %v4449_v11 }
  0x59   : > { %863 = vmatpush.bf16.msra.mxu3 %v4453_v12  ;;  %p5565_p2 = pneg %p5564_p1 }
  0xbd   : > { %v638_v16 = vpop.f32.mrf.mxu0 }
  0xbe   : > { %v5874_v19 = vadd.f32 %v5251_v17, %v638_v16 }
  0xc5   : > { %v640_v18 = vpop.f32.mrf.mxu0 }
  0xc6   : > { %v5876_v20 = vadd.f32 %v5251_v17, %v640_v18 }
  0xc8   : > { %v648_v21 = vpack.c.bf16 %v5876_v20, %v5874_v19 }
  0xca   : > { %826 = vmatmul.bf16.vlgmr.msra.gmra.mxu1 %v648_v21  ;;  %845 = vmatmul.bf16.vlgmr.msra.gmra.mxu2 %v648_v21 }
  0xcb   : > { %864 = vmatmul.bf16.vlgmr.msra.gmra.mxu3 %v648_v21 }
  0xcd   : > { %v643_v23 = vpop.f32.mrf.mxu0 }
  0xce   : > { %v5885_v28 = vadd.f32 %v5251_v17, %v643_v23 }
  0xd5   : > { %v645_v29 = vpop.f32.mrf.mxu0 }
  0xd6   : > { %v5889_v31 = vadd.f32 %v5251_v17, %v645_v29 }
  0xd8   : > { %v649_v35 = vpack.c.bf16 %v5889_v31, %v5885_v28 }
  0xda   : > { %831 = vmatmul.bf16.gmra.mxu1 %v649_v35  ;;  %850 = vmatmul.bf16.gmra.mxu2 %v649_v35 }
  0xdb   : > { %869 = vmatmul.bf16.gmra.mxu3 %v649_v35 }
 0x147   : > { %v827_v22 = vpop.f32.mrf.mxu1 }
 0x148   : > { %v828_v39 = vadd.f32 %v827_v22, %v5891_v33 }
 0x14a   : > { %v875_v48 = vmul.f32 0.17677669, %v828_v39 }
 0x14c   : > { %v895_v55 = vpack.c.bf16 %v875_v48, %v875_v48 }
 0x14d   : > { %v846_v25 = vpop.f32.mrf.mxu2 }
 0x14e   : > { %v865_v27 = vpop.f32.mrf.mxu3  ;;  %v847_v34 = vadd.f32 %v846_v25, %v5883_v26  ;;  %v903_v59 = vunpack.c.l.b16 %v895_v55 }
 0x14f   : > { %v829_v32 = vpop.f32.mrf.mxu1  ;;  %v866_v36 = vadd.f32 %v865_v27, %v5887_v30 }
 0x150   : > { %v830_v37 = vadd.f32 %v829_v32, %v5891_v33  ;;  %v897_v40 = vpack.c.bf16 %v847_v34, %v847_v34 }
 0x151   : > { %v899_v44 = vpack.c.bf16 %v866_v36, %v866_v36 }
 0x152   : > { %v876_v45 = vmul.f32 0.17677669, %v830_v37  ;;  %v908_v49 = vunpack.c.l.b16 %v897_v40 }
 0x153   : > { %v984_v52 = vunpack.c.l.b16 %v899_v44 }
 0x154   : > { %v896_v53 = vpack.c.bf16 %v876_v45, %v876_v45 }
 0x155   : > { %v848_v38 = vpop.f32.mrf.mxu2 }
 0x156   : > { %v849_v41 = vadd.f32 %v848_v38, %v5883_v26  ;;  %v867_v42 = vpop.f32.mrf.mxu3  ;;  %v904_v58 = vunpack.c.l.b16 %v896_v53 }
 0x157   : > { %v868_v43 = vadd.f32 %v867_v42, %v5887_v30  ;;  %v5919_v3 = vpop.f32.mrf.mxu1 }
 0x158   : > { %v898_v46 = vpack.c.bf16 %v849_v41, %v849_v41  ;;  %v5907_v60 = vpack.c.b16 %v904_v58, %v903_v59 }
 0x159   : > { %v900_v47 = vpack.c.bf16 %v868_v43, %v868_v43 }
 0x15a   : > { %v909_v50 = vunpack.c.l.b16 %v898_v46 }
 0x15b   : > { %v985_v51 = vunpack.c.l.b16 %v900_v47 }
 0x15c   : > { %v910_v54 = vpack.c.b16 %v909_v50, %v908_v49 }
 0x15d   : > { %v5901_v56 = vpack.c.b16 %v985_v51, %v984_v52 }
 0x15e   : > { %1160 = vrot.lane.b32.xlu1 %v910_v54, %s5664_s20  ;;  %1008 = vrot.lane.b32.xlu0 %v910_v54, %s5665_s28  ;;  %v916_v57 = vsel %vm911_vm2, %v910_v54, 0 }
 0x15f   : > { %925 = vmatpush.bf16.xpose.msrb.mxu0 %v916_v57  ;;  %v5921_v4 = vpop.f32.mrf.mxu1 }
 0x166   : > { %1158 = vrot.lane.b32.xlu1 %v5907_v60, %s5664_s20  ;;  %1006 = vrot.lane.b32.xlu0 %v5907_v60, %s5665_s28 }
 0x167   : > { %998 = vmatpush.bf16.msra.mxu0 %v5901_v56 }
 0x168   : > { %4538 = vmatmul.msk.bf16.vlgmr.msrb.gmra.mxu0 %vm911_vm2, %v5907_v60 }
 0x1d0   : > { %v1161_v61 = vpop.permute.xlu1 %1160  ;;  %v1009_v62 = vpop.permute.xlu0 %1008 }
 0x1d1   : > { %v1166_v63 = vsel %vm911_vm2, %v1161_v61, 0  ;;  %v1014_v0 = vsel %vm911_vm2, %v1009_v62, 0 }
 0x1d2   : > { %1023 = vmatpush.bf16.xpose.msrb.mxu1 %v1014_v0 }
 0x1d8   : > { %v1007_v1 = vpop.permute.xlu0 %1006  ;;  %v1159_v2 = vpop.permute.xlu1 %1158 }
 0x1d9   : > { %4540 = vmatmul.msk.bf16.vlgmr.msrb.gmra.mxu1 %vm911_vm2, %v1007_v1 }
 0x1da   : > { %1175 = vmatpush.bf16.xpose.msra.mxu1 %v1166_v63 }
 0x1e5   : > { %v927_v13 = vpop.f32.mrf.mxu0 }
 0x1e6   : > { %v933_v14 = vsel %vm932_vm3, %v927_v13, -inf }
 0x1e9   : > { %4560 = vmatmul.msk.bf16.vlgmr.msra.gmra.mxu1 %vm911_vm2, %v1159_v2 }
 0x1ed   : > { %v929_v15 = vpop.f32.mrf.mxu0 }
 0x1ee   : > { %v936_v16 = vsel %vm932_vm3, %v929_v15, -inf }
 0x256   : > { %v1025_v5 = vpop.f32.mrf.mxu1 }
 0x257   : > { %v1030_v6 = vsel %vm932_vm3, %v1025_v5, -inf }
 0x258   : > { %1031 = vmax.xlane.f32.xlu2 %v1030_v6 }
 0x25e   : > { %v1027_v7 = vpop.f32.mrf.mxu1 }
 0x25f   : > { %v1033_v8 = vsel %vm932_vm3, %v1027_v7, -inf }
 0x260   : > { %1034 = vmax.xlane.f32.xlu2 %v1033_v8 }
 0x266   : > { %v1177_v9 = vpop.f32.mrf.mxu1 }
 0x267   : > { %v1182_v10 = vsel %vm932_vm3, %v1177_v9, -inf }
 0x268   : > { %1183 = vmax.xlane.f32.xlu0 %v1182_v10 }
 0x26e   : > { %v1179_v11 = vpop.f32.mrf.mxu1 }
 0x26f   : > { %v1185_v12 = vsel %vm932_vm3, %v1179_v11, -inf }
 0x270   : > { %1186 = vmax.xlane.f32.xlu1 %v1185_v12 }
 0x278   : > { %934 = vmax.xlane.f32.xlu1 %v933_v14 }
 0x27c   : > { %1231 = vrot.lane.b32.xlu0 %v5901_v56, %s5664_s20 }
 0x280   : > { %937 = vmax.xlane.f32.xlu1 %v936_v16 }
 0x284   : > { %1285 = vrot.lane.b32.xlu0 %v910_v54, %s5666_s23 }
 0x2cb   : > { %v1032_v17 = vpop.xlane.xlu2 %1031 }
 0x2cc   : > { %v1036_v18 = vsub.f32 %v1025_v5, %v1032_v17 }
 0x2ce   : > { %v1038_v21 = vmul.f32 1.442695, %v1036_v18 }
 0x2d0   : > { %5264 = vpow2.f32 %v1038_v21 }
 0x2d3   : > { %v1035_v22 = vpop.xlane.xlu2 %1034 }
 0x2d4   : > { %v1037_v23 = vsub.f32 %v1027_v7, %v1035_v22 }
 0x2d6   : > { %v5932_v24 = vpop.eup %5264  ;;  %v1040_v25 = vmul.f32 1.442695, %v1037_v23 }
 0x2d7   : > { %v1042_v27 = vsel %vm932_vm3, %v5932_v24, 0.0 }
 0x2d8   : > { %5266 = vpow2.f32 %v1040_v25  ;;  %1043 = vadd.xlane.f32.xlu2 %v1042_v27 }
 0x2db   : > { %v1184_v29 = vpop.xlane.xlu0 %1183 }
 0x2dc   : > { %v1188_v32 = vsub.f32 %v1177_v9, %v1184_v29 }
 0x2de   : > { %v5936_v34 = vpop.eup %5266  ;;  %v1190_v35 = vmul.f32 1.442695, %v1188_v32 }
 0x2df   : > { %v1045_v36 = vsel %vm932_vm3, %v5936_v34, 0.0 }
 0x2e0   : > { %5268 = vpow2.f32 %v1190_v35  ;;  %1046 = vadd.xlane.f32.xlu2 %v1045_v36 }
 0x2e3   : > { %v1187_v37 = vpop.xlane.xlu1 %1186 }
 0x2e4   : > { %v1189_v38 = vsub.f32 %v1179_v11, %v1187_v37 }
 0x2e6   : > { %v5940_v39 = vpop.eup %5268  ;;  %v1192_v40 = vmul.f32 1.442695, %v1189_v38 }
 0x2e7   : > { %v1194_v41 = vsel %vm932_vm3, %v5940_v39, 0.0 }
 0x2e8   : > { %5270 = vpow2.f32 %v1192_v40  ;;  %1195 = vadd.xlane.f32.xlu2 %v1194_v41 }
 0x2eb   : > { %v935_v42 = vpop.xlane.xlu1 %934 }
 0x2ec   : > { %v939_v50 = vsub.f32 %v927_v13, %v935_v42 }
 0x2ee   : > { %v5944_v43 = vpop.eup %5270  ;;  %v941_v51 = vmul.f32 1.442695, %v939_v50  ;;  %v1232_v32 = vpop.permute.xlu0 %1231 }
 0x2ef   : > { %v1197_v44 = vsel %vm932_vm3, %v5944_v43, 0.0 }
 0x2f0   : > { %1198 = vadd.xlane.f32.xlu2 %v1197_v44 }
 0x2f3   : > { %v938_v45 = vpop.xlane.xlu1 %937 }
 0x2f4   : > { %v940_v46 = vsub.f32 %v929_v15, %v938_v45 }
 0x2f6   : > { %v943_v47 = vmul.f32 1.442695, %v940_v46 }
 0x2f8   : > { %5272 = vpow2.f32 %v943_v47 }
 0x2f9   : > { %5274 = vpow2.f32 %v941_v51 }
 0x2fe   : > { %v5948_v48 = vpop.eup %5272 }
 0x2ff   : > { %v948_v49 = vsel %vm932_vm3, %v5948_v48, 0.0  ;;  %v5956_v52 = vpop.eup %5274 }
 0x300   : > { %949 = vadd.xlane.f32.xlu1 %v948_v49  ;;  %v945_v53 = vsel %vm932_vm3, %v5956_v52, 0.0 }
 0x308   : > { %1079 = vrot.lane.b32.xlu2 %v5901_v56, %s5665_s28 }
 0x319   : > { %1283 = vrot.lane.b32.xlu1 %v5907_v60, %s5666_s23 }
 0x331   : > { %946 = vadd.xlane.f32.xlu2 %v945_v53 }
 0x34b   : > { %v1044_v54 = vpop.xlane.xlu2 %1043 }
 0x34c   : > { %5276 = vrcp.f32 %v1044_v54  ;;  %v1059_v9 = vand.u32 2147483648, %v1044_v54  ;;  %vm1053_vm8 = vweird.f32 %v1044_v54  ;;  %v1057_v10 = vand.u32 2147483647, %v1044_v54 }
 0x34e   : > { %v1060_v16 = vor.u32 1.1754944e-38, %v1059_v9  ;;  %vm1058_vm11 = vcmp.eq.f32.partialorder %v1057_v10, 8.507059e+37 }
 0x352   : > { %v5277_v55 = vpop.eup %5276 }
 0x353   : > { %v1047_v57 = vpop.xlane.xlu2 %1046  ;;  %v1049_v58 = vmul.f32 %v5277_v55, %v1044_v54  ;;  %vm1054_vm5 = vweird.f32 %v5277_v55 }
 0x354   : > { %5278 = vrcp.f32 %v1047_v57  ;;  %v1074_v2 = vand.u32 2147483648, %v1047_v57  ;;  %vm1068_vm6 = vweird.f32 %v1047_v57  ;;  %v1072_v7 = vand.u32 2147483647, %v1047_v57  ;;  %vm1055_vm9 = vmor %vm1053_vm8, %vm1054_vm5 }
 0x355   : > { %v1050_v59 = vsub.f32 1.0, %v1049_v58  ;;  %v5966_v58 = vld [vmem:[#allocation5 + $0x8] sm:$0xff] }
 0x356   : > { %v1075_v13 = vor.u32 1.1754944e-38, %v1074_v2  ;;  %vm1073_vm10 = vcmp.eq.f32.partialorder %v1072_v7, 8.507059e+37  ;;  %1150 = vmatpush.bf16.msrb.mxu0 %v5966_v58 }
 0x357   : > { %v1051_v60 = vmul.f32 %v5277_v55, %v1050_v59  ;;  %v5969_v59 = vld [vmem:[#allocation5] sm:$0xff] }
 0x359   : > { %v1052_v5 = vadd.f32 %v5277_v55, %v1051_v60 }
 0x35a   : > { %v5279_v61 = vpop.eup %5278  ;;  %1151 = vmatpush.bf16.msrb.mxu0 %v5969_v59 }
 0x35b   : > { %v1064_v62 = vmul.f32 %v5279_v61, %v1047_v57  ;;  %v1196_v63 = vpop.xlane.xlu2 %1195  ;;  %vm1069_vm4 = vweird.f32 %v5279_v61  ;;  %v1056_v14 = vsel %vm1055_vm9, %v5277_v55, %v1052_v5 }
 0x35c   : > { %5280 = vrcp.f32 %v1196_v63  ;;  %vm1070_vm7 = vmor %vm1068_vm6, %vm1069_vm4  ;;  %v1061_v18 = vsel %vm1058_vm11, %v1060_v16, %v1056_v14  ;;  %v1211_v44 = vand.u32 2147483648, %v1196_v63  ;;  %vm1205_vm0 = vweird.f32 %v1196_v63 }
 0x35d   : > { %v1065_v0 = vsub.f32 1.0, %v1064_v62  ;;  %v1062_v29 = vmul.f32 %v5932_v24, %v1061_v18  ;;  %v1209_v24 = vand.u32 2147483647, %v1196_v63 }
 0x35e   : > { %v1212_v49 = vor.u32 1.1754944e-38, %v1211_v44 }
 0x35f   : > { %v1066_v1 = vmul.f32 %v5279_v61, %v1065_v0  ;;  %vm1210_vm5 = vcmp.eq.f32.partialorder %v1209_v24, 8.507059e+37 }
 0x361   : > { %v1067_v6 = vadd.f32 %v5279_v61, %v1066_v1 }
 0x362   : > { %v5281_v8 = vpop.eup %5280 }
 0x363   : > { %v1071_v11 = vsel %vm1070_vm7, %v5279_v61, %v1067_v6  ;;  %v1199_v12 = vpop.xlane.xlu2 %1198  ;;  %v1201_v15 = vmul.f32 %v5281_v8, %v1196_v63  ;;  %vm1206_vm13 = vweird.f32 %v5281_v8 }
 0x364   : > { %5282 = vrcp.f32 %v1199_v12  ;;  %v1076_v17 = vsel %vm1073_vm10, %v1075_v13, %v1071_v11  ;;  %v1226_v40 = vand.u32 2147483648, %v1199_v12  ;;  %vm1220_vm14 = vweird.f32 %v1199_v12  ;;  %vm1207_vm1 = vmor %vm1205_vm0, %vm1206_vm13 }
 0x365   : > { %v1202_v21 = vsub.f32 1.0, %v1201_v15  ;;  %v1077_v22 = vmul.f32 %v5936_v34, %v1076_v17  ;;  %v1224_v34 = vand.u32 2147483647, %v1199_v12 }
 0x366   : > { %v1227_v46 = vor.u32 1.1754944e-38, %v1226_v40 }
 0x367   : > { %v1203_v35 = vmul.f32 %v5281_v8, %v1202_v21  ;;  %v1078_v37 = vpack.c.bf16 %v1077_v22, %v1062_v29  ;;  %vm1225_vm4 = vcmp.eq.f32.partialorder %v1224_v34, 8.507059e+37  ;;  %v1286_v21 = vpop.permute.xlu0 %1285  ;;  %v5051_v29 = vld [vmem:[#allocation5 + $0x28] sm:$0xff] }
 0x369   : > { %v1204_v41 = vadd.f32 %v5281_v8, %v1203_v35  ;;  %v851_v35 = vpop.f32.mrf.mxu2 }
 0x36a   : > { %v5283_v23 = vpop.eup %5282 }
 0x36b   : > { %v1216_v25 = vmul.f32 %v5283_v23, %v1199_v12  ;;  %v1080_v27 = vpop.permute.xlu2 %1079  ;;  %vm1221_vm12 = vweird.f32 %v5283_v23  ;;  %v1208_v47 = vsel %vm1207_vm1, %v5281_v8, %v1204_v41 }
 0x36c   : > { %1092 = vmatpush.bf16.msrb.mxu2 %v1080_v27  ;;  %vm1222_vm15 = vmor %vm1220_vm14, %vm1221_vm12  ;;  %v1213_v51 = vsel %vm1210_vm5, %v1212_v49, %v1208_v47  ;;  %v5048_v27 = vld [vmem:[#allocation5 + $0x10] sm:$0xff]  ;;  %v835_v49 = vadd.f32 %v5921_v4, %v5891_v33 }
 0x36d   : > { %v1217_v36 = vsub.f32 1.0, %v1216_v25  ;;  %v1214_v54 = vmul.f32 %v5940_v39, %v1213_v51  ;;  %v5049_v25 = vld [vmem:[#allocation5 + $0x18] sm:$0xff] }
 0x36e   : > { %1121 = vmatpush.bf16.msrb.mxu3 %v5049_v25 }
 0x36f   : > { %v1218_v38 = vmul.f32 %v5283_v23, %v1217_v36  ;;  %4541 = vmatmul.msk.bf16.vlgmr.msrb.gmra.mxu2 %vm932_vm3, %v1078_v37 }
 0x370   : > { %1244 = vmatpush.bf16.msra.mxu2 %v1232_v32  ;;  %v5050_v32 = vld [vmem:[#allocation5 + $0x20] sm:$0xff] }
 0x371   : > { %v1219_v42 = vadd.f32 %v5283_v23, %v1218_v38  ;;  %v853_v36 = vpop.f32.mrf.mxu2 }
 0x372   : > { %1122 = vmatpush.bf16.msrb.mxu3 %v5048_v27 }
 0x373   : > { %v1223_v45 = vsel %vm1222_vm15, %v5283_v23, %v1219_v42  ;;  %v950_v57 = vpop.xlane.xlu1 %949  ;;  %v1291_v23 = vsel %vm911_vm2, %v1286_v21, 0 }
 0x374   : > { %v1228_v50 = vsel %vm1225_vm4, %v1227_v46, %v1223_v45  ;;  %5284 = vrcp.f32 %v950_v57  ;;  %v977_v2 = vand.u32 2147483648, %v950_v57  ;;  %vm971_vm7 = vweird.f32 %v950_v57 }
 0x375   : > { %v1229_v53 = vmul.f32 %v5944_v43, %v1228_v50  ;;  %v975_v5 = vand.u32 2147483647, %v950_v57 }
 0x376   : > { %v978_v11 = vor.u32 1.1754944e-38, %v977_v2  ;;  %1273 = vmatpush.bf16.msra.mxu3 %v5051_v29 }
 0x377   : > { %v1230_v55 = vpack.c.bf16 %v1229_v53, %v1214_v54  ;;  %vm976_vm10 = vcmp.eq.f32.partialorder %v975_v5, 8.507059e+37  ;;  %v878_v53 = vmul.f32 0.17677669, %v835_v49 }
 0x37a   : > { %v5285_v61 = vpop.eup %5284  ;;  %1274 = vmatpush.bf16.msra.mxu3 %v5050_v32 }
 0x37b   : > { %v967_v62 = vmul.f32 %v5285_v61, %v950_v57  ;;  %vm972_vm6 = vweird.f32 %v5285_v61 }
 0x37c   : > { %vm973_vm8 = vmor %vm971_vm7, %vm972_vm6 }
 0x37d   : > { %v968_v63 = vsub.f32 1.0, %v967_v62 }
 0x37f   : > { %4561 = vmatmul.msk.bf16.vlgmr.msra.gmra.mxu2 %vm932_vm3, %v1230_v55  ;;  %v969_v43 = vmul.f32 %v5285_v61, %v968_v63  ;;  %v1409_v55 = vpack.c.bf16 %v878_v53, %v878_v53 }
 0x381   : > { %v970_v0 = vadd.f32 %v5285_v61, %v969_v43 }
 0x383   : > { %v974_v8 = vsel %vm973_vm8, %v5285_v61, %v970_v0  ;;  %v1417_v61 = vunpack.c.l.b16 %v1409_v55 }
 0x384   : > { %v979_v13 = vsel %vm976_vm10, %v978_v11, %v974_v8 }
 0x385   : > { %v980_v17 = vmul.f32 %v5948_v48, %v979_v13  ;;  %v852_v48 = vadd.f32 %v851_v35, %v5883_v26 }
 0x387   : > { %v1410_v37 = vpack.c.bf16 %v852_v48, %v852_v48 }
 0x389   : > { %v1421_v41 = vunpack.c.l.b16 %v1410_v37 }
 0x3a4   : > { %v947_v60 = vpop.xlane.xlu2 %946 }
 0x3a5   : > { %5286 = vrcp.f32 %v947_v60  ;;  %v962_v7 = vand.u32 2147483648, %v947_v60  ;;  %v960_v10 = vand.u32 2147483647, %v947_v60  ;;  %vm956_vm11 = vweird.f32 %v947_v60 }
 0x3a7   : > { %v963_v14 = vor.u32 1.1754944e-38, %v962_v7  ;;  %vm961_vm13 = vcmp.eq.f32.partialorder %v960_v10, 8.507059e+37  ;;  %v1284_v7 = vpop.permute.xlu1 %1283 }
 0x3ab   : > { %v5287_v39 = vpop.eup %5286 }
 0x3ac   : > { %v952_v1 = vmul.f32 %v5287_v39, %v947_v60  ;;  %vm957_vm9 = vweird.f32 %v5287_v39 }
 0x3ad   : > { %vm958_vm12 = vmor %vm956_vm11, %vm957_vm9 }
 0x3ae   : > { %v953_v6 = vsub.f32 1.0, %v952_v1 }
 0x3b0   : > { %v954_v9 = vmul.f32 %v5287_v39, %v953_v6 }
 0x3b2   : > { %v955_v12 = vadd.f32 %v5287_v39, %v954_v9 }
 0x3b4   : > { %v959_v15 = vsel %vm958_vm12, %v5287_v39, %v955_v12 }
 0x3b5   : > { %v964_v16 = vsel %vm961_vm13, %v963_v14, %v959_v15 }
 0x3b6   : > { %v965_v18 = vmul.f32 %v5956_v52, %v964_v16  ;;  %v854_v52 = vadd.f32 %v853_v36, %v5883_v26  ;;  %v833_v26 = vadd.f32 %v5919_v3, %v5891_v33  ;;  %v870_v3 = vpop.f32.mrf.mxu3 }
 0x3b7   : > { %v871_v4 = vadd.f32 %v870_v3, %v5887_v30 }
 0x3b8   : > { %v981_v22 = vpack.c.bf16 %v980_v17, %v965_v18  ;;  %v1411_v38 = vpack.c.bf16 %v854_v52, %v854_v52  ;;  %v877_v51 = vmul.f32 0.17677669, %v833_v26 }
 0x3b9   : > { %v1412_v43 = vpack.c.bf16 %v871_v4, %v871_v4 }
 0x3ba   : > { %4539 = vmatmul.msk.bf16.vlgmr.msra.gmra.mxu0 %vm932_vm3, %v981_v22  ;;  %v1422_v42 = vunpack.c.l.b16 %v1411_v38  ;;  %v1408_v54 = vpack.c.bf16 %v877_v51, %v877_v51 }
 0x3bb   : > { %1300 = vmatpush.bf16.xpose.msra.mxu0 %v1291_v23  ;;  %v1495_v0 = vunpack.c.l.b16 %v1412_v43 }
 0x3bc   : > { %v5978_v34 = vpack.c.b16 %v1422_v42, %v1421_v41  ;;  %v1416_v57 = vunpack.c.l.b16 %v1408_v54 }
 0x3be   : > { %v1428_v45 = vsel %vm911_vm2, %v5978_v34, 0  ;;  %v5988_v62 = vpack.c.b16 %v1417_v61, %v1416_v57  ;;  %v872_v33 = vpop.f32.mrf.mxu3 }
 0x3bf   : > { %v873_v63 = vadd.f32 %v872_v33, %v5887_v30 }
 0x3c1   : > { %v1413_v39 = vpack.c.bf16 %v873_v63, %v873_v63 }
 0x3c3   : > { %v1496_v1 = vunpack.c.l.b16 %v1413_v39 }
 0x3c5   : > { %v5994_v6 = vpack.c.b16 %v1496_v1, %v1495_v0 }
 0x3f2   : > { %v1094_v40 = vpop.f32.mrf.mxu2 }
 0x3fa   : > { %v1096_v44 = vpop.f32.mrf.mxu2 }
 0x3fb   : > { %v1099_v24 = vpack.c.bf16 %v1096_v44, %v1094_v40 }
 0x3fd   : > { %4550 = vmatmul.msk.bf16.vlgmr.msrb.gmra.mxu3 %vm911_vm2, %v1099_v24 }
 0x3fe   : > { %1437 = vmatpush.bf16.xpose.msrb.mxu3 %v1428_v45 }
 0x402   : > { %v1246_v46 = vpop.f32.mrf.mxu2 }
 0x40a   : > { %v1248_v47 = vpop.f32.mrf.mxu2 }
 0x40b   : > { %v1251_v50 = vpack.c.bf16 %v1248_v47, %v1246_v46 }
 0x40d   : > { %4570 = vmatmul.msk.bf16.vlgmr.msra.gmra.mxu3 %vm911_vm2, %v1251_v50 }
 0x40e   : > { %1620 = vmatpush.bf16.msra.mxu3 %v5049_v25 }
 0x412   : > { %1621 = vmatpush.bf16.msra.mxu3 %v5048_v27 }
 0x41d   : > { %4582 = vmatmul.msk.bf16.vlgmr.msrb.gmra.mxu3 %vm911_vm2, %v5988_v62 }
 0x41e   : > { %1748 = vmatpush.bf16.msrb.mxu3 %v5051_v29 }
 0x422   : > { %1749 = vmatpush.bf16.msrb.mxu3 %v5050_v32 }
 0x437   : > { %v1000_v60 = vpop.f32.mrf.mxu0 }
 0x43f   : > { %v1002_v2 = vpop.f32.mrf.mxu0 }
 0x440   : > { %v1005_v5 = vpack.c.bf16 %v1002_v2, %v1000_v60 }
 0x442   : > { %4559 = vmatmul.msk.bf16.vlgmr.msrb.gmra.mxu0 %vm911_vm2, %v1005_v5 }
 0x443   : > { %1509 = vmatpush.bf16.msrb.mxu0 %v5994_v6 }
 0x452   : > { %4571 = vmatmul.msk.bf16.vlgmr.msra.gmra.mxu0 %vm911_vm2, %v1284_v7 }
 0x453   : > { %1637 = vmatpush.bf16.msra.mxu0 %v5966_v58 }
 0x457   : > { %1638 = vmatpush.bf16.msra.mxu0 %v5969_v59 }
 0x480   : > { %v1124_v30 = vpop.f32.mrf.mxu3 }
 0x488   : > { %v6001_v8 = vpop.f32.mrf.mxu3 }
 0x490   : > { %v1276_v9 = vpop.f32.mrf.mxu3 }
 0x498   : > { %v6003_v10 = vpop.f32.mrf.mxu3 }
 0x4a0   : > { %v1439_v11 = vpop.f32.mrf.mxu3 }
 0x4a1   : > { %v1444_v12 = vsel %vm932_vm3, %v1439_v11, -inf }
 0x4a2   : > { %1445 = vmax.xlane.f32.xlu0 %v1444_v12 }
 0x4a8   : > { %v1441_v13 = vpop.f32.mrf.mxu3 }
 0x4a9   : > { %v1447_v14 = vsel %vm932_vm3, %v1441_v13, -inf }
 0x4aa   : > { %1448 = vmax.xlane.f32.xlu1 %v1447_v14 }
 0x4bf   : > { %v1153_v15 = vpop.f32.mrf.mxu0 }
 0x4c0   : > { %v1154_v16 = vadd.f32 %v1153_v15, %v1124_v30 }
 0x4c2   : > { %v6007_v17 = vadd.f32 %v1276_v9, %v1154_v16 }
 0x4c3   : > { %1517 = vrot.lane.b32.xlu1 %v5988_v62, %s5665_s28 }
 0x4c7   : > { %v6011_v58 = vpop.f32.mrf.mxu0 }
 0x4cb   : > { %1758 = vrot.lane.b32.xlu1 %v5988_v62, %s5666_s23 }
 0x4cf   : > { %v1302_v59 = vpop.f32.mrf.mxu0 }
 0x4d0   : > { %v1307_v18 = vsel %vm932_vm3, %v1302_v59, -inf }
 0x4d1   : > { %1308 = vmax.xlane.f32.xlu0 %v1307_v18 }
 0x4d7   : > { %v1304_v52 = vpop.f32.mrf.mxu0 }
 0x4d8   : > { %v1310_v37 = vsel %vm932_vm3, %v1304_v52, -inf }
 0x515   : > { %v1446_v21 = vpop.xlane.xlu0 %1445 }
 0x516   : > { %v1450_v22 = vsub.f32 %v1439_v11, %v1446_v21 }
 0x518   : > { %v1452_v23 = vmul.f32 1.442695, %v1450_v22 }
 0x51a   : > { %5288 = vpow2.f32 %v1452_v23 }
 0x51d   : > { %v1449_v25 = vpop.xlane.xlu1 %1448 }
 0x51e   : > { %v1451_v27 = vsub.f32 %v1441_v13, %v1449_v25 }
 0x520   : > { %v5289_v29 = vpop.eup %5288  ;;  %v1454_v32 = vmul.f32 1.442695, %v1451_v27 }
 0x521   : > { %v1456_v35 = vsel %vm932_vm3, %v5289_v29, 0.0 }
 0x522   : > { %5290 = vpow2.f32 %v1454_v32  ;;  %1457 = vadd.xlane.f32.xlu2 %v1456_v35 }
 0x528   : > { %v5291_v36 = vpop.eup %5290 }
 0x529   : > { %v1459_v48 = vsel %vm932_vm3, %v5291_v36, 0.0 }
 0x52a   : > { %1460 = vadd.xlane.f32.xlu2 %v1459_v48 }
 0x532   : > { %1311 = vmax.xlane.f32.xlu2 %v1310_v37 }
 0x544   : > { %v1309_v38 = vpop.xlane.xlu0 %1308 }
 0x545   : > { %v1313_v40 = vsub.f32 %v1302_v59, %v1309_v38 }
 0x547   : > { %v1315_v41 = vmul.f32 1.442695, %v1313_v40 }
 0x549   : > { %5292 = vpow2.f32 %v1315_v41 }
 0x54f   : > { %v6019_v42 = vpop.eup %5292 }
 0x550   : > { %v1319_v44 = vsel %vm932_vm3, %v6019_v42, 0.0 }
 0x551   : > { %1320 = vadd.xlane.f32.xlu0 %v1319_v44 }
 0x565   : > { %1356 = vrot.lane.b32.xlu0 %v5901_v56, %s5666_s23 }
 0x56d   : > { %1647 = vrot.lane.b32.xlu0 %v5978_v34, %s5664_s20 }
 0x575   : > { %1760 = vrot.lane.b32.xlu0 %v5978_v34, %s5666_s23 }
 0x595   : > { %v1458_v24 = vpop.xlane.xlu2 %1457 }
 0x596   : > { %5294 = vrcp.f32 %v1458_v24  ;;  %v1473_v56 = vand.u32 2147483648, %v1458_v24  ;;  %vm1467_vm15 = vweird.f32 %v1458_v24  ;;  %v1471_v57 = vand.u32 2147483647, %v1458_v24 }
 0x598   : > { %v1474_v43 = vor.u32 1.1754944e-38, %v1473_v56  ;;  %vm1472_vm4 = vcmp.eq.f32.partialorder %v1471_v57, 8.507059e+37 }
 0x59c   : > { %v5295_v45 = vpop.eup %5294 }
 0x59d   : > { %v1463_v46 = vmul.f32 %v5295_v45, %v1458_v24  ;;  %v1461_v47 = vpop.xlane.xlu2 %1460  ;;  %vm1468_vm14 = vweird.f32 %v5295_v45 }
 0x59e   : > { %5296 = vrcp.f32 %v1461_v47  ;;  %vm1469_vm0 = vmor %vm1467_vm15, %vm1468_vm14  ;;  %v1488_v3 = vand.u32 2147483648, %v1461_v47  ;;  %v1486_v60 = vand.u32 2147483647, %v1461_v47  ;;  %vm1482_vm5 = vweird.f32 %v1461_v47 }
 0x59f   : > { %v1464_v26 = vsub.f32 1.0, %v1463_v46 }
 0x5a0   : > { %v1489_v1 = vor.u32 1.1754944e-38, %v1488_v3  ;;  %vm1487_vm7 = vcmp.eq.f32.partialorder %v1486_v60, 8.507059e+37  ;;  %v6047_v3 = vld [vmem:[#allocation5 + $0x30] sm:$0xff] }
 0x5a1   : > { %v1465_v49 = vmul.f32 %v5295_v45, %v1464_v26 }
 0x5a3   : > { %v1466_v51 = vadd.f32 %v5295_v45, %v1465_v49 }
 0x5a4   : > { %v5297_v50 = vpop.eup %5296 }
 0x5a5   : > { %v1478_v53 = vmul.f32 %v5297_v50, %v1461_v47  ;;  %v1312_v54 = vpop.xlane.xlu2 %1311  ;;  %v1470_v4 = vsel %vm1469_vm0, %v5295_v45, %v1466_v51  ;;  %vm1483_vm1 = vweird.f32 %v5297_v50 }
 0x5a6   : > { %v1314_v55 = vsub.f32 %v1304_v52, %v1312_v54  ;;  %v1475_v0 = vsel %vm1472_vm4, %v1474_v43, %v1470_v4  ;;  %vm1484_vm6 = vmor %vm1482_vm5, %vm1483_vm1 }
 0x5a7   : > { %v1479_v61 = vsub.f32 1.0, %v1478_v53  ;;  %v1476_v7 = vmul.f32 %v5289_v29, %v1475_v0 }
 0x5a8   : > { %v1317_v33 = vmul.f32 1.442695, %v1314_v55  ;;  %v1518_v55 = vpop.permute.xlu1 %1517 }
 0x5a9   : > { %v1480_v63 = vmul.f32 %v5297_v50, %v1479_v61 }
 0x5aa   : > { %5298 = vpow2.f32 %v1317_v33 }
 0x5ab   : > { %v1481_v39 = vadd.f32 %v5297_v50, %v1480_v63 }
 0x5ad   : > { %v1485_v2 = vsel %vm1484_vm6, %v5297_v50, %v1481_v39 }
 0x5ae   : > { %v1490_v5 = vsel %vm1487_vm7, %v1489_v1, %v1485_v2 }
 0x5af   : > { %v1491_v30 = vmul.f32 %v5291_v36, %v1490_v5 }
 0x5b0   : > { %v5299_v9 = vpop.eup %5298  ;;  %v1759_v57 = vpop.permute.xlu1 %1758 }
 0x5b1   : > { %v1322_v11 = vsel %vm932_vm3, %v5299_v9, 0.0  ;;  %v1492_v12 = vpack.c.bf16 %v1491_v30, %v1476_v7 }
 0x5b2   : > { %1323 = vadd.xlane.f32.xlu2 %v1322_v11 }
 0x5b3   : > { %4583 = vmatmul.msk.bf16.vlgmr.msrb.gmra.mxu0 %vm932_vm3, %v1492_v12 }
 0x5c4   : > { %v1321_v13 = vpop.xlane.xlu0 %1320 }
 0x5c5   : > { %5300 = vrcp.f32 %v1321_v13  ;;  %vm1330_vm9 = vweird.f32 %v1321_v13  ;;  %v1334_v36 = vand.u32 2147483647, %v1321_v13 }
 0x5c7   : > { %vm1335_vm12 = vcmp.eq.f32.partialorder %v1334_v36, 8.507059e+37 }
 0x5ca   : > { %1519 = vrot.lane.b32.xlu2 %v5978_v34, %s5665_s28 }
 0x5cb   : > { %v5301_v18 = vpop.eup %5300 }
 0x5cc   : > { %v1326_v21 = vmul.f32 %v5301_v18, %v1321_v13  ;;  %vm1331_vm8 = vweird.f32 %v5301_v18 }
 0x5cd   : > { %vm1332_vm10 = vmor %vm1330_vm9, %vm1331_vm8 }
 0x5ce   : > { %v1327_v22 = vsub.f32 1.0, %v1326_v21 }
 0x5d0   : > { %v1328_v25 = vmul.f32 %v5301_v18, %v1327_v22 }
 0x5d2   : > { %1645 = vrot.lane.b32.xlu2 %v5988_v62, %s5664_s20  ;;  %v1329_v34 = vadd.f32 %v5301_v18, %v1328_v25  ;;  %v1336_v62 = vand.u32 2147483648, %v1321_v13 }
 0x5d4   : > { %v1333_v38 = vsel %vm1332_vm10, %v5301_v18, %v1329_v34  ;;  %v1337_v44 = vor.u32 1.1754944e-38, %v1336_v62 }
 0x5d6   : > { %v1338_v45 = vsel %vm1335_vm12, %v1337_v44, %v1333_v38 }
 0x5d7   : > { %v1357_v14 = vpop.permute.xlu0 %1356  ;;  %v1339_v49 = vmul.f32 %v6019_v42, %v1338_v45  ;;  %v6044_v42 = vld [vmem:[#allocation5 + $0x38] sm:$0xff] }
 0x5d8   : > { %1369 = vmatpush.bf16.msrb.mxu1 %v1357_v14  ;;  %1398 = vmatpush.bf16.msrb.mxu2 %v6044_v42 }
 0x5dc   : > { %1399 = vmatpush.bf16.msrb.mxu2 %v6047_v3 }
 0x5df   : > { %v1648_v15 = vpop.permute.xlu0 %1647 }
 0x5e0   : > { %v1653_v56 = vsel %vm911_vm2, %v1648_v15, 0 }
 0x5e7   : > { %v1761_v16 = vpop.permute.xlu0 %1760 }
 0x5e8   : > { %v1766_v59 = vsel %vm911_vm2, %v1761_v16, 0 }
 0x5e9   : > { %1775 = vmatpush.bf16.xpose.msrb.mxu0 %v1766_v59 }
 0x625   : > { %v1324_v23 = vpop.xlane.xlu2 %1323 }
 0x626   : > { %5302 = vrcp.f32 %v1324_v23  ;;  %v1351_v52 = vand.u32 2147483648, %v1324_v23  ;;  %v1349_v41 = vand.u32 2147483647, %v1324_v23  ;;  %vm1345_vm13 = vweird.f32 %v1324_v23 }
 0x628   : > { %v1352_v46 = vor.u32 1.1754944e-38, %v1351_v52  ;;  %vm1350_vm15 = vcmp.eq.f32.partialorder %v1349_v41, 8.507059e+37 }
 0x62c   : > { %v5303_v27 = vpop.eup %5302 }
 0x62d   : > { %v1341_v29 = vmul.f32 %v5303_v27, %v1324_v23  ;;  %v1520_v32 = vpop.permute.xlu2 %1519  ;;  %vm1346_vm11 = vweird.f32 %v5303_v27 }
 0x62e   : > { %v1525_v35 = vsel %vm911_vm2, %v1520_v32, 0  ;;  %vm1347_vm14 = vmor %vm1345_vm13, %vm1346_vm11 }
 0x62f   : > { %v1342_v48 = vsub.f32 1.0, %v1341_v29  ;;  %1534 = vmatpush.bf16.xpose.msra.mxu1 %v1525_v35 }
 0x630   : > { %v1511_v37 = vpop.f32.mrf.mxu0 }
 0x631   : > { %v1343_v40 = vmul.f32 %v5303_v27, %v1342_v48 }
 0x633   : > { %v1344_v24 = vadd.f32 %v5303_v27, %v1343_v40 }
 0x635   : > { %v1348_v47 = vsel %vm1347_vm14, %v5303_v27, %v1344_v24  ;;  %v1646_v61 = vpop.permute.xlu2 %1645 }
 0x636   : > { %v1353_v26 = vsel %vm1350_vm15, %v1352_v46, %v1348_v47 }
 0x637   : > { %v1354_v50 = vmul.f32 %v5299_v9, %v1353_v26 }
 0x638   : > { %v1513_v51 = vpop.f32.mrf.mxu0 }
 0x639   : > { %v1516_v53 = vpack.c.bf16 %v1513_v51, %v1511_v37  ;;  %v1355_v54 = vpack.c.bf16 %v1354_v50, %v1339_v49 }
 0x63b   : > { %4572 = vmatmul.msk.bf16.vlgmr.msrb.gmra.mxu1 %vm932_vm3, %v1355_v54  ;;  %4587 = vmatmul.msk.bf16.vlgmr.msra.gmra.mxu0 %vm911_vm2, %v1516_v53  ;;  %v1156_v54 = vadd.f32 %v6011_v58, %v6001_v8 }
 0x63c   : > { %1662 = vmatpush.bf16.xpose.msrb.mxu1 %v1653_v56 }
 0x64b   : > { %4584 = vmatmul.msk.bf16.vlgmr.msra.gmra.mxu1 %vm911_vm2, %v1518_v55  ;;  %4591 = vmatmul.msk.bf16.vlgmr.msrb.gmra.mxu0 %vm911_vm2, %v1759_v57  ;;  %v6097_v55 = vld [vmem:[%s6801_s6] ss:$0 sm:$0xff] }
 0x65b   : > { %4588 = vmatmul.msk.bf16.vlgmr.msrb.gmra.mxu1 %vm911_vm2, %v1646_v61  ;;  %v1282_v61 = vadd.f32 %v6003_v10, %v1156_v54 }
 0x6b8   : > { %v1371_v33 = vpop.f32.mrf.mxu1  ;;  %v6050_v4 = vpop.f32.mrf.mxu0 }
 0x6c0   : > { %v1373_v63 = vpop.f32.mrf.mxu1  ;;  %v6054_v0 = vpop.f32.mrf.mxu0 }
 0x6c1   : > { %v1376_v60 = vpack.c.bf16 %v1373_v63, %v1371_v33 }
 0x6c3   : > { %4581 = vmatmul.msk.bf16.vlgmr.msrb.gmra.mxu2 %vm911_vm2, %v1376_v60 }
 0x6c8   : > { %v1536_v43 = vpop.f32.mrf.mxu1  ;;  %v1777_v5 = vpop.f32.mrf.mxu0 }
 0x6c9   : > { %v1541_v39 = vsel %vm932_vm3, %v1536_v43, -inf  ;;  %v1782_v9 = vsel %vm932_vm3, %v1777_v5, -inf }
 0x6ca   : > { %1542 = vmax.xlane.f32.xlu2 %v1541_v39 }
 0x6d0   : > { %v1538_v1 = vpop.f32.mrf.mxu1  ;;  %v1779_v11 = vpop.f32.mrf.mxu0 }
 0x6d1   : > { %v1544_v2 = vsel %vm932_vm3, %v1538_v1, -inf  ;;  %v1785_v14 = vsel %vm932_vm3, %v1779_v11, -inf }
 0x6d2   : > { %1545 = vmax.xlane.f32.xlu0 %v1544_v2 }
 0x6d8   : > { %v1664_v7 = vpop.f32.mrf.mxu1 }
 0x6d9   : > { %v1669_v30 = vsel %vm932_vm3, %v1664_v7, -inf }
 0x6da   : > { %1670 = vmax.xlane.f32.xlu1 %v1669_v30  ;;  %1783 = vmax.xlane.f32.xlu0 %v1782_v9 }
 0x6e0   : > { %v1666_v12 = vpop.f32.mrf.mxu1 }
 0x6e1   : > { %v1672_v13 = vsel %vm932_vm3, %v1666_v12, -inf }
 0x6e2   : > { %1673 = vmax.xlane.f32.xlu2 %v1672_v13  ;;  %1786 = vmax.xlane.f32.xlu1 %v1785_v14 }
 0x73d   : > { %v1543_v15 = vpop.xlane.xlu2 %1542 }
 0x73e   : > { %v1547_v16 = vsub.f32 %v1536_v43, %v1543_v15 }
 0x740   : > { %v1549_v59 = vmul.f32 1.442695, %v1547_v16 }
 0x742   : > { %5304 = vpow2.f32 %v1549_v59 }
 0x745   : > { %v1546_v18 = vpop.xlane.xlu0 %1545 }
 0x746   : > { %v1548_v21 = vsub.f32 %v1538_v1, %v1546_v18  ;;  %v1401_v53 = vpop.f32.mrf.mxu2 }
 0x747   : > { %v1406_v56 = vadd.f32 %v1401_v53, %v6007_v17 }
 0x748   : > { %v6061_v22 = vpop.eup %5304  ;;  %v1551_v23 = vmul.f32 1.442695, %v1548_v21 }
 0x749   : > { %v1553_v25 = vsel %vm932_vm3, %v6061_v22, 0.0  ;;  %v1875_v33 = vadd.f32 %v6097_v55, %v1406_v56 }
 0x74a   : > { %5306 = vpow2.f32 %v1551_v23  ;;  %1554 = vadd.xlane.f32.xlu2 %v1553_v25 }
 0x74d   : > { %v1671_v27 = vpop.xlane.xlu1 %1670  ;;  %v1784_v34 = vpop.xlane.xlu0 %1783 }
 0x74e   : > { %v1675_v29 = vsub.f32 %v1664_v7, %v1671_v27  ;;  %v1788_v35 = vsub.f32 %v1777_v5, %v1784_v34  ;;  %v1403_v57 = vpop.f32.mrf.mxu2 }
 0x74f   : > { %v1407_v63 = vadd.f32 %v1403_v57, %v1282_v61 }
 0x750   : > { %v6065_v32 = vpop.eup %5306  ;;  %v1677_v62 = vmul.f32 1.442695, %v1675_v29  ;;  %v1790_v48 = vmul.f32 1.442695, %v1788_v35 }
 0x751   : > { %v1556_v36 = vsel %vm932_vm3, %v6065_v32, 0.0  ;;  %v1876_v60 = vadd.f32 %v6097_v55, %v1407_v63 }
 0x752   : > { %1557 = vadd.xlane.f32.xlu0 %v1556_v36  ;;  %5308 = vpow2.f32 %v1677_v62 }
 0x753   : > { %5310 = vpow2.f32 %v1790_v48  ;;  %v6107_v8 = vadd.f32 %v1876_v60, %v5876_v20 }
 0x755   : > { %v1674_v52 = vpop.xlane.xlu2 %1673  ;;  %v1787_v37 = vpop.xlane.xlu1 %1786  ;;  %v1905_v17 = vmul.f32 %v6107_v8, %v6107_v8 }
 0x756   : > { %v1676_v38 = vsub.f32 %v1666_v12, %v1674_v52  ;;  %v1789_v41 = vsub.f32 %v1779_v11, %v1787_v37 }
 0x758   : > { %v1679_v40 = vmul.f32 1.442695, %v1676_v38  ;;  %v6069_v44 = vpop.eup %5308  ;;  %v1792_v45 = vmul.f32 1.442695, %v1789_v41 }
 0x759   : > { %v1681_v24 = vsel %vm932_vm3, %v6069_v44, 0.0  ;;  %v6073_v46 = vpop.eup %5310 }
 0x75a   : > { %5312 = vpow2.f32 %v1679_v40  ;;  %1682 = vadd.xlane.f32.xlu1 %v1681_v24  ;;  %v1794_v49 = vsel %vm932_vm3, %v6073_v46, 0.0 }
 0x75b   : > { %5314 = vpow2.f32 %v1792_v45 }
 0x760   : > { %v6075_v47 = vpop.eup %5312 }
 0x761   : > { %v1684_v26 = vsel %vm932_vm3, %v6075_v47, 0.0  ;;  %v6081_v50 = vpop.eup %5314 }
 0x762   : > { %1685 = vadd.xlane.f32.xlu2 %v1684_v26  ;;  %1795 = vadd.xlane.f32.xlu1 %v1794_v49  ;;  %v1797_v51 = vsel %vm932_vm3, %v6081_v50, 0.0 }
 0x766   : > { %1590 = vrot.lane.b32.xlu0 %v5994_v6, %s5665_s28 }
 0x76a   : > { %1798 = vadd.xlane.f32.xlu2 %v1797_v51 }
 0x77b   : > { %1718 = vrot.lane.b32.xlu1 %v5994_v6, %s5664_s20 }
 0x782   : > { %1831 = vrot.lane.b32.xlu2 %v5994_v6, %s5666_s23  ;;  %v6103_v6 = vadd.f32 %v1875_v33, %v5874_v19 }
 0x784   : > { %v1904_v10 = vmul.f32 %v6103_v6, %v6103_v6 }
 0x790   : > { %1885 = vadd.xlane.f32.xlu0 %v6103_v6 }
 0x798   : > { %1910 = vadd.xlane.f32.xlu0 %v1905_v17 }
 0x7a5   : > { %1887 = vadd.xlane.f32.xlu1 %v6107_v8 }
 0x7ab   : > { %1908 = vadd.xlane.f32.xlu2 %v1904_v10 }
 0x7bd   : > { %v1555_v58 = vpop.xlane.xlu2 %1554 }
 0x7be   : > { %5316 = vrcp.f32 %v1555_v58  ;;  %v1570_v30 = vand.u32 2147483648, %v1555_v58  ;;  %vm1564_vm1 = vweird.f32 %v1555_v58  ;;  %v1568_v11 = vand.u32 2147483647, %v1555_v58 }
 0x7c0   : > { %v1571_v59 = vor.u32 1.1754944e-38, %v1570_v30  ;;  %vm1569_vm6 = vcmp.eq.f32.partialorder %v1568_v11, 8.507059e+37 }
 0x7c4   : > { %v5317_v43 = vpop.eup %5316 }
 0x7c5   : > { %v1560_v19 = vmul.f32 %v5317_v43, %v1555_v58  ;;  %v1558_v39 = vpop.xlane.xlu0 %1557  ;;  %vm1565_vm0 = vweird.f32 %v5317_v43 }
 0x7c6   : > { %5318 = vrcp.f32 %v1558_v39  ;;  %vm1566_vm4 = vmor %vm1564_vm1, %vm1565_vm0  ;;  %v1585_v13 = vand.u32 2147483648, %v1558_v39  ;;  %v1583_v16 = vand.u32 2147483647, %v1558_v39  ;;  %vm1579_vm7 = vweird.f32 %v1558_v39 }
 0x7c7   : > { %v1561_v1 = vsub.f32 1.0, %v1560_v19 }
 0x7c8   : > { %v1586_v23 = vor.u32 1.1754944e-38, %v1585_v13  ;;  %vm1584_vm9 = vcmp.eq.f32.partialorder %v1583_v16, 8.507059e+37 }
 0x7c9   : > { %v1562_v2 = vmul.f32 %v5317_v43, %v1561_v1 }
 0x7cb   : > { %v1563_v5 = vadd.f32 %v5317_v43, %v1562_v2 }
 0x7cc   : > { %v5319_v20 = vpop.eup %5318 }
 0x7cd   : > { %v1575_v7 = vmul.f32 %v5319_v20, %v1558_v39  ;;  %v6114_v9 = vpop.xlane.xlu1 %1682  ;;  %v1567_v14 = vsel %vm1566_vm4, %v5317_v43, %v1563_v5  ;;  %vm1580_vm5 = vweird.f32 %v5319_v20 }
 0x7ce   : > { %5320 = vrcp.f32 %v6114_v9  ;;  %v1572_v21 = vsel %vm1569_vm6, %v1571_v59, %v1567_v14  ;;  %vm1581_vm8 = vmor %vm1579_vm7, %vm1580_vm5  ;;  %v1698_v53 = vand.u32 2147483648, %v6114_v9  ;;  %vm1692_vm13 = vweird.f32 %v6114_v9 }
 0x7cf   : > { %v1576_v12 = vsub.f32 1.0, %v1575_v7  ;;  %v1573_v35 = vmul.f32 %v6061_v22, %v1572_v21  ;;  %v1696_v43 = vand.u32 2147483647, %v6114_v9 }
 0x7d0   : > { %v1699_v19 = vor.u32 1.1754944e-38, %v1698_v53  ;;  %v5060_v53 = vld [vmem:[#allocation7 + $0x34] sm:$0xf] }
 0x7d1   : > { %v1577_v15 = vmul.f32 %v5319_v20, %v1576_v12  ;;  %vm1697_vm7 = vcmp.eq.f32.partialorder %v1696_v43, 8.507059e+37  ;;  %v5056_v43 = vld [vmem:[#allocation7 + $0x14] sm:$0xf] }
 0x7d3   : > { %v1578_v18 = vadd.f32 %v5319_v20, %v1577_v15 }
 0x7d4   : > { %v6117_v25 = vpop.eup %5320 }
 0x7d5   : > { %v1582_v27 = vsel %vm1581_vm8, %v5319_v20, %v1578_v18  ;;  %v1686_v34 = vpop.xlane.xlu2 %1685  ;;  %v1796_v62 = vpop.xlane.xlu1 %1795  ;;  %v1688_v48 = vmul.f32 %v6117_v25, %v6114_v9  ;;  %vm1693_vm11 = vweird.f32 %v6117_v25 }
 0x7d6   : > { %v1587_v29 = vsel %vm1584_vm9, %v1586_v23, %v1582_v27  ;;  %5322 = vrcp.f32 %v1686_v34  ;;  %v1713_v56 = vand.u32 2147483648, %v1686_v34  ;;  %vm1707_vm12 = vweird.f32 %v1686_v34  ;;  %vm6136_vm0 = vmor %vm1692_vm13, %vm1693_vm11 }
 0x7d7   : > { %v1588_v36 = vmul.f32 %v6065_v32, %v1587_v29  ;;  %5324 = vrcp.f32 %v1796_v62  ;;  %v1689_v40 = vsub.f32 1.0, %v1688_v48  ;;  %v1711_v63 = vand.u32 2147483647, %v1686_v34 }
 0x7d8   : > { %v1591_v52 = vpop.permute.xlu0 %1590  ;;  %v1811_v1 = vand.u32 2147483648, %v1796_v62  ;;  %v1714_v20 = vor.u32 1.1754944e-38, %v1713_v56  ;;  %vm1805_vm1 = vweird.f32 %v1796_v62  ;;  %v1809_v5 = vand.u32 2147483647, %v1796_v62 }
 0x7d9   : > { %1603 = vmatpush.bf16.msra.mxu2 %v1591_v52  ;;  %v1589_v37 = vpack.c.bf16 %v1588_v36, %v1573_v35  ;;  %v1690_v22 = vmul.f32 %v6117_v25, %v1689_v40  ;;  %vm1712_vm4 = vcmp.eq.f32.partialorder %v1711_v63, 8.507059e+37  ;;  %v4654_v52 = vld [vmem:[#allocation7 + $0x78] sm:$0xf0] }
 0x7da   : > { %v1812_v15 = vor.u32 1.1754944e-38, %v1811_v1  ;;  %vm1810_vm8 = vcmp.eq.f32.partialorder %v1809_v5, 8.507059e+37 }
 0x7db   : > { %v1691_v33 = vadd.f32 %v6117_v25, %v1690_v22  ;;  %v4630_v22 = vld [vmem:[#allocation7 + $0x48] sm:$0xf0] }
 0x7dc   : > { %v5323_v38 = vpop.eup %5322  ;;  %4585 = vmatmul.msk.bf16.vlgmr.msra.gmra.mxu2 %vm932_vm3, %v1589_v37 }
 0x7dd   : > { %v1703_v41 = vmul.f32 %v5323_v38, %v1686_v34  ;;  %v1799_v24 = vpop.xlane.xlu2 %1798  ;;  %v5325_v45 = vpop.eup %5324  ;;  %vm1708_vm10 = vweird.f32 %v5323_v38  ;;  %v1695_v30 = vsel %vm6136_vm0, %v6117_v25, %v1691_v33  ;;  %v4614_v33 = vld [vmem:[#allocation7 + $0x28] sm:$0xf0] }
 0x7de   : > { %5326 = vrcp.f32 %v1799_v24  ;;  %v1801_v49 = vmul.f32 %v5325_v45, %v1796_v62  ;;  %vm6129_vm14 = vmor %vm1707_vm12, %vm1708_vm10  ;;  %vm1806_vm15 = vweird.f32 %v5325_v45  ;;  %v1824_v9 = vand.u32 2147483647, %v1799_v24 }
 0x7df   : > { %v1704_v26 = vsub.f32 1.0, %v1703_v41  ;;  %vm1807_vm5 = vmor %vm1805_vm1, %vm1806_vm15  ;;  %v1826_v11 = vand.u32 2147483648, %v1799_v24  ;;  %v1700_v16 = vsel %vm1697_vm7, %v1699_v19, %v1695_v30  ;;  %vm1820_vm9 = vweird.f32 %v1799_v24  ;;  %v4606_v19 = vld [vmem:[#allocation7 + $0x18] sm:$0xf0] }
 0x7e0   : > { %v1802_v51 = vsub.f32 1.0, %v1801_v49  ;;  %vm1825_vm11 = vcmp.eq.f32.partialorder %v1824_v9, 8.507059e+37  ;;  %v1701_v27 = vmul.f32 %v6069_v44, %v1700_v16  ;;  %v5068_v44 = vld [vmem:[#allocation7 + $0x74] sm:$0xf]  ;;  %v5062_v49 = vld [vmem:[#allocation7 + $0x44] sm:$0xf]  ;;  %v4609_v2 = vor.u32 %v5056_v43, %v4606_v19 }
 0x7e1   : > { %v1705_v32 = vmul.f32 %v5323_v38, %v1704_v26  ;;  %v1827_v23 = vor.u32 1.1754944e-38, %v1826_v11  ;;  %v4657_v37 = vor.u32 %v5068_v44, %v4654_v52  ;;  %v6162_v52 = vld [vmem:[%s6802_s7] ss:$0 sm:$0xff]  ;;  %v5085_v43 = vld [vmem:[#allocation8 + $0x78] sm:$0xff]  ;;  %v5084_v19 = vld [vmem:[#allocation8 + $0x70] sm:$0xff] }
 0x7e2   : > { %v1803_v57 = vmul.f32 %v5325_v45, %v1802_v51 }
 0x7e3   : > { %v1706_v54 = vadd.f32 %v5323_v38, %v1705_v32  ;;  %2121 = vmatpush.bf16.msra.mxu0 %v4657_v37  ;;  %v4633_v32 = vor.u32 %v5062_v49, %v4630_v22  ;;  %v4652_v22 = vld [vmem:[#allocation7 + $0x70] sm:$0xf] }
 0x7e4   : > { %v5327_v61 = vpop.eup %5326  ;;  %v1804_v17 = vadd.f32 %v5325_v45, %v1803_v57 }
 0x7e5   : > { %v1816_v10 = vmul.f32 %v5327_v61, %v1799_v24  ;;  %v1832_v58 = vpop.permute.xlu2 %1831  ;;  %v1710_v39 = vsel %vm6129_vm14, %v5323_v38, %v1706_v54  ;;  %vm1821_vm6 = vweird.f32 %v5327_v61  ;;  %v4638_v24 = vld [vmem:[#allocation7 + $0x58] sm:$0xf0] }
 0x7e6   : > { %1844 = vmatpush.bf16.msra.mxu1 %v1832_v58  ;;  %v1715_v12 = vsel %vm1712_vm4, %v1714_v20, %v1710_v39  ;;  %v1808_v13 = vsel %vm1807_vm5, %v5325_v45, %v1804_v17  ;;  %vm1822_vm10 = vmor %vm1820_vm9, %vm1821_vm6  ;;  %v4622_v54 = vld [vmem:[#allocation7 + $0x38] sm:$0xf0]  ;;  %v5054_v39 = vld [vmem:[#allocation7 + $0x4] sm:$0xf] }
 0x7e7   : > { %v1817_v7 = vsub.f32 1.0, %v1816_v10  ;;  %v1716_v18 = vmul.f32 %v6075_v47, %v1715_v12  ;;  %v1813_v21 = vsel %vm1810_vm8, %v1812_v15, %v1808_v13  ;;  %v5667_v47 = vmov 128.0   ;;  %v4598_v20 = vld [vmem:[#allocation7 + $0x8] sm:$0xf0] }
 0x7e8   : > { %v1814_v62 = vmul.f32 %v6073_v46, %v1813_v21  ;;  %5328 = vrcp.f32 %v5667_v47  ;;  %v5066_v46 = vld [vmem:[#allocation7 + $0x64] sm:$0xf]  ;;  %v4625_v56 = vor.u32 %v5060_v53, %v4622_v54  ;;  %v4601_v30 = vor.u32 %v5054_v39, %v4598_v20  ;;  %v4644_v54 = vld [vmem:[#allocation7 + $0x60] sm:$0xf] }
 0x7e9   : > { %v1818_v14 = vmul.f32 %v5327_v61, %v1817_v7  ;;  %v1717_v36 = vpack.c.bf16 %v1716_v18, %v1701_v27 }
 0x7eb   : > { %v1819_v59 = vadd.f32 %v5327_v61, %v1818_v14 }
 0x7ed   : > { %v1823_v25 = vsel %vm1822_vm10, %v5327_v61, %v1819_v59  ;;  %v1719_v29 = vpop.permute.xlu1 %1718  ;;  %v5058_v61 = vld [vmem:[#allocation7 + $0x24] sm:$0xf] }
 0x7ee   : > { %v1828_v34 = vsel %vm1825_vm11, %v1827_v23, %v1823_v25  ;;  %1731 = vmatpush.bf16.msrb.mxu2 %v1719_v29  ;;  %v5329_v38 = vpop.eup %5328  ;;  %v4617_v63 = vor.u32 %v5058_v61, %v4614_v33  ;;  %v4636_v61 = vld [vmem:[#allocation7 + $0x50] sm:$0xf]  ;;  %v5065_v33 = vld [vmem:[#allocation7 + $0x54] sm:$0xf0] }
 0x7ef   : > { %v1829_v35 = vmul.f32 %v6081_v50, %v1828_v34  ;;  %v4646_v50 = vld [vmem:[#allocation7 + $0x68] sm:$0xf0]  ;;  %v1894_v41 = vmul.f32 128.0, %v5329_v38  ;;  %vm1898_vm12 = vweird.f32 %v5329_v38 }
 0x7f0   : > { %v4649_v40 = vor.u32 %v5066_v46, %v4646_v50 }
 0x7f1   : > { %v1830_v48 = vpack.c.bf16 %v1829_v35, %v1814_v62  ;;  %4589 = vmatmul.msk.bf16.vlgmr.msrb.gmra.mxu2 %vm932_vm3, %v1717_v36  ;;  %v1895_v26 = vsub.f32 1.0, %v1894_v41 }
 0x7f2   : > { %1861 = vmatpush.bf16.msra.mxu2 %v6044_v42  ;;  %2122 = vmatpush.bf16.msra.mxu0 %v4649_v40  ;;  %v5064_v42 = vld [vmem:[#allocation7 + $0x54] sm:$0xf] }
 0x7f3   : > { %4592 = vmatmul.msk.bf16.vlgmr.msra.gmra.mxu1 %vm932_vm3, %v1830_v48  ;;  %v4641_v45 = vor.u32 %v5064_v42, %v4638_v24  ;;  %v1896_v51 = vmul.f32 %v5329_v38, %v1895_v26 }
 0x7f5   : > { %v1897_v57 = vadd.f32 %v5329_v38, %v1896_v51 }
 0x7f6   : > { %1862 = vmatpush.bf16.msra.mxu2 %v6047_v3  ;;  %2123 = vmatpush.bf16.msra.mxu0 %v4641_v45 }
 0x7f7   : > { %v6152_v60 = vsel %vm1898_vm12, %v5329_v38, %v1897_v57 }
 0x7fa   : > { %2124 = vmatpush.bf16.msra.mxu0 %v4633_v32  ;;  %2303 = vmatpush.bf16.msrb.mxu2 %v5085_v43 }
 0x7fe   : > { %2125 = vmatpush.bf16.msra.mxu0 %v4625_v56  ;;  %v5067_v56 = vld [vmem:[#allocation7 + $0x64] sm:$0xf0]  ;;  %2304 = vmatpush.bf16.msrb.mxu2 %v5084_v19 }
 0x7ff   : > { %v4645_v57 = vor.u32 %v5067_v56, %v4644_v54 }
 0x802   : > { %2126 = vmatpush.bf16.msra.mxu0 %v4617_v63  ;;  %v4637_v63 = vor.u32 %v5065_v33, %v4636_v61 }
 0x803   : > { %v1886_v3 = vpop.xlane.xlu0 %1885 }
 0x804   : > { %v1900_v1 = vmul.f32 %v6152_v60, %v1886_v3  ;;  %v5069_v3 = vld [vmem:[#allocation7 + $0x74] sm:$0xf0] }
 0x805   : > { %v4653_v51 = vor.u32 %v5069_v3, %v4652_v22  ;;  %v5073_v22 = vld [vmem:[#allocation8 + $0x18] sm:$0xff]  ;;  %v5072_v3 = vld [vmem:[#allocation8 + $0x10] sm:$0xff] }
 0x806   : > { %2127 = vmatpush.bf16.msra.mxu0 %v4609_v2  ;;  %v1920_v12 = vmul.f32 %v1900_v1, %v1900_v1  ;;  %v1932_v50 = vsub.f32 %v6103_v6, %v1900_v1  ;;  %v4620_v1 = vld [vmem:[#allocation7 + $0x30] sm:$0xf]  ;;  %v5061_v2 = vld [vmem:[#allocation7 + $0x34] sm:$0xf0] }
 0x80a   : > { %2128 = vmatpush.bf16.msra.mxu0 %v4601_v30 }
 0x80b   : > { %v1911_v17 = vpop.xlane.xlu0 %1910 }
 0x80c   : > { %v1917_v5 = vmul.f32 %v1911_v17, %v6152_v60 }
 0x818   : > { %v1888_v10 = vpop.xlane.xlu1 %1887 }
 0x819   : > { %v1901_v58 = vmul.f32 %v6152_v60, %v1888_v10  ;;  %v4628_v10 = vld [vmem:[#allocation7 + $0x40] sm:$0xf] }
 0x81b   : > { %v1921_v7 = vmul.f32 %v1901_v58, %v1901_v58  ;;  %v1933_v47 = vsub.f32 %v6107_v8, %v1901_v58  ;;  %v6168_v8 = vld [vmem:[%s6803_s8] ss:$0 sm:$0xff]  ;;  %v5063_v58 = vld [vmem:[#allocation7 + $0x44] sm:$0xf0] }
 0x81c   : > { %v4629_v39 = vor.u32 %v5063_v58, %v4628_v10 }
 0x81d   : > { %v1925_v9 = vsub.f32 %v1917_v5, %v1921_v7  ;;  %v5083_v5 = vld [vmem:[#allocation8 + $0x68] sm:$0xff]  ;;  %v4621_v7 = vor.u32 %v5061_v2, %v4620_v1 }
 0x81e   : > { %v1909_v11 = vpop.xlane.xlu2 %1908  ;;  %2305 = vmatpush.bf16.msrb.mxu2 %v5083_v5 }
 0x81f   : > { %v1916_v13 = vmul.f32 %v1909_v11, %v6152_v60  ;;  %v1929_v14 = vmax.f32 %v1925_v9, 0.0  ;;  %v4612_v9 = vld [vmem:[#allocation7 + $0x20] sm:$0xf]  ;;  %v5059_v11 = vld [vmem:[#allocation7 + $0x24] sm:$0xf0] }
 0x821   : > { %v1924_v15 = vsub.f32 %v1916_v13, %v1920_v12  ;;  %v1937_v16 = vadd.f32 1e-05, %v1929_v14  ;;  %v5082_v13 = vld [vmem:[#allocation8 + $0x60] sm:$0xff]  ;;  %v4613_v14 = vor.u32 %v5059_v11, %v4612_v9 }
 0x822   : > { %2306 = vmatpush.bf16.msrb.mxu2 %v5082_v13 }
 0x823   : > { %v1928_v59 = vmax.f32 %v1924_v15, 0.0  ;;  %5330 = vrsqrt.f32 %v1937_v16  ;;  %vm1956_vm14 = vweird.f32 %v1937_v16  ;;  %v4604_v15 = vld [vmem:[#allocation7 + $0x10] sm:$0xf] }
 0x825   : > { %v1936_v18 = vadd.f32 1e-05, %v1928_v59 }
 0x827   : > { %5332 = vrsqrt.f32 %v1936_v18  ;;  %vm1946_vm1 = vweird.f32 %v1936_v18 }
 0x829   : > { %v5331_v21 = vpop.eup %5330 }
 0x82a   : > { %v1951_v23 = vmul.f32 %v5331_v21, %v1937_v16  ;;  %vm1957_vm13 = vweird.f32 %v5331_v21  ;;  %v5057_v16 = vld [vmem:[#allocation7 + $0x14] sm:$0xf0] }
 0x82b   : > { %vm1958_vm15 = vmor %vm1956_vm14, %vm1957_vm13 }
 0x82c   : > { %v1952_v27 = vmul.f32 %v5331_v21, %v1951_v23  ;;  %v4596_v23 = vld [vmem:[#allocation7] sm:$0xf] }
 0x82d   : > { %v5333_v25 = vpop.eup %5332 }
 0x82e   : > { %v1941_v34 = vmul.f32 %v5333_v25, %v1936_v18  ;;  %v1953_v29 = vmul.f32 0.5, %v1952_v27  ;;  %vm1947_vm0 = vweird.f32 %v5333_v25 }
 0x82f   : > { %vm1948_vm4 = vmor %vm1946_vm1, %vm1947_vm0 }
 0x830   : > { %v1942_v62 = vmul.f32 %v5333_v25, %v1941_v34  ;;  %v1954_v35 = vsub.f32 1.5, %v1953_v29  ;;  %v5081_v34 = vld [vmem:[#allocation8 + $0x58] sm:$0xff]  ;;  %v5080_v29 = vld [vmem:[#allocation8 + $0x50] sm:$0xff] }
 0x831   : > { %2307 = vmatpush.bf16.msrb.mxu2 %v5081_v34 }
 0x832   : > { %v1943_v36 = vmul.f32 0.5, %v1942_v62  ;;  %v1955_v48 = vmul.f32 %v5331_v21, %v1954_v35  ;;  %v5079_v62 = vld [vmem:[#allocation8 + $0x48] sm:$0xff]  ;;  %v5078_v35 = vld [vmem:[#allocation8 + $0x40] sm:$0xff] }
 0x834   : > { %v1944_v44 = vsub.f32 1.5, %v1943_v36  ;;  %v1959_v37 = vsel %vm1958_vm15, %v5331_v21, %v1955_v48  ;;  %v4605_v21 = vor.u32 %v5057_v16, %v4604_v15  ;;  %v2016_v36 = vld [vmem:[%s6805_s10] sm:$0x3] }
 0x835   : > { %v1981_v38 = vmul.f32 %v1959_v37, %v1933_v47  ;;  %2308 = vmatpush.bf16.msrb.mxu2 %v5080_v29  ;;  %v6186_v47 = vperm.slane %v2016_v36, 1 }
 0x836   : > { %v1945_v46 = vmul.f32 %v5333_v25, %v1944_v44 }
 0x837   : > { %v1988_v41 = vmul.f32 %v6162_v52, %v1981_v38 }
 0x838   : > { %v1949_v40 = vsel %vm1948_vm4, %v5333_v25, %v1945_v46  ;;  %v5055_v25 = vld [vmem:[#allocation7 + $0x4] sm:$0xf0] }
 0x839   : > { %v1980_v42 = vmul.f32 %v1949_v40, %v1932_v50  ;;  %v6173_v45 = vadd.f32 %v6168_v8, %v1988_v41  ;;  %v4597_v27 = vor.u32 %v5055_v25, %v4596_v23  ;;  %2309 = vmatpush.bf16.msrb.mxu2 %v5079_v62  ;;  %v5077_v41 = vld [vmem:[#allocation8 + $0x38] sm:$0xff] }
 0x83a   : > { %2284 = vmatpush.bf16.msrb.mxu1 %v5077_v41 }
 0x83b   : > { %v1987_v24 = vmul.f32 %v6162_v52, %v1980_v42  ;;  %v5076_v42 = vld [vmem:[#allocation8 + $0x30] sm:$0xff] }
 0x83d   : > { %v6176_v26 = vadd.f32 %v6168_v8, %v1987_v24  ;;  %2310 = vmatpush.bf16.msrb.mxu2 %v5078_v35  ;;  %v5075_v24 = vld [vmem:[#allocation8 + $0x28] sm:$0xff] }
 0x83e   : > { %2285 = vmatpush.bf16.msrb.mxu1 %v5076_v42  ;;  %v6207_v42 = vld [vmem:[%s6807_s12] ss:$0 sm:$0xff] }
 0x83f   : > { %v1998_v6 = vpack.c.bf16 %v6173_v45, %v6176_v26 }
 0x841   : > { %2129 = vmatmul.bf16.vlgmr.msra.gmra.mxu0 %v1998_v6 }
 0x842   : > { %2286 = vmatpush.bf16.msrb.mxu1 %v5075_v24 }
 0x85f   : > { %v1605_v49 = vpop.f32.mrf.mxu2 }
 0x867   : > { %v1607_v32 = vpop.f32.mrf.mxu2 }
 0x868   : > { %v1610_v53 = vpack.c.bf16 %v1607_v32, %v1605_v49 }
 0x86a   : > { %4586 = vmatmul.msk.bf16.vlgmr.msra.gmra.mxu3 %vm911_vm2, %v1610_v53  ;;  %v5070_v53 = vld [vmem:[#allocation8] sm:$0xff] }
 0x86b   : > { %2102 = vmatpush.bf16.msra.mxu3 %v4653_v51  ;;  %v5071_v51 = vld [vmem:[#allocation8 + $0x8] sm:$0xff] }
 0x86f   : > { %2103 = vmatpush.bf16.msra.mxu3 %v4645_v57 }
 0x870   : > { %v1846_v17 = vpop.f32.mrf.mxu1 }
 0x873   : > { %2104 = vmatpush.bf16.msra.mxu3 %v4637_v63 }
 0x874   : > { %v1733_v20 = vpop.f32.mrf.mxu2 }
 0x877   : > { %2105 = vmatpush.bf16.msra.mxu3 %v4629_v39 }
 0x878   : > { %v1848_v30 = vpop.f32.mrf.mxu1 }
 0x879   : > { %v1851_v12 = vpack.c.bf16 %v1848_v30, %v1846_v17 }
 0x87b   : > { %4593 = vmatmul.msk.bf16.vlgmr.msra.gmra.mxu2 %vm911_vm2, %v1851_v12  ;;  %2106 = vmatpush.bf16.msra.mxu3 %v4621_v7  ;;  %v6196_v7 = vperm.slane %v2016_v36, 0 }
 0x87c   : > { %v1735_v59 = vpop.f32.mrf.mxu2 }
 0x87d   : > { %v1738_v18 = vpack.c.bf16 %v1735_v59, %v1733_v20 }
 0x87f   : > { %2107 = vmatpush.bf16.msra.mxu3 %v4613_v14 }
 0x880   : > { %4590 = vmatmul.msk.bf16.vlgmr.msrb.gmra.mxu3 %vm911_vm2, %v1738_v18 }
 0x883   : > { %2108 = vmatpush.bf16.msra.mxu3 %v4605_v21 }
 0x887   : > { %2109 = vmatpush.bf16.msra.mxu3 %v4597_v27 }
 0x890   : > { %2110 = vmatmul.bf16.vlgmr.msra.gmra.mxu3 %v1998_v6  ;;  %v5074_v6 = vld [vmem:[#allocation8 + $0x20] sm:$0xff] }
 0x891   : > { %2287 = vmatpush.bf16.msrb.mxu1 %v5074_v6 }
 0x895   : > { %2288 = vmatpush.bf16.msrb.mxu1 %v5073_v22 }
 0x899   : > { %2289 = vmatpush.bf16.msrb.mxu1 %v5072_v3 }
 0x89d   : > { %2290 = vmatpush.bf16.msrb.mxu1 %v5071_v51 }
 0x8a1   : > { %2291 = vmatpush.bf16.msrb.mxu1 %v5070_v53 }
 0x8be   : > { %v2130_v48 = vpop.f32.mrf.mxu0 }
 0x8bf   : > { %v2131_v44 = vadd.f32 %v2130_v48, %v6186_v47 }
 0x8c1   : > { %v2141_v46 = vmax.f32 %v2131_v44, 0.0 }
 0x8c6   : > { %v2132_v37 = vpop.f32.mrf.mxu0 }
 0x8c7   : > { %v2133_v38 = vadd.f32 %v2132_v37, %v6186_v47 }
 0x8c9   : > { %v2143_v50 = vmax.f32 %v2133_v38, 0.0 }
 0x8cb   : > { %v2149_v40 = vpack.c.bf16 %v2143_v50, %v2141_v46 }
 0x8cd   : > { %2311 = vmatmul.bf16.vlgmr.msrb.gmra.mxu2 %v2149_v40 }
 0x8ed   : > { %v1623_v49 = vpop.f32.mrf.mxu3 }
 0x8ee   : > { %v1641_v54 = vadd.f32 %v6050_v4, %v1623_v49 }
 0x8f5   : > { %v1625_v32 = vpop.f32.mrf.mxu3 }
 0x8f6   : > { %v1643_v17 = vadd.f32 %v6054_v0, %v1625_v32 }
 0x8fe   : > { %v1864_v56 = vpop.f32.mrf.mxu2 }
 0x903   : > { %v1751_v57 = vpop.f32.mrf.mxu3 }
 0x904   : > { %v1756_v61 = vadd.f32 %v1751_v57, %v1641_v54 }
 0x906   : > { %v1869_v33 = vadd.f32 %v1864_v56, %v1756_v61  ;;  %v1866_v39 = vpop.f32.mrf.mxu2 }
 0x908   : > { %v1877_v63 = vadd.f32 %v6097_v55, %v1869_v33 }
 0x90a   : > { %v1881_v10 = vadd.f32 %v1877_v63, %v5885_v28 }
 0x90b   : > { %v1753_v58 = vpop.f32.mrf.mxu3 }
 0x90c   : > { %v1757_v43 = vadd.f32 %v1753_v58, %v1643_v17  ;;  %1889 = vadd.xlane.f32.xlu0 %v1881_v10  ;;  %v1906_v19 = vmul.f32 %v1881_v10, %v1881_v10 }
 0x90e   : > { %v1870_v1 = vadd.f32 %v1866_v39, %v1757_v43  ;;  %1912 = vadd.xlane.f32.xlu2 %v1906_v19 }
 0x910   : > { %v1878_v2 = vadd.f32 %v6097_v55, %v1870_v1 }
 0x912   : > { %v1882_v4 = vadd.f32 %v1878_v2, %v5889_v31 }
 0x913   : > { %v2111_v20 = vpop.f32.mrf.mxu3 }
 0x914   : > { %1891 = vadd.xlane.f32.xlu1 %v1882_v4  ;;  %v1907_v5 = vmul.f32 %v1882_v4, %v1882_v4  ;;  %v2112_v0 = vadd.f32 %v2111_v20, %v6196_v7 }
 0x916   : > { %1914 = vadd.xlane.f32.xlu0 %v1907_v5  ;;  %v2140_v9 = vmax.f32 %v2112_v0, 0.0  ;;  %v4809_v5 = vld [vmem:[#allocation2 + $0x168] sm:$0xf]  ;;  %v5108_v0 = vld [vmem:[#allocation2 + $0x170] sm:$0xf0] }
 0x91b   : > { %v2113_v28 = vpop.f32.mrf.mxu3 }
 0x91c   : > { %v2114_v30 = vadd.f32 %v2113_v28, %v6196_v7  ;;  %v5107_v28 = vld [vmem:[#allocation2 + $0x16c] sm:$0xf] }
 0x91e   : > { %v2142_v11 = vmax.f32 %v2114_v30, 0.0  ;;  %v4811_v30 = vld [vmem:[#allocation2 + $0x174] sm:$0xf0] }
 0x920   : > { %v2148_v12 = vpack.c.bf16 %v2142_v11, %v2140_v9  ;;  %v4814_v9 = vor.u32 %v5107_v28, %v4811_v30  ;;  %v4797_v11 = vld [vmem:[#allocation2 + $0x150] sm:$0xf]  ;;  %v4739_v28 = vld [vmem:[#allocation2 + $0xe4] sm:$0xf0]  ;;  %v5097_v30 = vld [vmem:[#allocation2 + $0x118] sm:$0xf0] }
 0x922   : > { %2292 = vmatmul.bf16.vlgmr.msrb.gmra.mxu1 %v2148_v12  ;;  %2625 = vmatpush.bf16.msrb.mxu0 %v4814_v9  ;;  %v5105_v12 = vld [vmem:[#allocation2 + $0x158] sm:$0xf0] }
 0x950   : > { %v2312_v49 = vpop.f32.mrf.mxu2 }
 0x958   : > { %v2314_v39 = vpop.f32.mrf.mxu2 }
 0x97f   : > { %v1890_v13 = vpop.xlane.xlu0 %1889 }
 0x980   : > { %v1902_v55 = vmul.f32 %v6152_v60, %v1890_v13  ;;  %v4798_v13 = vor.u32 %v5105_v12, %v4797_v11 }
 0x981   : > { %v1913_v14 = vpop.xlane.xlu2 %1912 }
 0x982   : > { %v1922_v31 = vmul.f32 %v1902_v55, %v1902_v55  ;;  %v1918_v15 = vmul.f32 %v1913_v14, %v6152_v60  ;;  %v1934_v22 = vsub.f32 %v1881_v10, %v1902_v55  ;;  %v4799_v55 = vld [vmem:[#allocation2 + $0x15c] sm:$0xf0] }
 0x984   : > { %v1926_v16 = vsub.f32 %v1918_v15, %v1922_v31  ;;  %v4785_v31 = vld [vmem:[#allocation2 + $0x138] sm:$0xf]  ;;  %v5102_v15 = vld [vmem:[#allocation2 + $0x140] sm:$0xf0] }
 0x986   : > { %v1930_v59 = vmax.f32 %v1926_v16, 0.0  ;;  %v5101_v16 = vld [vmem:[#allocation2 + $0x13c] sm:$0xf] }
 0x987   : > { %v1892_v18 = vpop.xlane.xlu1 %1891 }
 0x988   : > { %v1938_v21 = vadd.f32 1e-05, %v1930_v59  ;;  %v1903_v23 = vmul.f32 %v6152_v60, %v1892_v18  ;;  %v4786_v59 = vor.u32 %v5102_v15, %v4785_v31  ;;  %v4787_v18 = vld [vmem:[#allocation2 + $0x144] sm:$0xf0]  ;;  %v5086_v31 = vld [vmem:[#allocation2 + $0xc4] sm:$0xf] }
 0x989   : > { %v1915_v25 = vpop.xlane.xlu0 %1914  ;;  %v4727_v15 = vld [vmem:[#allocation2 + $0xcc] sm:$0xf0] }
 0x98a   : > { %5334 = vrsqrt.f32 %v1938_v21  ;;  %v1923_v27 = vmul.f32 %v1903_v23, %v1903_v23  ;;  %v1919_v34 = vmul.f32 %v1915_v25, %v6152_v60  ;;  %vm1966_vm6 = vweird.f32 %v1938_v21 }
 0x98b   : > { %v1935_v57 = vsub.f32 %v1882_v4, %v1903_v23  ;;  %v5109_v23 = vld [vmem:[#allocation2 + $0x178] sm:$0xf0]  ;;  %v4790_v25 = vor.u32 %v5101_v16, %v4787_v18  ;;  %v4757_v16 = vld [vmem:[#allocation2 + $0xf8] sm:$0xf] }
 0x98c   : > { %v1927_v29 = vsub.f32 %v1919_v34, %v1923_v27  ;;  %v4773_v34 = vld [vmem:[#allocation2 + $0x120] sm:$0xf] }
 0x98e   : > { %v1931_v62 = vmax.f32 %v1927_v29, 0.0  ;;  %v5099_v29 = vld [vmem:[#allocation2 + $0x128] sm:$0xf0] }
 0x990   : > { %v5335_v35 = vpop.eup %5334  ;;  %v1939_v48 = vadd.f32 1e-05, %v1931_v62  ;;  %v5098_v62 = vld [vmem:[#allocation2 + $0x124] sm:$0xf] }
 0x991   : > { %v1961_v36 = vmul.f32 %v5335_v35, %v1938_v21  ;;  %vm1967_vm5 = vweird.f32 %v5335_v35  ;;  %v4817_v21 = vld [vmem:[#allocation2 + $0x170] sm:$0xf] }
 0x992   : > { %5336 = vrsqrt.f32 %v1939_v48  ;;  %vm1968_vm7 = vmor %vm1966_vm6, %vm1967_vm5  ;;  %vm1976_vm9 = vweird.f32 %v1939_v48  ;;  %v4818_v27 = vor.u32 %v5109_v23, %v4817_v21  ;;  %v4730_v21 = vor.u32 %v5086_v31, %v4727_v15  ;;  %v5094_v23 = vld [vmem:[#allocation2 + $0x100] sm:$0xf0] }
 0x993   : > { %v1962_v44 = vmul.f32 %v5335_v35, %v1961_v36  ;;  %v4775_v36 = vld [vmem:[#allocation2 + $0x12c] sm:$0xf0] }
 0x994   : > { %2644 = vmatpush.bf16.msra.mxu1 %v4818_v27  ;;  %v4758_v27 = vor.u32 %v5094_v23, %v4757_v16 }
 0x995   : > { %v1963_v37 = vmul.f32 0.5, %v1962_v44  ;;  %v5106_v44 = vld [vmem:[#allocation2 + $0x160] sm:$0xf0] }
 0x997   : > { %v1964_v38 = vsub.f32 1.5, %v1963_v37  ;;  %v4778_v37 = vor.u32 %v5098_v62, %v4775_v36  ;;  %v4745_v62 = vld [vmem:[#allocation2 + $0xe0] sm:$0xf] }
 0x998   : > { %v5337_v46 = vpop.eup %5336 }
 0x999   : > { %v1971_v50 = vmul.f32 %v5337_v46, %v1939_v48  ;;  %v1965_v40 = vmul.f32 %v5335_v35, %v1964_v38  ;;  %vm1977_vm8 = vweird.f32 %v5337_v46  ;;  %v4805_v48 = vld [vmem:[#allocation2 + $0x158] sm:$0xf] }
 0x99a   : > { %vm1978_vm10 = vmor %vm1976_vm9, %vm1977_vm8  ;;  %v4806_v38 = vor.u32 %v5106_v44, %v4805_v48  ;;  %v4733_v44 = vld [vmem:[#allocation2 + $0xc8] sm:$0xf] }
 0x99b   : > { %v1972_v41 = vmul.f32 %v5337_v46, %v1971_v50  ;;  %v1969_v6 = vsel %vm1968_vm7, %v5335_v35, %v1965_v40  ;;  %v4774_v35 = vor.u32 %v5099_v29, %v4773_v34  ;;  %v5096_v50 = vld [vmem:[#allocation2 + $0x110] sm:$0xf0]  ;;  %v5095_v40 = vld [vmem:[#allocation2 + $0x10c] sm:$0xf] }
 0x99c   : > { %v1982_v53 = vmul.f32 %v1969_v6, %v1934_v22  ;;  %2645 = vmatpush.bf16.msra.mxu1 %v4806_v38  ;;  %v4793_v6 = vld [vmem:[#allocation2 + $0x140] sm:$0xf] }
 0x99d   : > { %v1973_v24 = vmul.f32 0.5, %v1972_v41 }
 0x99e   : > { %v1989_v17 = vmul.f32 %v6162_v52, %v1982_v53  ;;  %v4749_v53 = vld [vmem:[#allocation2 + $0xf0] sm:$0xf] }
 0x99f   : > { %v2293_v3 = vpop.f32.mrf.mxu1  ;;  %v1974_v32 = vsub.f32 1.5, %v1973_v24  ;;  %v4763_v24 = vld [vmem:[#allocation2 + $0x114] sm:$0xf0] }
 0x9a0   : > { %v2294_v51 = vadd.f32 %v6207_v42, %v2293_v3  ;;  %v6220_v1 = vadd.f32 %v6168_v8, %v1989_v17  ;;  %v4766_v22 = vor.u32 %v5095_v40, %v4763_v24  ;;  %v4781_v17 = vld [vmem:[#allocation2 + $0x128] sm:$0xf] }
 0x9a1   : > { %v1975_v56 = vmul.f32 %v5337_v46, %v1974_v32 }
 0x9a2   : > { %v2313_v54 = vadd.f32 %v2312_v49, %v2294_v51  ;;  %v5103_v49 = vld [vmem:[#allocation2 + $0x148] sm:$0xf0] }
 0x9a3   : > { %v1979_v33 = vsel %vm1978_vm10, %v5337_v46, %v1975_v56  ;;  %v4761_v46 = vld [vmem:[#allocation2 + $0x108] sm:$0xf]  ;;  %v4794_v3 = vor.u32 %v5103_v49, %v4793_v6  ;;  %v5092_v56 = vld [vmem:[#allocation2 + $0xf4] sm:$0xf] }
 0x9a4   : > { %v6211_v61 = vadd.f32 %v2313_v54, %v6176_v26  ;;  %v1983_v63 = vmul.f32 %v1979_v33, %v1935_v57  ;;  %v4762_v41 = vor.u32 %v5096_v50, %v4761_v46  ;;  %v5093_v54 = vld [vmem:[#allocation2 + $0xf8] sm:$0xf0] }
 0x9a5   : > { %2646 = vmatpush.bf16.msra.mxu1 %v4794_v3  ;;  %v4750_v33 = vor.u32 %v5093_v54, %v4749_v53 }
 0x9a6   : > { %2328 = vadd.xlane.f32.xlu1 %v6211_v61  ;;  %v2340_v10 = vmul.f32 %v6211_v61, %v6211_v61  ;;  %v1990_v43 = vmul.f32 %v6162_v52, %v1983_v63  ;;  %v4751_v63 = vld [vmem:[#allocation2 + $0xfc] sm:$0xf0] }
 0x9a7   : > { %v2295_v58 = vpop.f32.mrf.mxu1 }
 0x9a8   : > { %v2296_v19 = vadd.f32 %v6207_v42, %v2295_v58  ;;  %2344 = vadd.xlane.f32.xlu0 %v2340_v10  ;;  %v6223_v26 = vadd.f32 %v6168_v8, %v1990_v43  ;;  %v4810_v8 = vor.u32 %v5108_v0, %v4809_v5  ;;  %v5100_v10 = vld [vmem:[#allocation2 + $0x130] sm:$0xf0]  ;;  %v5089_v5 = vld [vmem:[#allocation2 + $0xdc] sm:$0xf] }
 0x9a9   : > { %v4742_v11 = vor.u32 %v5089_v5, %v4739_v28 }
 0x9aa   : > { %v2315_v2 = vadd.f32 %v2314_v39, %v2296_v19  ;;  %v1999_v4 = vpack.c.bf16 %v6223_v26, %v6220_v1  ;;  %2606 = vmatpush.bf16.msrb.mxu3 %v4810_v8  ;;  %v4754_v19 = vor.u32 %v5092_v56, %v4751_v63  ;;  %v4782_v39 = vor.u32 %v5100_v10, %v4781_v17  ;;  %v4769_v8 = vld [vmem:[#allocation2 + $0x110] sm:$0xf] }
 0x9ab   : > { %v4770_v12 = vor.u32 %v5097_v30, %v4769_v8  ;;  %v6254_v8 = vld [vmem:[%s6851_s0] ss:$0 sm:$0xff] }
 0x9ac   : > { %v6228_v20 = vadd.f32 %v2315_v2, %v6173_v45  ;;  %2115 = vmatmul.bf16.gmra.mxu3 %v1999_v4  ;;  %2134 = vmatmul.bf16.gmra.mxu0 %v1999_v4  ;;  %v5104_v45 = vld [vmem:[#allocation2 + $0x154] sm:$0xf]  ;;  %v4737_v4 = vld [vmem:[#allocation2 + $0xd8] sm:$0xf] }
 0x9ad   : > { %v4802_v14 = vor.u32 %v5104_v45, %v4799_v55  ;;  %2647 = vmatpush.bf16.msra.mxu1 %v4782_v39  ;;  %v4725_v45 = vld [vmem:[#allocation2 + $0xc0] sm:$0xf] }
 0x9ae   : > { %2330 = vadd.xlane.f32.xlu2 %v6228_v20  ;;  %v2341_v52 = vmul.f32 %v6228_v20, %v6228_v20  ;;  %2607 = vmatpush.bf16.msrb.mxu3 %v4798_v13  ;;  %v5087_v13 = vld [vmem:[#allocation2 + $0xc8] sm:$0xf0] }
 0x9af   : > { %2626 = vmatpush.bf16.msrb.mxu0 %v4802_v14  ;;  %v4726_v14 = vor.u32 %v5087_v13, %v4725_v45 }
 0x9b0   : > { %2346 = vadd.xlane.f32.xlu1 %v2341_v52  ;;  %v5090_v52 = vld [vmem:[#allocation2 + $0xe0] sm:$0xf0] }
 0x9b1   : > { %v4738_v0 = vor.u32 %v5090_v52, %v4737_v4  ;;  %2648 = vmatpush.bf16.msra.mxu1 %v4770_v12  ;;  %v6262_v12 = vld [vmem:[%s6852_s19] ss:$0 sm:$0xff] }
 0x9b2   : > { %2608 = vmatpush.bf16.msrb.mxu3 %v4786_v59 }
 0x9b3   : > { %2627 = vmatpush.bf16.msrb.mxu0 %v4790_v25 }
 0x9b5   : > { %2649 = vmatpush.bf16.msra.mxu1 %v4758_v27 }
 0x9b6   : > { %2609 = vmatpush.bf16.msrb.mxu3 %v4774_v35  ;;  %v5091_v35 = vld [vmem:[#allocation2 + $0xe8] sm:$0xf0] }
 0x9b7   : > { %2628 = vmatpush.bf16.msrb.mxu0 %v4778_v37  ;;  %v4746_v48 = vor.u32 %v5091_v35, %v4745_v62  ;;  %v5088_v37 = vld [vmem:[#allocation2 + $0xd0] sm:$0xf0] }
 0x9b8   : > { %v4734_v24 = vor.u32 %v5088_v37, %v4733_v44 }
 0x9b9   : > { %2650 = vmatpush.bf16.msra.mxu1 %v4746_v48 }
 0x9ba   : > { %2610 = vmatpush.bf16.msrb.mxu3 %v4762_v41 }
 0x9bb   : > { %2629 = vmatpush.bf16.msrb.mxu0 %v4766_v22 }
 0x9bd   : > { %2651 = vmatpush.bf16.msra.mxu1 %v4734_v24 }
 0x9be   : > { %2611 = vmatpush.bf16.msrb.mxu3 %v4750_v33 }
 0x9bf   : > { %2630 = vmatpush.bf16.msrb.mxu0 %v4754_v19 }
 0x9c2   : > { %2612 = vmatpush.bf16.msrb.mxu3 %v4738_v0 }
 0x9c3   : > { %2631 = vmatpush.bf16.msrb.mxu0 %v4742_v11 }
 0x9c6   : > { %2613 = vmatpush.bf16.msrb.mxu3 %v4726_v14 }
 0x9c7   : > { %2632 = vmatpush.bf16.msrb.mxu0 %v4730_v21 }
 0xa19   : > { %v2329_v32 = vpop.xlane.xlu1 %2328 }
 0xa1a   : > { %v6234_v51 = vmul.f32 %v2329_v32, %v6152_v60 }
 0xa1b   : > { %v2345_v57 = vpop.xlane.xlu0 %2344 }
 0xa1c   : > { %v2356_v58 = vmul.f32 %v6234_v51, %v6234_v51  ;;  %v2352_v43 = vmul.f32 %v2345_v57, %v6152_v60  ;;  %v2368_v4 = vsub.f32 %v6211_v61, %v6234_v51 }
 0xa1e   : > { %v2360_v2 = vsub.f32 %v2352_v43, %v2356_v58 }
 0xa20   : > { %v2364_v9 = vmax.f32 %v2360_v2, 0.0 }
 0xa21   : > { %v2331_v55 = vpop.xlane.xlu2 %2330 }
 0xa22   : > { %v2372_v59 = vadd.f32 1e-05, %v2364_v9  ;;  %v6240_v18 = vmul.f32 %v2331_v55, %v6152_v60 }
 0xa23   : > { %v2347_v25 = vpop.xlane.xlu1 %2346 }
 0xa24   : > { %5338 = vrsqrt.f32 %v2372_v59  ;;  %v2357_v34 = vmul.f32 %v6240_v18, %v6240_v18  ;;  %v2353_v29 = vmul.f32 %v2347_v25, %v6152_v60  ;;  %vm2382_vm12 = vweird.f32 %v2372_v59 }
 0xa25   : > { %v2369_v9 = vsub.f32 %v6228_v20, %v6240_v18  ;;  %v4722_v18 = vld [vmem:[%s6799_s4 + $0x3] sm:$0x7] }
 0xa26   : > { %v2361_v36 = vsub.f32 %v2353_v29, %v2357_v34  ;;  %v6284_v29 = vperm.slane %v4722_v18, 1  ;;  %v6289_v35 = vperm.slane %v4722_v18, 0 }
 0xa28   : > { %v2365_v38 = vmax.f32 %v2361_v36, 0.0 }
 0xa29   : > { %v2135_v50 = vpop.f32.mrf.mxu0 }
 0xa2a   : > { %v5339_v46 = vpop.eup %5338  ;;  %v2373_v41 = vadd.f32 1e-05, %v2365_v38  ;;  %v2136_v32 = vadd.f32 %v2135_v50, %v6186_v47 }
 0xa2b   : > { %v2377_v40 = vmul.f32 %v5339_v46, %v2372_v59  ;;  %vm2383_vm11 = vweird.f32 %v5339_v46 }
 0xa2c   : > { %5340 = vrsqrt.f32 %v2373_v41  ;;  %v2145_v63 = vmax.f32 %v2136_v32, 0.0  ;;  %vm2384_vm13 = vmor %vm2382_vm12, %vm2383_vm11  ;;  %vm2392_vm15 = vweird.f32 %v2373_v41 }
 0xa2d   : > { %v2378_v6 = vmul.f32 %v5339_v46, %v2377_v40 }
 0xa2f   : > { %v2379_v49 = vmul.f32 0.5, %v2378_v6  ;;  %v2116_v22 = vpop.f32.mrf.mxu3 }
 0xa30   : > { %v2117_v58 = vadd.f32 %v2116_v22, %v6196_v7 }
 0xa31   : > { %v2380_v3 = vsub.f32 1.5, %v2379_v49  ;;  %v2137_v53 = vpop.f32.mrf.mxu0 }
 0xa32   : > { %v5341_v54 = vpop.eup %5340  ;;  %v2138_v56 = vadd.f32 %v2137_v53, %v6186_v47  ;;  %v2144_v0 = vmax.f32 %v2117_v58, 0.0 }
 0xa33   : > { %v2381_v57 = vmul.f32 %v5339_v46, %v2380_v3  ;;  %v2387_v33 = vmul.f32 %v5341_v54, %v2373_v41  ;;  %vm2393_vm14 = vweird.f32 %v5341_v54 }
 0xa34   : > { %v2147_v17 = vmax.f32 %v2138_v56, 0.0  ;;  %vm2394_vm0 = vmor %vm2392_vm15, %vm2393_vm14 }
 0xa35   : > { %v2388_v10 = vmul.f32 %v5341_v54, %v2387_v33  ;;  %v2385_v19 = vsel %vm2384_vm13, %v5339_v46, %v2381_v57  ;;  %v6296_v46 = vperm.slane %v4722_v18, 2 }
 0xa36   : > { %v2151_v43 = vpack.c.bf16 %v2147_v17, %v2145_v63  ;;  %v2416_v5 = vmul.f32 %v2385_v19, %v2368_v4 }
 0xa37   : > { %v2389_v39 = vmul.f32 0.5, %v2388_v10  ;;  %v2118_v2 = vpop.f32.mrf.mxu3 }
 0xa38   : > { %v2119_v52 = vadd.f32 %v2118_v2, %v6196_v7  ;;  %2316 = vmatmul.bf16.gmra.mxu2 %v2151_v43  ;;  %v2423_v11 = vmul.f32 %v6254_v8, %v2416_v5 }
 0xa39   : > { %v2390_v47 = vsub.f32 1.5, %v2389_v39 }
 0xa3a   : > { %v2146_v28 = vmax.f32 %v2119_v52, 0.0  ;;  %v6266_v13 = vadd.f32 %v6262_v12, %v2423_v11 }
 0xa3b   : > { %v2391_v30 = vmul.f32 %v5341_v54, %v2390_v47 }
 0xa3c   : > { %v2150_v61 = vpack.c.bf16 %v2146_v28, %v2144_v0 }
 0xa3d   : > { %v2395_v51 = vsel %vm2394_vm0, %v5341_v54, %v2391_v30 }
 0xa3e   : > { %v2417_v7 = vmul.f32 %v2395_v51, %v2369_v9  ;;  %2297 = vmatmul.bf16.gmra.mxu1 %v2150_v61 }
 0xa40   : > { %v2424_v45 = vmul.f32 %v6254_v8, %v2417_v7 }
 0xa42   : > { %v6269_v55 = vadd.f32 %v6262_v12, %v2424_v45 }
 0xa44   : > { %v2434_v20 = vpack.c.bf16 %v6269_v55, %v6266_v13 }
 0xa46   : > { %2614 = vmatmul.bf16.vlgmr.msrb.gmra.mxu3 %v2434_v20  ;;  %2633 = vmatmul.bf16.vlgmr.msrb.gmra.mxu0 %v2434_v20 }
 0xa4e   : > { %2652 = vmatmul.bf16.vlgmr.msra.gmra.mxu1 %v2434_v20 }
 0xabb   : > { %v2298_v14 = vpop.f32.mrf.mxu1  ;;  %v2317_v31 = vpop.f32.mrf.mxu2 }
 0xabc   : > { %v2299_v15 = vadd.f32 %v6207_v42, %v2298_v14 }
 0xabe   : > { %v2318_v16 = vadd.f32 %v2317_v31, %v2299_v15 }
 0xac0   : > { %v6275_v59 = vadd.f32 %v2318_v16, %v6220_v1 }
 0xac2   : > { %2332 = vadd.xlane.f32.xlu2 %v6275_v59  ;;  %v2342_v21 = vmul.f32 %v6275_v59, %v6275_v59 }
 0xac3   : > { %v2300_v23 = vpop.f32.mrf.mxu1  ;;  %v2634_v27 = vpop.f32.mrf.mxu0 }
 0xac4   : > { %v2301_v25 = vadd.f32 %v6207_v42, %v2300_v23  ;;  %2348 = vadd.xlane.f32.xlu1 %v2342_v21  ;;  %v2319_v34 = vpop.f32.mrf.mxu2  ;;  %v2635_v36 = vadd.f32 %v2634_v27, %v6284_v29 }
 0xac6   : > { %v2320_v62 = vadd.f32 %v2319_v34, %v2301_v25  ;;  %v2686_v50 = vpack.c.bf16 %v2635_v36, %v2635_v36 }
 0xac8   : > { %v6287_v1 = vadd.f32 %v2320_v62, %v6223_v26  ;;  %v2697_v6 = vunpack.c.l.b16 %v2686_v50 }
 0xac9   : > { %v2615_v48 = vpop.f32.mrf.mxu3 }
 0xaca   : > { %2334 = vadd.xlane.f32.xlu0 %v6287_v1  ;;  %v2343_v44 = vmul.f32 %v6287_v1, %v6287_v1  ;;  %v2616_v37 = vadd.f32 %v2615_v48, %v6289_v35 }
 0xacb   : > { %v2653_v42 = vpop.f32.mrf.mxu1  ;;  %v2636_v38 = vpop.f32.mrf.mxu0 }
 0xacc   : > { %2350 = vadd.xlane.f32.xlu2 %v2343_v44  ;;  %v2637_v26 = vadd.f32 %v2636_v38, %v6284_v29  ;;  %v2663_v41 = vmul.f32 0.17677669, %v2616_v37  ;;  %v2654_v24 = vadd.f32 %v2653_v42, %v6296_v46 }
 0xace   : > { %v2687_v40 = vpack.c.bf16 %v2637_v26, %v2637_v26  ;;  %v2684_v54 = vpack.c.bf16 %v2663_v41, %v2663_v41  ;;  %v2688_v56 = vpack.c.bf16 %v2654_v24, %v2654_v24 }
 0xad0   : > { %v2698_v49 = vunpack.c.l.b16 %v2687_v40  ;;  %v2692_v58 = vunpack.c.l.b16 %v2684_v54  ;;  %v2771_v43 = vunpack.c.l.b16 %v2688_v56 }
 0xad1   : > { %v2617_v22 = vpop.f32.mrf.mxu3 }
 0xad2   : > { %v2618_v3 = vadd.f32 %v2617_v22, %v6289_v35  ;;  %v6301_v32 = vpack.c.b16 %v2698_v49, %v2697_v6 }
 0xad3   : > { %v2655_v53 = vpop.f32.mrf.mxu1 }
 0xad4   : > { %v2664_v57 = vmul.f32 0.17677669, %v2618_v3  ;;  %v2656_v33 = vadd.f32 %v2655_v53, %v6296_v46  ;;  %v2704_v63 = vsel %vm911_vm2, %v6301_v32, 0 }
 0xad5   : > { %2713 = vmatpush.bf16.xpose.msra.mxu2 %v2704_v63 }
 0xad6   : > { %v2685_v17 = vpack.c.bf16 %v2664_v57, %v2664_v57  ;;  %v2689_v10 = vpack.c.bf16 %v2656_v33, %v2656_v33 }
 0xad8   : > { %v2693_v19 = vunpack.c.l.b16 %v2685_v17  ;;  %v2772_v39 = vunpack.c.l.b16 %v2689_v10 }
 0xada   : > { %v6306_v2 = vpack.c.b16 %v2693_v19, %v2692_v58  ;;  %v6308_v4 = vpack.c.b16 %v2772_v39, %v2771_v43 }
 0xadc   : > { %4819 = vmatmul.msk.bf16.vlgmr.msra.gmra.mxu2 %vm911_vm2, %v6306_v2 }
 0xadd   : > { %2785 = vmatpush.bf16.msrb.mxu2 %v6308_v4  ;;  %2793 = vrot.lane.b32.xlu1 %v6306_v2, %s5665_s28 }
 0xade   : > { %2795 = vrot.lane.b32.xlu0 %v6301_v32, %s5665_s28 }
 0xae4   : > { %2947 = vrot.lane.b32.xlu2 %v6301_v32, %s5664_s20 }
 0xae6   : > { %2945 = vrot.lane.b32.xlu0 %v6306_v2, %s5664_s20 }
 0xb35   : > { %v2333_v52 = vpop.xlane.xlu2 %2332 }
 0xb36   : > { %v2338_v47 = vmul.f32 %v2333_v52, %v6152_v60 }
 0xb37   : > { %v2349_v5 = vpop.xlane.xlu1 %2348 }
 0xb38   : > { %v2358_v0 = vmul.f32 %v2338_v47, %v2338_v47  ;;  %v2354_v28 = vmul.f32 %v2349_v5, %v6152_v60  ;;  %v2370_v26 = vsub.f32 %v6275_v59, %v2338_v47 }
 0xb3a   : > { %v2362_v30 = vsub.f32 %v2354_v28, %v2358_v0 }
 0xb3c   : > { %v2366_v9 = vmax.f32 %v2362_v30, 0.0 }
 0xb3d   : > { %v2335_v61 = vpop.xlane.xlu0 %2334 }
 0xb3e   : > { %v2374_v51 = vadd.f32 1e-05, %v2366_v9  ;;  %v2339_v7 = vmul.f32 %v2335_v61, %v6152_v60 }
 0xb3f   : > { %v2351_v11 = vpop.xlane.xlu2 %2350 }
 0xb40   : > { %5342 = vrsqrt.f32 %v2374_v51  ;;  %v2359_v45 = vmul.f32 %v2339_v7, %v2339_v7  ;;  %v2355_v20 = vmul.f32 %v2351_v11, %v6152_v60  ;;  %vm2402_vm4 = vweird.f32 %v2374_v51 }
 0xb41   : > { %v2371_v6 = vsub.f32 %v6287_v1, %v2339_v7 }
 0xb42   : > { %v2363_v14 = vsub.f32 %v2355_v20, %v2359_v45 }
 0xb44   : > { %v2367_v31 = vmax.f32 %v2363_v14, 0.0 }
 0xb46   : > { %v5343_v15 = vpop.eup %5342  ;;  %v2375_v18 = vadd.f32 1e-05, %v2367_v31 }
 0xb47   : > { %v2397_v16 = vmul.f32 %v5343_v15, %v2374_v51  ;;  %v2948_v34 = vpop.permute.xlu2 %2947  ;;  %vm2403_vm1 = vweird.f32 %v5343_v15 }
 0xb48   : > { %5344 = vrsqrt.f32 %v2375_v18  ;;  %v2953_v37 = vsel %vm911_vm2, %v2948_v34, 0  ;;  %vm2404_vm5 = vmor %vm2402_vm4, %vm2403_vm1  ;;  %vm2412_vm7 = vweird.f32 %v2375_v18 }
 0xb49   : > { %v2398_v21 = vmul.f32 %v5343_v15, %v2397_v16 }
 0xb4b   : > { %v2399_v23 = vmul.f32 0.5, %v2398_v21 }
 0xb4d   : > { %v2400_v25 = vsub.f32 1.5, %v2399_v23 }
 0xb4e   : > { %v5345_v27 = vpop.eup %5344 }
 0xb4f   : > { %v2401_v62 = vmul.f32 %v5343_v15, %v2400_v25  ;;  %v2407_v36 = vmul.f32 %v5345_v27, %v2375_v18  ;;  %vm2413_vm6 = vweird.f32 %v5345_v27  ;;  %v2794_v1 = vpop.permute.xlu1 %2793 }
 0xb50   : > { %v2796_v48 = vpop.permute.xlu0 %2795  ;;  %vm2414_vm8 = vmor %vm2412_vm7, %vm2413_vm6 }
 0xb51   : > { %v2801_v44 = vsel %vm911_vm2, %v2796_v48, 0  ;;  %v2408_v42 = vmul.f32 %v5345_v27, %v2407_v36  ;;  %v2405_v50 = vsel %vm2404_vm5, %v5343_v15, %v2401_v62 }
 0xb52   : > { %2810 = vmatpush.bf16.xpose.msra.mxu3 %v2801_v44  ;;  %v2418_v41 = vmul.f32 %v2405_v50, %v2370_v26 }
 0xb53   : > { %v2409_v38 = vmul.f32 0.5, %v2408_v42 }
 0xb54   : > { %v2425_v3 = vmul.f32 %v6254_v8, %v2418_v41 }
 0xb55   : > { %v2410_v40 = vsub.f32 1.5, %v2409_v38 }
 0xb56   : > { %v6332_v54 = vadd.f32 %v6262_v12, %v2425_v3 }
 0xb57   : > { %v2411_v24 = vmul.f32 %v5345_v27, %v2410_v40 }
 0xb58   : > { %v2946_v57 = vpop.permute.xlu0 %2945 }
 0xb59   : > { %v2415_v49 = vsel %vm2414_vm8, %v5345_v27, %v2411_v24 }
 0xb5a   : > { %2962 = vmatpush.bf16.xpose.msrb.mxu3 %v2953_v37  ;;  %v2419_v22 = vmul.f32 %v2415_v49, %v2371_v6 }
 0xb5c   : > { %v2426_v53 = vmul.f32 %v6254_v8, %v2419_v22 }
 0xb5e   : > { %v6335_v56 = vadd.f32 %v6262_v12, %v2426_v53 }
 0xb5f   : > { %v2715_v37 = vpop.f32.mrf.mxu2 }
 0xb60   : > { %v2435_v59 = vpack.c.bf16 %v6335_v56, %v6332_v54  ;;  %v2720_v38 = vsel %vm932_vm3, %v2715_v37, -inf }
 0xb62   : > { %2619 = vmatmul.bf16.gmra.mxu3 %v2435_v59  ;;  %2638 = vmatmul.bf16.gmra.mxu0 %v2435_v59 }
 0xb63   : > { %2657 = vmatmul.bf16.gmra.mxu1 %v2435_v59 }
 0xb67   : > { %v6368_v50 = vpop.f32.mrf.mxu2 }
 0xb68   : > { %v2723_v26 = vsel %vm932_vm3, %v6368_v50, -inf }
 0xb72   : > { %4821 = vmatmul.msk.bf16.vlgmr.msra.gmra.mxu3 %vm911_vm2, %v2794_v1 }
 0xb82   : > { %4841 = vmatmul.msk.bf16.vlgmr.msrb.gmra.mxu3 %vm911_vm2, %v2946_v57 }
 0xbe5   : > { %v2620_v33 = vpop.f32.mrf.mxu3 }
 0xbe6   : > { %v2621_v8 = vadd.f32 %v2620_v33, %v6289_v35 }
 0xbe8   : > { %v2665_v63 = vmul.f32 0.17677669, %v2621_v8 }
 0xbea   : > { %v3195_v10 = vpack.c.bf16 %v2665_v63, %v2665_v63 }
 0xbec   : > { %v3203_v19 = vunpack.c.l.b16 %v3195_v10 }
 0xbed   : > { %v2622_v17 = vpop.f32.mrf.mxu3 }
 0xbee   : > { %v2623_v12 = vadd.f32 %v2622_v17, %v6289_v35 }
 0xbf0   : > { %v2666_v58 = vmul.f32 0.17677669, %v2623_v12 }
 0xbf2   : > { %v3196_v43 = vpack.c.bf16 %v2666_v58, %v2666_v58 }
 0xbf4   : > { %v3204_v39 = vunpack.c.l.b16 %v3196_v43 }
 0xbf5   : > { %v2812_v52 = vpop.f32.mrf.mxu3 }
 0xbf6   : > { %v6343_v47 = vpack.c.b16 %v3204_v39, %v3203_v19  ;;  %v2817_v5 = vsel %vm932_vm3, %v2812_v52, -inf }
 0xbf7   : > { %2818 = vmax.xlane.f32.xlu0 %v2817_v5 }
 0xbfd   : > { %v2814_v0 = vpop.f32.mrf.mxu3 }
 0xbfe   : > { %v2820_v28 = vsel %vm932_vm3, %v2814_v0, -inf }
 0xbff   : > { %2821 = vmax.xlane.f32.xlu2 %v2820_v28 }
 0xc05   : > { %v2964_v30 = vpop.f32.mrf.mxu3 }
 0xc06   : > { %v2969_v9 = vsel %vm932_vm3, %v2964_v30, -inf }
 0xc07   : > { %2970 = vmax.xlane.f32.xlu1 %v2969_v9 }
 0xc0d   : > { %v2966_v35 = vpop.f32.mrf.mxu3 }
 0xc0e   : > { %v2972_v61 = vsel %vm932_vm3, %v2966_v35, -inf }
 0xc0f   : > { %2973 = vmax.xlane.f32.xlu0 %v2972_v61 }
 0xc6a   : > { %v2819_v51 = vpop.xlane.xlu0 %2818 }
 0xc6b   : > { %v2823_v7 = vsub.f32 %v2812_v52, %v2819_v51 }
 0xc6d   : > { %v2825_v11 = vmul.f32 1.442695, %v2823_v7 }
 0xc6f   : > { %5346 = vpow2.f32 %v2825_v11 }
 0xc72   : > { %v2822_v45 = vpop.xlane.xlu2 %2821 }
 0xc73   : > { %v2824_v20 = vsub.f32 %v2814_v0, %v2822_v45 }
 0xc75   : > { %v6349_v14 = vpop.eup %5346  ;;  %v2827_v31 = vmul.f32 1.442695, %v2824_v20 }
 0xc76   : > { %v2829_v15 = vsel %vm932_vm3, %v6349_v14, 0.0 }
 0xc77   : > { %5348 = vpow2.f32 %v2827_v31  ;;  %2830 = vadd.xlane.f32.xlu2 %v2829_v15 }
 0xc7a   : > { %v2971_v16 = vpop.xlane.xlu1 %2970 }
 0xc7b   : > { %v2975_v18 = vsub.f32 %v2964_v30, %v2971_v16 }
 0xc7d   : > { %v6353_v21 = vpop.eup %5348  ;;  %v2977_v23 = vmul.f32 1.442695, %v2975_v18 }
 0xc7e   : > { %v2832_v25 = vsel %vm932_vm3, %v6353_v21, 0.0 }
 0xc7f   : > { %5350 = vpow2.f32 %v2977_v23  ;;  %2833 = vadd.xlane.f32.xlu1 %v2832_v25 }
 0xc82   : > { %v2974_v27 = vpop.xlane.xlu0 %2973 }
 0xc83   : > { %v2976_v34 = vsub.f32 %v2966_v35, %v2974_v27 }
 0xc85   : > { %v6357_v62 = vpop.eup %5350  ;;  %v2979_v36 = vmul.f32 1.442695, %v2976_v34 }
 0xc86   : > { %v2981_v48 = vsel %vm932_vm3, %v6357_v62, 0.0 }
 0xc87   : > { %5352 = vpow2.f32 %v2979_v36  ;;  %2982 = vadd.xlane.f32.xlu0 %v2981_v48 }
 0xc8d   : > { %v6361_v44 = vpop.eup %5352 }
 0xc8e   : > { %v2984_v42 = vsel %vm932_vm3, %v6361_v44, 0.0 }
 0xc8f   : > { %2985 = vadd.xlane.f32.xlu2 %v2984_v42 }
 0xc97   : > { %2721 = vmax.xlane.f32.xlu2 %v2720_v38 }
 0xc98   : > { %2866 = vrot.lane.b32.xlu1 %v6308_v4, %s5665_s28 }
 0xc9b   : > { %3018 = vrot.lane.b32.xlu0 %v6308_v4, %s5664_s20 }
 0xc9f   : > { %2724 = vmax.xlane.f32.xlu2 %v2723_v26 }
 0xca0   : > { %3072 = vrot.lane.b32.xlu1 %v6301_v32, %s5666_s23 }
 0xcea   : > { %v2831_v40 = vpop.xlane.xlu2 %2830 }
 0xceb   : > { %5354 = vrcp.f32 %v2831_v40  ;;  %v2846_v12 = vand.u32 2147483648, %v2831_v40  ;;  %vm2840_vm13 = vweird.f32 %v2831_v40  ;;  %v2844_v10 = vand.u32 2147483647, %v2831_v40 }
 0xced   : > { %v2847_v5 = vor.u32 1.1754944e-38, %v2846_v12  ;;  %vm2845_vm0 = vcmp.eq.f32.partialorder %v2844_v10, 8.507059e+37 }
 0xcf1   : > { %v5355_v41 = vpop.eup %5354 }
 0xcf2   : > { %v2834_v24 = vpop.xlane.xlu1 %2833  ;;  %v2836_v6 = vmul.f32 %v5355_v41, %v2831_v40  ;;  %vm2841_vm10 = vweird.f32 %v5355_v41 }
 0xcf3   : > { %5356 = vrcp.f32 %v2834_v24  ;;  %v2861_v33 = vand.u32 2147483648, %v2834_v24  ;;  %vm2855_vm11 = vweird.f32 %v2834_v24  ;;  %v2859_v63 = vand.u32 2147483647, %v2834_v24  ;;  %vm2842_vm14 = vmor %vm2840_vm13, %vm2841_vm10 }
 0xcf4   : > { %v2837_v49 = vsub.f32 1.0, %v2836_v6 }
 0xcf5   : > { %v2862_v19 = vor.u32 1.1754944e-38, %v2861_v33  ;;  %vm2860_vm15 = vcmp.eq.f32.partialorder %v2859_v63, 8.507059e+37  ;;  %v6403_v33 = vld [vmem:[#allocation5 + $0x50] sm:$0xff] }
 0xcf6   : > { %v2838_v59 = vmul.f32 %v5355_v41, %v2837_v49 }
 0xcf8   : > { %v2839_v32 = vadd.f32 %v5355_v41, %v2838_v59 }
 0xcf9   : > { %v5357_v22 = vpop.eup %5356 }
 0xcfa   : > { %v2851_v3 = vmul.f32 %v5357_v22, %v2834_v24  ;;  %v6376_v53 = vpop.xlane.xlu0 %2982  ;;  %vm2856_vm9 = vweird.f32 %v5357_v22  ;;  %v2843_v39 = vsel %vm2842_vm14, %v5355_v41, %v2839_v32  ;;  %v2639_v32 = vpop.f32.mrf.mxu0 }
 0xcfb   : > { %5358 = vrcp.f32 %v6376_v53  ;;  %vm2857_vm12 = vmor %vm2855_vm11, %vm2856_vm9  ;;  %v2848_v28 = vsel %vm2845_vm0, %v2847_v5, %v2843_v39  ;;  %v2998_v34 = vand.u32 2147483648, %v6376_v53  ;;  %vm2992_vm7 = vweird.f32 %v6376_v53 }
 0xcfc   : > { %v2852_v1 = vsub.f32 1.0, %v2851_v3  ;;  %v2849_v61 = vmul.f32 %v6349_v14, %v2848_v28  ;;  %v2996_v36 = vand.u32 2147483647, %v6376_v53  ;;  %v2640_v12 = vadd.f32 %v2639_v32, %v6284_v29 }
 0xcfd   : > { %v2999_v41 = vor.u32 1.1754944e-38, %v2998_v34 }
 0xcfe   : > { %v2853_v57 = vmul.f32 %v5357_v22, %v2852_v1  ;;  %vm2997_vm10 = vcmp.eq.f32.partialorder %v2996_v36, 8.507059e+37 }
 0xd00   : > { %v2854_v8 = vadd.f32 %v5357_v22, %v2853_v57  ;;  %v6400_v57 = vld [vmem:[#allocation5 + $0x58] sm:$0xff] }
 0xd01   : > { %v5359_v17 = vpop.eup %5358  ;;  %2908 = vmatpush.bf16.msrb.mxu1 %v6400_v57 }
 0xd02   : > { %v2858_v58 = vsel %vm2857_vm12, %v5357_v22, %v2854_v8  ;;  %v2986_v43 = vpop.xlane.xlu2 %2985  ;;  %v2988_v52 = vmul.f32 %v5359_v17, %v6376_v53  ;;  %vm2993_vm4 = vweird.f32 %v5359_v17  ;;  %v6412_v8 = vld [vmem:[#allocation5 + $0x48] sm:$0xff] }
 0xd03   : > { %5360 = vrcp.f32 %v2986_v43  ;;  %v2863_v0 = vsel %vm2860_vm15, %v2862_v19, %v2858_v58  ;;  %vm3007_vm5 = vweird.f32 %v2986_v43  ;;  %v3011_v27 = vand.u32 2147483647, %v2986_v43  ;;  %vm2994_vm8 = vmor %vm2992_vm7, %vm2993_vm4  ;;  %2937 = vmatpush.bf16.msra.mxu2 %v6412_v8 }
 0xd04   : > { %v2864_v30 = vmul.f32 %v6353_v21, %v2863_v0  ;;  %v2989_v9 = vsub.f32 1.0, %v2988_v52  ;;  %v3013_v21 = vand.u32 2147483648, %v2986_v43  ;;  %v3197_v19 = vpack.c.bf16 %v2640_v12, %v2640_v12 }
 0xd05   : > { %vm3012_vm9 = vcmp.eq.f32.partialorder %v3011_v27, 8.507059e+37  ;;  %2909 = vmatpush.bf16.msrb.mxu1 %v6403_v33 }
 0xd06   : > { %v2865_v20 = vpack.c.bf16 %v2864_v30, %v2849_v61  ;;  %v2990_v31 = vmul.f32 %v5359_v17, %v2989_v9  ;;  %v3208_v52 = vunpack.c.l.b16 %v3197_v19 }
 0xd08   : > { %v2991_v25 = vadd.f32 %v5359_v17, %v2990_v31 }
 0xd09   : > { %v5361_v35 = vpop.eup %5360 }
 0xd0a   : > { %v3003_v51 = vmul.f32 %v5361_v35, %v2986_v43  ;;  %v2867_v7 = vpop.permute.xlu1 %2866  ;;  %v2722_v11 = vpop.xlane.xlu2 %2721  ;;  %vm3008_vm1 = vweird.f32 %v5361_v35  ;;  %v2995_v26 = vsel %vm2994_vm8, %v5359_v17, %v2991_v25  ;;  %v6416_v17 = vld [vmem:[#allocation5 + $0x40] sm:$0xff] }
 0xd0b   : > { %v2726_v45 = vsub.f32 %v2715_v37, %v2722_v11  ;;  %2879 = vmatpush.bf16.msra.mxu0 %v2867_v7  ;;  %vm3009_vm6 = vmor %vm3007_vm5, %vm3008_vm1  ;;  %v3014_v37 = vor.u32 1.1754944e-38, %v3013_v21  ;;  %v3000_v22 = vsel %vm2997_vm10, %v2999_v41, %v2995_v26  ;;  %2938 = vmatpush.bf16.msra.mxu2 %v6416_v17 }
 0xd0c   : > { %v3004_v15 = vsub.f32 1.0, %v3003_v51  ;;  %v3001_v53 = vmul.f32 %v6357_v62, %v3000_v22  ;;  %v6409_v62 = vld [vmem:[#allocation5 + $0x60] sm:$0xff] }
 0xd0d   : > { %v2728_v16 = vmul.f32 1.442695, %v2726_v45  ;;  %v3019_v18 = vpop.permute.xlu0 %3018 }
 0xd0e   : > { %v3005_v23 = vmul.f32 %v5361_v35, %v3004_v15  ;;  %4822 = vmatmul.msk.bf16.vlgmr.msra.gmra.mxu0 %vm932_vm3, %v2865_v20 }
 0xd0f   : > { %5362 = vpow2.f32 %v2728_v16  ;;  %3031 = vmatpush.bf16.msrb.mxu0 %v3019_v18 }
 0xd10   : > { %v3006_v14 = vadd.f32 %v5361_v35, %v3005_v23 }
 0xd12   : > { %v3010_v48 = vsel %vm3009_vm6, %v5361_v35, %v3006_v14  ;;  %v2725_v42 = vpop.xlane.xlu2 %2724 }
 0xd13   : > { %v2727_v38 = vsub.f32 %v6368_v50, %v2725_v42  ;;  %v3015_v24 = vsel %vm3012_vm9, %v3014_v37, %v3010_v48 }
 0xd14   : > { %v3016_v3 = vmul.f32 %v6361_v44, %v3015_v24  ;;  %v6405_v44 = vld [vmem:[#allocation5 + $0x68] sm:$0xff]  ;;  %v3073_v24 = vpop.permute.xlu1 %3072 }
 0xd15   : > { %v6387_v40 = vpop.eup %5362  ;;  %v2730_v6 = vmul.f32 1.442695, %v2727_v38  ;;  %3060 = vmatpush.bf16.msra.mxu1 %v6405_v44 }
 0xd16   : > { %v2732_v49 = vsel %vm932_vm3, %v6387_v40, 0.0  ;;  %v3017_v59 = vpack.c.bf16 %v3016_v3, %v3001_v53 }
 0xd17   : > { %5364 = vpow2.f32 %v2730_v6  ;;  %2733 = vadd.xlane.f32.xlu2 %v2732_v49  ;;  %v3078_v49 = vsel %vm911_vm2, %v3073_v24, 0 }
 0xd19   : > { %3061 = vmatpush.bf16.msra.mxu1 %v6409_v62 }
 0xd1d   : > { %v6393_v50 = vpop.eup %5364 }
 0xd1e   : > { %4842 = vmatmul.msk.bf16.vlgmr.msrb.gmra.mxu0 %vm932_vm3, %v3017_v59  ;;  %v2735_v1 = vsel %vm932_vm3, %v6393_v50, 0.0 }
 0xd1f   : > { %2736 = vadd.xlane.f32.xlu0 %v2735_v1 }
 0xd2f   : > { %3070 = vrot.lane.b32.xlu2 %v6306_v2, %s5666_s23  ;;  %v2641_v2 = vpop.f32.mrf.mxu0 }
 0xd30   : > { %v2642_v63 = vadd.f32 %v2641_v2, %v6284_v29 }
 0xd32   : > { %v3198_v10 = vpack.c.bf16 %v2642_v63, %v2642_v63 }
 0xd34   : > { %v3209_v39 = vunpack.c.l.b16 %v3198_v10 }
 0xd36   : > { %v6420_v0 = vpack.c.b16 %v3209_v39, %v3208_v52 }
 0xd38   : > { %v3215_v29 = vsel %vm911_vm2, %v6420_v0, 0 }
 0xd8a   : > { %v2734_v58 = vpop.xlane.xlu2 %2733 }
 0xd8b   : > { %5366 = vrcp.f32 %v2734_v58  ;;  %v2881_v43 = vpop.f32.mrf.mxu0  ;;  %v2749_v20 = vand.u32 2147483648, %v2734_v58  ;;  %vm2743_vm12 = vweird.f32 %v2734_v58  ;;  %v2747_v15 = vand.u32 2147483647, %v2734_v58 }
 0xd8d   : > { %v2750_v14 = vor.u32 1.1754944e-38, %v2749_v20  ;;  %vm2748_vm15 = vcmp.eq.f32.partialorder %v2747_v15, 8.507059e+37 }
 0xd91   : > { %v5367_v5 = vpop.eup %5366 }
 0xd92   : > { %v2739_v28 = vmul.f32 %v5367_v5, %v2734_v58  ;;  %v2737_v30 = vpop.xlane.xlu0 %2736  ;;  %vm2744_vm11 = vweird.f32 %v5367_v5  ;;  %v3071_v39 = vpop.permute.xlu2 %3070 }
 0xd93   : > { %5368 = vrcp.f32 %v2737_v30  ;;  %v2883_v9 = vpop.f32.mrf.mxu0  ;;  %vm2745_vm13 = vmor %vm2743_vm12, %vm2744_vm11  ;;  %v2764_v18 = vand.u32 2147483648, %v2737_v30  ;;  %v2762_v25 = vand.u32 2147483647, %v2737_v30  ;;  %vm2758_vm0 = vweird.f32 %v2737_v30 }
 0xd94   : > { %v2740_v35 = vsub.f32 1.0, %v2739_v28  ;;  %v2886_v61 = vpack.c.bf16 %v2883_v9, %v2881_v43 }
 0xd95   : > { %v2765_v36 = vor.u32 1.1754944e-38, %v2764_v18  ;;  %vm2763_vm4 = vcmp.eq.f32.partialorder %v2762_v25, 8.507059e+37 }
 0xd96   : > { %v2741_v51 = vmul.f32 %v5367_v5, %v2740_v35  ;;  %4831 = vmatmul.msk.bf16.vlgmr.msrb.gmra.mxu1 %vm911_vm2, %v2886_v61 }
 0xd97   : > { %3224 = vmatpush.bf16.xpose.msrb.mxu1 %v3215_v29 }
 0xd98   : > { %v2742_v11 = vadd.f32 %v5367_v5, %v2741_v51 }
 0xd99   : > { %v5369_v7 = vpop.eup %5368 }
 0xd9a   : > { %v2754_v45 = vmul.f32 %v5369_v7, %v2737_v30  ;;  %v2746_v23 = vsel %vm2745_vm13, %v5367_v5, %v2742_v11  ;;  %vm2759_vm14 = vweird.f32 %v5369_v7 }
 0xd9b   : > { %v3033_v31 = vpop.f32.mrf.mxu0  ;;  %v2751_v34 = vsel %vm2748_vm15, %v2750_v14, %v2746_v23  ;;  %vm2760_vm1 = vmor %vm2758_vm0, %vm2759_vm14 }
 0xd9c   : > { %v2755_v16 = vsub.f32 1.0, %v2754_v45  ;;  %v2752_v38 = vmul.f32 %v6387_v40, %v2751_v34  ;;  %v2658_v40 = vpop.f32.mrf.mxu1 }
 0xd9d   : > { %v2659_v1 = vadd.f32 %v2658_v40, %v6296_v46 }
 0xd9e   : > { %v2756_v21 = vmul.f32 %v5369_v7, %v2755_v16 }
 0xd9f   : > { %v3199_v2 = vpack.c.bf16 %v2659_v1, %v2659_v1 }
 0xda0   : > { %v2757_v27 = vadd.f32 %v5369_v7, %v2756_v21 }
 0xda1   : > { %v3282_v63 = vunpack.c.l.b16 %v3199_v2 }
 0xda2   : > { %v2761_v48 = vsel %vm2760_vm1, %v5369_v7, %v2757_v27 }
 0xda3   : > { %v2766_v42 = vsel %vm2763_vm4, %v2765_v36, %v2761_v48  ;;  %v3035_v37 = vpop.f32.mrf.mxu0 }
 0xda4   : > { %v2767_v26 = vmul.f32 %v6393_v50, %v2766_v42  ;;  %v3038_v41 = vpack.c.bf16 %v3035_v37, %v3033_v31  ;;  %v2660_v22 = vpop.f32.mrf.mxu1 }
 0xda5   : > { %v2661_v50 = vadd.f32 %v2660_v22, %v6296_v46 }
 0xda6   : > { %4851 = vmatmul.msk.bf16.vlgmr.msra.gmra.mxu1 %vm911_vm2, %v3038_v41  ;;  %v2768_v6 = vpack.c.bf16 %v2767_v26, %v2752_v38 }
 0xda7   : > { %3407 = vmatpush.bf16.msra.mxu1 %v6400_v57  ;;  %v3200_v32 = vpack.c.bf16 %v2661_v50, %v2661_v50 }
 0xda8   : > { %4820 = vmatmul.msk.bf16.vlgmr.msrb.gmra.mxu2 %vm932_vm3, %v2768_v6 }
 0xda9   : > { %3087 = vmatpush.bf16.xpose.msrb.mxu2 %v3078_v49 }
 0xdab   : > { %3408 = vmatpush.bf16.msra.mxu1 %v6403_v33 }
 0xdb6   : > { %4863 = vmatmul.msk.bf16.vlgmr.msrb.gmra.mxu1 %vm911_vm2, %v6343_v47 }
 0xdb7   : > { %3535 = vmatpush.bf16.msrb.mxu1 %v6405_v44  ;;  %v3283_v44 = vunpack.c.l.b16 %v3200_v32 }
 0xdb9   : > { %v6447_v43 = vpack.c.b16 %v3283_v44, %v3282_v63 }
 0xdbb   : > { %3536 = vmatpush.bf16.msrb.mxu1 %v6409_v62 }
 0xe13   : > { %v6436_v3 = vpop.f32.mrf.mxu1 }
 0xe1b   : > { %v6438_v53 = vpop.f32.mrf.mxu1 }
 0xe23   : > { %v6440_v59 = vpop.f32.mrf.mxu1 }
 0xe2b   : > { %v2787_v57 = vpop.f32.mrf.mxu2  ;;  %v6444_v33 = vpop.f32.mrf.mxu1 }
 0xe33   : > { %v2789_v62 = vpop.f32.mrf.mxu2  ;;  %v3226_v12 = vpop.f32.mrf.mxu1 }
 0xe34   : > { %v2792_v10 = vpack.c.bf16 %v2789_v62, %v2787_v57  ;;  %v3231_v58 = vsel %vm932_vm3, %v3226_v12, -inf }
 0xe35   : > { %3232 = vmax.xlane.f32.xlu1 %v3231_v58 }
 0xe36   : > { %4840 = vmatmul.msk.bf16.vlgmr.msra.gmra.mxu2 %vm911_vm2, %v2792_v10 }
 0xe37   : > { %3296 = vmatpush.bf16.msra.mxu2 %v6447_v43 }
 0xe3b   : > { %v3228_v46 = vpop.f32.mrf.mxu1 }
 0xe3c   : > { %v3234_v19 = vsel %vm932_vm3, %v3228_v46, -inf }
 0xe3d   : > { %3235 = vmax.xlane.f32.xlu2 %v3234_v19 }
 0xe46   : > { %4852 = vmatmul.msk.bf16.vlgmr.msrb.gmra.mxu2 %vm911_vm2, %v3071_v39 }
 0xe47   : > { %3424 = vmatpush.bf16.msrb.mxu2 %v6412_v8 }
 0xe4b   : > { %3425 = vmatpush.bf16.msrb.mxu2 %v6416_v17 }
 0xe55   : > { %3306 = vrot.lane.b32.xlu2 %v6420_v0, %s5665_s28 }
 0xe5d   : > { %3545 = vrot.lane.b32.xlu2 %v6343_v47, %s5666_s23 }
 0xea8   : > { %v3233_v52 = vpop.xlane.xlu1 %3232 }
 0xea9   : > { %v3237_v5 = vsub.f32 %v3226_v12, %v3233_v52 }
 0xeab   : > { %v3239_v28 = vmul.f32 1.442695, %v3237_v5 }
 0xead   : > { %5370 = vpow2.f32 %v3239_v28 }
 0xeb0   : > { %v3236_v30 = vpop.xlane.xlu2 %3235 }
 0xeb1   : > { %v3238_v9 = vsub.f32 %v3228_v46, %v3236_v30 }
 0xeb3   : > { %v5371_v35 = vpop.eup %5370  ;;  %v3241_v61 = vmul.f32 1.442695, %v3238_v9 }
 0xeb4   : > { %v3243_v51 = vsel %vm932_vm3, %v5371_v35, 0.0 }
 0xeb5   : > { %5372 = vpow2.f32 %v3241_v61  ;;  %3244 = vadd.xlane.f32.xlu0 %v3243_v51 }
 0xeb9   : > { %v6460_v8 = vpop.f32.mrf.mxu2 }
 0xebb   : > { %v5373_v17 = vpop.eup %5372 }
 0xebc   : > { %v3246_v29 = vsel %vm932_vm3, %v5373_v17, 0.0 }
 0xebd   : > { %3247 = vadd.xlane.f32.xlu0 %v3246_v29 }
 0xec1   : > { %v6463_v7 = vpop.f32.mrf.mxu2 }
 0xec9   : > { %v3089_v11 = vpop.f32.mrf.mxu2 }
 0xeca   : > { %v3094_v45 = vsel %vm932_vm3, %v3089_v11, -inf }
 0xecb   : > { %3095 = vmax.xlane.f32.xlu1 %v3094_v45 }
 0xed1   : > { %v3091_v20 = vpop.f32.mrf.mxu2 }
 0xed2   : > { %v3097_v31 = vsel %vm932_vm3, %v3091_v20, -inf }
 0xed3   : > { %3098 = vmax.xlane.f32.xlu0 %v3097_v31 }
 0xf28   : > { %v3245_v15 = vpop.xlane.xlu0 %3244 }
 0xf29   : > { %5374 = vrcp.f32 %v3245_v15  ;;  %v3260_v36 = vand.u32 2147483648, %v3245_v15  ;;  %vm3254_vm6 = vweird.f32 %v3245_v15  ;;  %v3258_v48 = vand.u32 2147483647, %v3245_v15 }
 0xf2b   : > { %v3261_v24 = vor.u32 1.1754944e-38, %v3260_v36  ;;  %vm3259_vm9 = vcmp.eq.f32.partialorder %v3258_v48, 8.507059e+37 }
 0xf2f   : > { %v5375_v16 = vpop.eup %5374 }
 0xf30   : > { %v3250_v18 = vmul.f32 %v5375_v16, %v3245_v15  ;;  %v3248_v23 = vpop.xlane.xlu0 %3247  ;;  %vm3255_vm5 = vweird.f32 %v5375_v16 }
 0xf31   : > { %5376 = vrcp.f32 %v3248_v23  ;;  %vm3256_vm7 = vmor %vm3254_vm6, %vm3255_vm5  ;;  %v3275_v37 = vand.u32 2147483648, %v3248_v23  ;;  %v3273_v41 = vand.u32 2147483647, %v3248_v23  ;;  %vm3269_vm10 = vweird.f32 %v3248_v23 }
 0xf32   : > { %v3251_v21 = vsub.f32 1.0, %v3250_v18 }
 0xf33   : > { %v3276_v22 = vor.u32 1.1754944e-38, %v3275_v37  ;;  %vm3274_vm12 = vcmp.eq.f32.partialorder %v3273_v41, 8.507059e+37 }
 0xf34   : > { %v3252_v25 = vmul.f32 %v5375_v16, %v3251_v21 }
 0xf36   : > { %v3253_v27 = vadd.f32 %v5375_v16, %v3252_v25 }
 0xf37   : > { %v5377_v14 = vpop.eup %5376 }
 0xf38   : > { %v3265_v34 = vmul.f32 %v5377_v14, %v3248_v23  ;;  %v3257_v38 = vsel %vm3256_vm7, %v5375_v16, %v3253_v27  ;;  %vm3270_vm8 = vweird.f32 %v5377_v14  ;;  %v3307_v23 = vpop.permute.xlu2 %3306 }
 0xf39   : > { %v3262_v40 = vsel %vm3259_vm9, %v3261_v24, %v3257_v38  ;;  %vm3271_vm11 = vmor %vm3269_vm10, %vm3270_vm8  ;;  %v3312_v36 = vsel %vm911_vm2, %v3307_v23, 0 }
 0xf3a   : > { %v3266_v42 = vsub.f32 1.0, %v3265_v34  ;;  %v3263_v2 = vmul.f32 %v5371_v35, %v3262_v40 }
 0xf3c   : > { %v3267_v26 = vmul.f32 %v5377_v14, %v3266_v42 }
 0xf3e   : > { %v3268_v6 = vadd.f32 %v5377_v14, %v3267_v26  ;;  %v3096_v49 = vpop.xlane.xlu1 %3095 }
 0xf3f   : > { %v3100_v50 = vsub.f32 %v3089_v11, %v3096_v49 }
 0xf40   : > { %v3272_v1 = vsel %vm3271_vm11, %v5377_v14, %v3268_v6  ;;  %v3546_v40 = vpop.permute.xlu2 %3545 }
 0xf41   : > { %v3277_v57 = vsel %vm3274_vm12, %v3276_v22, %v3272_v1  ;;  %v3102_v32 = vmul.f32 1.442695, %v3100_v50  ;;  %v6488_v50 = vld [vmem:[#allocation5 + $0x78] sm:$0xff]  ;;  %v6491_v1 = vld [vmem:[#allocation5 + $0x70] sm:$0xff] }
 0xf42   : > { %v3278_v44 = vmul.f32 %v5373_v17, %v3277_v57  ;;  %3185 = vmatpush.bf16.msra.mxu0 %v6488_v50 }
 0xf43   : > { %5378 = vpow2.f32 %v3102_v32 }
 0xf44   : > { %v3279_v63 = vpack.c.bf16 %v3278_v44, %v3263_v2 }
 0xf46   : > { %4864 = vmatmul.msk.bf16.vlgmr.msra.gmra.mxu2 %vm932_vm3, %v3279_v63  ;;  %v3099_v62 = vpop.xlane.xlu0 %3098  ;;  %3186 = vmatpush.bf16.msra.mxu0 %v6491_v1 }
 0xf47   : > { %v3101_v12 = vsub.f32 %v3091_v20, %v3099_v62 }
 0xf49   : > { %v5379_v10 = vpop.eup %5378  ;;  %v3104_v58 = vmul.f32 1.442695, %v3101_v12 }
 0xf4a   : > { %v3106_v46 = vsel %vm932_vm3, %v5379_v10, 0.0 }
 0xf4b   : > { %5380 = vpow2.f32 %v3104_v58  ;;  %3107 = vadd.xlane.f32.xlu1 %v3106_v46 }
 0xf51   : > { %v5381_v19 = vpop.eup %5380 }
 0xf52   : > { %v3109_v39 = vsel %vm932_vm3, %v5381_v19, 0.0 }
 0xf53   : > { %3110 = vadd.xlane.f32.xlu0 %v3109_v39 }
 0xf64   : > { %3143 = vrot.lane.b32.xlu1 %v6308_v4, %s5666_s23 }
 0xf67   : > { %3304 = vrot.lane.b32.xlu0 %v6343_v47, %s5665_s28 }
 0xf6c   : > { %3547 = vrot.lane.b32.xlu1 %v6420_v0, %s5666_s23 }
 0xf6f   : > { %3434 = vrot.lane.b32.xlu0 %v6420_v0, %s5664_s20 }
 0xf74   : > { %3432 = vrot.lane.b32.xlu1 %v6343_v47, %s5664_s20 }
 0xfbe   : > { %v3108_v52 = vpop.xlane.xlu1 %3107 }
 0xfbf   : > { %5382 = vrcp.f32 %v3108_v52  ;;  %v3123_v29 = vand.u32 2147483648, %v3108_v52  ;;  %vm3117_vm14 = vweird.f32 %v3108_v52  ;;  %v3121_v11 = vand.u32 2147483647, %v3108_v52 }
 0xfc1   : > { %v3124_v18 = vor.u32 1.1754944e-38, %v3123_v29  ;;  %vm3122_vm1 = vcmp.eq.f32.partialorder %v3121_v11, 8.507059e+37 }
 0xfc5   : > { %v5383_v5 = vpop.eup %5382 }
 0xfc6   : > { %v3113_v28 = vmul.f32 %v5383_v5, %v3108_v52  ;;  %v3111_v30 = vpop.xlane.xlu0 %3110  ;;  %vm3118_vm13 = vweird.f32 %v5383_v5 }
 0xfc7   : > { %5384 = vrcp.f32 %v3111_v30  ;;  %vm3119_vm15 = vmor %vm3117_vm14, %vm3118_vm13  ;;  %v3136_v45 = vand.u32 2147483647, %v3111_v30  ;;  %v3138_v47 = vand.u32 2147483648, %v3111_v30  ;;  %vm3132_vm4 = vweird.f32 %v3111_v30 }
 0xfc8   : > { %v3114_v9 = vsub.f32 1.0, %v3113_v28 }
 0xfc9   : > { %v3298_v4 = vpop.f32.mrf.mxu2  ;;  %v3139_v14 = vor.u32 1.1754944e-38, %v3138_v47  ;;  %vm3137_vm6 = vcmp.eq.f32.partialorder %v3136_v45, 8.507059e+37 }
 0xfca   : > { %v3115_v35 = vmul.f32 %v5383_v5, %v3114_v9 }
 0xfcc   : > { %v3116_v51 = vadd.f32 %v5383_v5, %v3115_v35 }
 0xfcd   : > { %v5385_v61 = vpop.eup %5384 }
 0xfce   : > { %v3128_v17 = vmul.f32 %v5385_v61, %v3111_v30  ;;  %v3120_v31 = vsel %vm3119_vm15, %v5383_v5, %v3116_v51  ;;  %vm3133_vm0 = vweird.f32 %v5385_v61 }
 0xfcf   : > { %v3125_v25 = vsel %vm3122_vm1, %v3124_v18, %v3120_v31  ;;  %vm3134_vm5 = vmor %vm3132_vm4, %vm3133_vm0 }
 0xfd0   : > { %v3129_v0 = vsub.f32 1.0, %v3128_v17  ;;  %v3126_v42 = vmul.f32 %v5379_v10, %v3125_v25 }
 0xfd1   : > { %v3300_v20 = vpop.f32.mrf.mxu2 }
 0xfd2   : > { %v3130_v15 = vmul.f32 %v5385_v61, %v3129_v0  ;;  %v3303_v16 = vpack.c.bf16 %v3300_v20, %v3298_v4 }
 0xfd4   : > { %v3131_v21 = vadd.f32 %v5385_v61, %v3130_v15  ;;  %4868 = vmatmul.msk.bf16.vlgmr.msrb.gmra.mxu2 %vm911_vm2, %v3303_v16 }
 0xfd6   : > { %v3135_v27 = vsel %vm3134_vm5, %v5385_v61, %v3131_v21  ;;  %v3144_v34 = vpop.permute.xlu1 %3143 }
 0xfd7   : > { %v3140_v48 = vsel %vm3137_vm6, %v3139_v14, %v3135_v27  ;;  %3156 = vmatpush.bf16.msra.mxu3 %v3144_v34 }
 0xfd8   : > { %v3141_v37 = vmul.f32 %v5381_v19, %v3140_v48 }
 0xfd9   : > { %v3305_v38 = vpop.permute.xlu0 %3304 }
 0xfda   : > { %v3142_v26 = vpack.c.bf16 %v3141_v37, %v3126_v42 }
 0xfdb   : > { %3321 = vmatpush.bf16.xpose.msrb.mxu3 %v3312_v36 }
 0xfdc   : > { %4853 = vmatmul.msk.bf16.vlgmr.msra.gmra.mxu3 %vm932_vm3, %v3142_v26 }
 0xfde   : > { %v3548_v41 = vpop.permute.xlu1 %3547 }
 0xfdf   : > { %v3553_v24 = vsel %vm911_vm2, %v3548_v41, 0 }
 0xfe0   : > { %3562 = vmatpush.bf16.xpose.msra.mxu2 %v3553_v24 }
 0xfe1   : > { %v3435_v6 = vpop.permute.xlu0 %3434 }
 0xfe2   : > { %v3440_v49 = vsel %vm911_vm2, %v3435_v6, 0 }
 0xfe3   : > { %3449 = vmatpush.bf16.xpose.msra.mxu3 %v3440_v49 }
 0xfe6   : > { %v3433_v22 = vpop.permute.xlu1 %3432 }
 0xfe7   : > { %4872 = vmatmul.msk.bf16.vlgmr.msra.gmra.mxu2 %vm911_vm2, %v3546_v40  ;;  %v2941_v40 = vadd.f32 %v6460_v8, %v6436_v3 }
 0xfec   : > { %4865 = vmatmul.msk.bf16.vlgmr.msrb.gmra.mxu3 %vm911_vm2, %v3305_v38 }
 0xffc   : > { %4869 = vmatmul.msk.bf16.vlgmr.msra.gmra.mxu3 %vm911_vm2, %v3433_v22  ;;  %v2943_v22 = vadd.f32 %v6463_v7, %v6438_v53 }
0x1057   : > { %v6494_v57 = vpop.f32.mrf.mxu2 }
0x105f   : > { %v3158_v32 = vpop.f32.mrf.mxu3  ;;  %v6496_v2 = vpop.f32.mrf.mxu2 }
0x1067   : > { %v3160_v44 = vpop.f32.mrf.mxu3 }
0x1068   : > { %v3163_v63 = vpack.c.bf16 %v3160_v44, %v3158_v32  ;;  %v3068_v32 = vadd.f32 %v6440_v59, %v2941_v40 }
0x106a   : > { %4862 = vmatmul.msk.bf16.vlgmr.msra.gmra.mxu0 %vm911_vm2, %v3163_v63  ;;  %v3564_v62 = vpop.f32.mrf.mxu2  ;;  %v6543_v63 = vld [vmem:[%s6801_s6 + $0x1] ss:$0 sm:$0xff] }
0x106b   : > { %v3569_v12 = vsel %vm932_vm3, %v3564_v62, -inf }
0x106c   : > { %3570 = vmax.xlane.f32.xlu1 %v3569_v12  ;;  %v3069_v12 = vadd.f32 %v6444_v33, %v2943_v22 }
0x106f   : > { %v3323_v10 = vpop.f32.mrf.mxu3 }
0x1070   : > { %v3328_v58 = vsel %vm932_vm3, %v3323_v10, -inf }
0x1071   : > { %3329 = vmax.xlane.f32.xlu0 %v3328_v58 }
0x1072   : > { %v3566_v46 = vpop.f32.mrf.mxu2 }
0x1073   : > { %v3572_v52 = vsel %vm932_vm3, %v3566_v46, -inf }
0x1077   : > { %v3325_v19 = vpop.f32.mrf.mxu3 }
0x1078   : > { %v3331_v39 = vsel %vm932_vm3, %v3325_v19, -inf }
0x1079   : > { %3332 = vmax.xlane.f32.xlu2 %v3331_v39  ;;  %3573 = vmax.xlane.f32.xlu0 %v3572_v52 }
0x107f   : > { %v3451_v5 = vpop.f32.mrf.mxu3 }
0x1080   : > { %v3456_v28 = vsel %vm932_vm3, %v3451_v5, -inf }
0x1081   : > { %3457 = vmax.xlane.f32.xlu2 %v3456_v28 }
0x1087   : > { %v3453_v30 = vpop.f32.mrf.mxu3 }
0x1088   : > { %v3459_v9 = vsel %vm932_vm3, %v3453_v30, -inf }
0x1089   : > { %3460 = vmax.xlane.f32.xlu1 %v3459_v9 }
0x10df   : > { %v3571_v31 = vpop.xlane.xlu1 %3570 }
0x10e0   : > { %v3575_v48 = vsub.f32 %v3564_v62, %v3571_v31 }
0x10e2   : > { %v3577_v38 = vmul.f32 1.442695, %v3575_v48 }
0x10e4   : > { %v3330_v4 = vpop.xlane.xlu0 %3329 }
0x10e5   : > { %v3334_v35 = vsub.f32 %v3323_v10, %v3330_v4 }
0x10e7   : > { %v3336_v61 = vmul.f32 1.442695, %v3334_v35  ;;  %v3188_v49 = vpop.f32.mrf.mxu0 }
0x10e8   : > { %v3193_v44 = vadd.f32 %v3188_v49, %v3068_v32 }
0x10e9   : > { %5386 = vpow2.f32 %v3336_v61 }
0x10ea   : > { %v3663_v10 = vadd.f32 %v6543_v63, %v3193_v44 }
0x10ec   : > { %v3574_v51 = vpop.xlane.xlu0 %3573  ;;  %v3333_v17 = vpop.xlane.xlu2 %3332 }
0x10ed   : > { %v3576_v29 = vsub.f32 %v3566_v46, %v3574_v51  ;;  %v3335_v11 = vsub.f32 %v3325_v19, %v3333_v17 }
0x10ef   : > { %v6505_v0 = vpop.eup %5386  ;;  %v3579_v45 = vmul.f32 1.442695, %v3576_v29  ;;  %v3338_v47 = vmul.f32 1.442695, %v3335_v11  ;;  %v3190_v62 = vpop.f32.mrf.mxu0 }
0x10f0   : > { %v3340_v20 = vsel %vm932_vm3, %v6505_v0, 0.0  ;;  %v3194_v3 = vadd.f32 %v3190_v62, %v3069_v12 }
0x10f1   : > { %5388 = vpow2.f32 %v3579_v45  ;;  %3341 = vadd.xlane.f32.xlu0 %v3340_v20 }
0x10f2   : > { %5390 = vpow2.f32 %v3338_v47  ;;  %v3664_v8 = vadd.f32 %v6543_v63, %v3194_v3 }
0x10f4   : > { %v3458_v15 = vpop.xlane.xlu2 %3457  ;;  %v6553_v53 = vadd.f32 %v3664_v8, %v6269_v55 }
0x10f5   : > { %v3462_v16 = vsub.f32 %v3451_v5, %v3458_v15 }
0x10f6   : > { %v3688_v59 = vmul.f32 %v6553_v53, %v6553_v53 }
0x10f7   : > { %v6509_v18 = vpop.eup %5388  ;;  %v3464_v23 = vmul.f32 1.442695, %v3462_v16 }
0x10f8   : > { %v6511_v21 = vpop.eup %5390  ;;  %v3584_v25 = vsel %vm932_vm3, %v6509_v18, 0.0 }
0x10f9   : > { %5392 = vpow2.f32 %v3464_v23  ;;  %3585 = vadd.xlane.f32.xlu0 %v3584_v25  ;;  %v3343_v14 = vsel %vm932_vm3, %v6511_v21, 0.0 }
0x10fa   : > { %3344 = vadd.xlane.f32.xlu2 %v3343_v14 }
0x10fc   : > { %v3461_v27 = vpop.xlane.xlu1 %3460 }
0x10fd   : > { %v3463_v34 = vsub.f32 %v3453_v30, %v3461_v27 }
0x10ff   : > { %v6517_v36 = vpop.eup %5392  ;;  %v3466_v42 = vmul.f32 1.442695, %v3463_v34 }
0x1100   : > { %v3468_v37 = vsel %vm932_vm3, %v6517_v36, 0.0 }
0x1101   : > { %5394 = vpow2.f32 %v3466_v42 }
0x1102   : > { %3469 = vadd.xlane.f32.xlu2 %v3468_v37  ;;  %5396 = vpow2.f32 %v3577_v38 }
0x1107   : > { %v6521_v26 = vpop.eup %5394 }
0x1108   : > { %v3471_v41 = vsel %vm932_vm3, %v6521_v26, 0.0  ;;  %v6525_v24 = vpop.eup %5396 }
0x1109   : > { %3472 = vadd.xlane.f32.xlu1 %v3471_v41  ;;  %v3581_v6 = vsel %vm932_vm3, %v6525_v24, 0.0 }
0x110d   : > { %3377 = vrot.lane.b32.xlu0 %v6447_v43, %s5665_s28  ;;  %s6707_s28 = scalar_lea.vmem [#allocation10], %s4433_s18  ;;  %s5566_s18 = scalar_lea.hbm %s6860_s5, 64 }
0x110e   : > { %s4266_s25 = sshll.u32 %s6707_s28, 4  ;;  %p5568_p4 = scmp.lt.s32.totalorder %s5566_s18, %s5562_s22  ;;  %s4267_s25 = int_to_ptr.vmem [resolvable:$true] %s4266_s25 }
0x1110   : > { %p5569_p7 = por %p5568_p4, %p5567_p3 }
0x1111   : > { %3582 = vadd.xlane.f32.xlu1 %v3581_v6 }
0x1112   : > { %p5570_p8 = pnand %p5569_p7, %p5565_p2 }
0x111a   : > { %3618 = vrot.lane.b32.xlu2 %v6447_v43, %s5666_s23 }
0x112a   : > { %3505 = vrot.lane.b32.xlu1 %v6447_v43, %s5664_s20  ;;  %v6549_v43 = vadd.f32 %v3663_v10, %v6266_v13 }
0x112c   : > { %v3687_v33 = vmul.f32 %v6549_v43, %v6549_v43 }
0x1137   : > { %3675 = vadd.xlane.f32.xlu0 %v6549_v43 }
0x113f   : > { %3693 = vadd.xlane.f32.xlu0 %v3688_v59 }
0x1143   : > { %3677 = vadd.xlane.f32.xlu2 %v6553_v53 }
0x1154   : > { %3691 = vadd.xlane.f32.xlu1 %v3687_v33 }
0x1164   : > { %v3342_v7 = vpop.xlane.xlu0 %3341 }
0x1165   : > { %5398 = vrcp.f32 %v3342_v7  ;;  %v3357_v9 = vand.u32 2147483648, %v3342_v7  ;;  %vm3351_vm8 = vweird.f32 %v3342_v7  ;;  %v3355_v4 = vand.u32 2147483647, %v3342_v7 }
0x1167   : > { %v3358_v11 = vor.u32 1.1754944e-38, %v3357_v9  ;;  %vm3356_vm11 = vcmp.eq.f32.partialorder %v3355_v4, 8.507059e+37 }
0x116b   : > { %v5399_v58 = vpop.eup %5398 }
0x116c   : > { %v3347_v13 = vmul.f32 %v5399_v58, %v3342_v7  ;;  %v6560_v55 = vpop.xlane.xlu0 %3585  ;;  %vm3352_vm7 = vweird.f32 %v5399_v58 }
0x116d   : > { %v3345_v46 = vpop.xlane.xlu2 %3344  ;;  %vm3353_vm9 = vmor %vm3351_vm8, %vm3352_vm7  ;;  %vm3607_vm0 = vweird.f32 %v6560_v55  ;;  %v3613_v3 = vand.u32 2147483648, %v6560_v55 }
0x116e   : > { %v3348_v19 = vsub.f32 1.0, %v3347_v13  ;;  %5400 = vrcp.f32 %v3345_v46  ;;  %v3372_v61 = vand.u32 2147483648, %v3345_v46  ;;  %v3370_v29 = vand.u32 2147483647, %v3345_v46 }
0x116f   : > { %5402 = vrcp.f32 %v6560_v55  ;;  %vm3366_vm12 = vweird.f32 %v3345_v46 }
0x1170   : > { %v3349_v39 = vmul.f32 %v5399_v58, %v3348_v19  ;;  %v3373_v31 = vor.u32 1.1754944e-38, %v3372_v61  ;;  %vm3371_vm14 = vcmp.eq.f32.partialorder %v3370_v29, 8.507059e+37 }
0x1172   : > { %v3350_v5 = vadd.f32 %v5399_v58, %v3349_v39 }
0x1174   : > { %v5401_v52 = vpop.eup %5400  ;;  %v3354_v51 = vsel %vm3353_vm9, %v5399_v58, %v3350_v5 }
0x1175   : > { %v3362_v28 = vmul.f32 %v5401_v52, %v3345_v46  ;;  %v6562_v30 = vpop.xlane.xlu2 %3469  ;;  %vm3367_vm10 = vweird.f32 %v5401_v52  ;;  %v5403_v47 = vpop.eup %5402  ;;  %v3359_v20 = vsel %vm3356_vm11, %v3358_v11, %v3354_v51 }
0x1176   : > { %vm3368_vm13 = vmor %vm3366_vm12, %vm3367_vm10  ;;  %5404 = vrcp.f32 %v6562_v30  ;;  %v3360_v14 = vmul.f32 %v6505_v0, %v3359_v20  ;;  %v3603_v27 = vmul.f32 %v5403_v47, %v6560_v55  ;;  %vm3608_vm15 = vweird.f32 %v5403_v47 }
0x1177   : > { %v3363_v35 = vsub.f32 1.0, %v3362_v28  ;;  %vm6578_vm1 = vmor %vm3607_vm0, %vm3608_vm15  ;;  %vm3479_vm11 = vweird.f32 %v6562_v30  ;;  %v3485_v61 = vand.u32 2147483648, %v6562_v30 }
0x1178   : > { %v3604_v38 = vsub.f32 1.0, %v3603_v27 }
0x1179   : > { %v3364_v17 = vmul.f32 %v5401_v52, %v3363_v35 }
0x117a   : > { %v3605_v22 = vmul.f32 %v5403_v47, %v3604_v38  ;;  %v5130_v38 = vld [vmem:[#allocation7 + $0xe4] sm:$0xf] }
0x117b   : > { %v3365_v45 = vadd.f32 %v5401_v52, %v3364_v17  ;;  %v3483_v17 = vand.u32 2147483647, %v6562_v30 }
0x117c   : > { %v6565_v15 = vpop.xlane.xlu1 %3472  ;;  %v5405_v37 = vpop.eup %5404  ;;  %v3606_v62 = vadd.f32 %v5403_v47, %v3605_v22 }
0x117d   : > { %v3369_v16 = vsel %vm3368_vm13, %v5401_v52, %v3365_v45  ;;  %v3619_v23 = vpop.permute.xlu2 %3618  ;;  %5406 = vrcp.f32 %v6565_v15  ;;  %v3475_v40 = vmul.f32 %v5405_v37, %v6562_v30  ;;  %vm3480_vm7 = vweird.f32 %v5405_v37 }
0x117e   : > { %v3374_v25 = vsel %vm3371_vm14, %v3373_v31, %v3369_v16  ;;  %3631 = vmatpush.bf16.msrb.mxu3 %v3619_v23  ;;  %v3610_v7 = vsel %vm6578_vm1, %v5403_v47, %v3606_v62  ;;  %vm3494_vm8 = vweird.f32 %v6565_v15  ;;  %v3500_v52 = vand.u32 2147483648, %v6565_v15  ;;  %vm3481_vm14 = vmor %vm3479_vm11, %vm3480_vm7 }
0x117f   : > { %v3375_v34 = vmul.f32 %v6511_v21, %v3374_v25  ;;  %v3378_v48 = vpop.permute.xlu0 %3377  ;;  %v3476_v32 = vsub.f32 1.0, %v3475_v40  ;;  %v3611_v21 = vand.u32 2147483647, %v6560_v55  ;;  %v3614_v55 = vor.u32 1.1754944e-38, %v3613_v3 }
0x1180   : > { %3390 = vmatpush.bf16.msrb.mxu0 %v3378_v48  ;;  %v3498_v9 = vand.u32 2147483647, %v6565_v15  ;;  %v3501_v45 = vor.u32 1.1754944e-38, %v3500_v52  ;;  %v3486_v16 = vor.u32 1.1754944e-38, %v3485_v61  ;;  %vm3484_vm0 = vcmp.eq.f32.partialorder %v3483_v17, 8.507059e+37 }
0x1181   : > { %v3376_v42 = vpack.c.bf16 %v3375_v34, %v3360_v14  ;;  %v3477_v59 = vmul.f32 %v5405_v37, %v3476_v32  ;;  %vm6584_vm4 = vcmp.eq.f32.partialorder %v3611_v21, 8.507059e+37  ;;  %v5124_v21 = vld [vmem:[#allocation7 + $0xb4] sm:$0xf]  ;;  %v4883_v52 = vld [vmem:[#allocation7 + $0x88] sm:$0xf0] }
0x1182   : > { %v3615_v35 = vsel %vm6584_vm4, %v3614_v55, %v3610_v7  ;;  %vm3499_vm15 = vcmp.eq.f32.partialorder %v3498_v9, 8.507059e+37  ;;  %v5118_v55 = vld [vmem:[#allocation7 + $0x84] sm:$0xf] }
0x1183   : > { %4866 = vmatmul.msk.bf16.vlgmr.msrb.gmra.mxu0 %vm932_vm3, %v3376_v42  ;;  %v5407_v41 = vpop.eup %5406  ;;  %v3478_v5 = vadd.f32 %v5405_v37, %v3477_v59  ;;  %v3616_v20 = vmul.f32 %v6509_v18, %v3615_v35  ;;  %v5132_v18 = vld [vmem:[#allocation7 + $0xf4] sm:$0xf]  ;;  %v5122_v59 = vld [vmem:[#allocation7 + $0xa4] sm:$0xf] }
0x1184   : > { %v3583_v6 = vpop.xlane.xlu1 %3582  ;;  %v3490_v49 = vmul.f32 %v5407_v41, %v6565_v15  ;;  %vm3495_vm5 = vweird.f32 %v5407_v41 }
0x1185   : > { %5408 = vrcp.f32 %v3583_v6  ;;  %v3598_v13 = vand.u32 2147483648, %v3583_v6  ;;  %v3596_v39 = vand.u32 2147483647, %v3583_v6  ;;  %vm6590_vm9 = vmor %vm3494_vm8, %vm3495_vm5  ;;  %vm3592_vm10 = vweird.f32 %v3583_v6 }
0x1186   : > { %v3491_v0 = vsub.f32 1.0, %v3490_v49  ;;  %v3482_v31 = vsel %vm3481_vm14, %v5405_v37, %v3478_v5  ;;  %v4886_v5 = vor.u32 %v5118_v55, %v4883_v52  ;;  %v4889_v52 = vld [vmem:[#allocation7 + $0x90] sm:$0xf] }
0x1187   : > { %v3599_v51 = vor.u32 1.1754944e-38, %v3598_v13  ;;  %vm3597_vm13 = vcmp.eq.f32.partialorder %v3596_v39, 8.507059e+37  ;;  %v3487_v30 = vsel %vm3484_vm0, %v3486_v16, %v3482_v31  ;;  %v5120_v13 = vld [vmem:[#allocation7 + $0x94] sm:$0xf] }
0x1188   : > { %v3492_v12 = vmul.f32 %v5407_v41, %v3491_v0  ;;  %v3488_v27 = vmul.f32 %v6517_v36, %v3487_v30  ;;  %v4923_v36 = vld [vmem:[#allocation7 + $0xd8] sm:$0xf0]  ;;  %v4915_v0 = vld [vmem:[#allocation7 + $0xc8] sm:$0xf0] }
0x118a   : > { %v3493_v46 = vadd.f32 %v5407_v41, %v3492_v12  ;;  %v4907_v12 = vld [vmem:[#allocation7 + $0xb8] sm:$0xf0] }
0x118b   : > { %v5409_v44 = vpop.eup %5408  ;;  %v4910_v3 = vor.u32 %v5124_v21, %v4907_v12  ;;  %v4913_v12 = vld [vmem:[#allocation7 + $0xc0] sm:$0xf] }
0x118c   : > { %v3588_v10 = vmul.f32 %v5409_v44, %v3583_v6  ;;  %vm3593_vm6 = vweird.f32 %v5409_v44  ;;  %v3497_v29 = vsel %vm6590_vm9, %v5407_v41, %v3493_v46  ;;  %v5128_v6 = vld [vmem:[#allocation7 + $0xd4] sm:$0xf]  ;;  %v4891_v46 = vld [vmem:[#allocation7 + $0x98] sm:$0xf0] }
0x118d   : > { %vm3594_vm12 = vmor %vm3592_vm10, %vm3593_vm6  ;;  %v3502_v23 = vsel %vm3499_vm15, %v3501_v45, %v3497_v29  ;;  %v4926_v49 = vor.u32 %v5128_v6, %v4923_v36  ;;  %v4937_v36 = vld [vmem:[#allocation7 + $0xf0] sm:$0xf] }
0x118e   : > { %v3589_v33 = vsub.f32 1.0, %v3588_v10  ;;  %v3503_v14 = vmul.f32 %v6521_v26, %v3502_v23  ;;  %v4931_v26 = vld [vmem:[#allocation7 + $0xe8] sm:$0xf0] }
0x118f   : > { %v4934_v41 = vor.u32 %v5130_v38, %v4931_v26 }
0x1190   : > { %v3590_v19 = vmul.f32 %v5409_v44, %v3589_v33  ;;  %v3504_v48 = vpack.c.bf16 %v3503_v14, %v3488_v27  ;;  %v4899_v33 = vld [vmem:[#allocation7 + $0xa8] sm:$0xf0]  ;;  %v6619_v27 = vld [vmem:[%s6802_s7 + $0x1] ss:$0 sm:$0xff] }
0x1191   : > { %v4902_v58 = vor.u32 %v5122_v59, %v4899_v33  ;;  %v5125_v59 = vld [vmem:[#allocation7 + $0xb4] sm:$0xf0] }
0x1192   : > { %v3591_v4 = vadd.f32 %v5409_v44, %v3590_v19  ;;  %v4894_v19 = vor.u32 %v5120_v13, %v4891_v46  ;;  %v5123_v13 = vld [vmem:[#allocation7 + $0xa4] sm:$0xf0]  ;;  %v5148_v46 = vld [vmem:[#allocation8 + $0xf0] sm:$0xff] }
0x1194   : > { %v3595_v11 = vsel %vm3594_vm12, %v5409_v44, %v3591_v4 }
0x1195   : > { %v3600_v47 = vsel %vm3597_vm13, %v3599_v51, %v3595_v11 }
0x1196   : > { %v3601_v15 = vmul.f32 %v6525_v24, %v3600_v47  ;;  %v4939_v24 = vld [vmem:[#allocation7 + $0xf8] sm:$0xf0] }
0x1197   : > { %v4942_v42 = vor.u32 %v5132_v18, %v4939_v24 }
0x1198   : > { %v3617_v25 = vpack.c.bf16 %v3616_v20, %v3601_v15 }
0x1199   : > { %3906 = vmatpush.bf16.msrb.mxu2 %v4942_v42  ;;  %v6625_v42 = vld [vmem:[%s6803_s8 + $0x1] ss:$0 sm:$0xff] }
0x119a   : > { %4873 = vmatmul.msk.bf16.vlgmr.msrb.gmra.mxu3 %vm932_vm3, %v3617_v25 }
0x119c   : > { %v3506_v34 = vpop.permute.xlu1 %3505 }
0x119d   : > { %3518 = vmatpush.bf16.msra.mxu0 %v3506_v34  ;;  %3907 = vmatpush.bf16.msrb.mxu2 %v4934_v41 }
0x11a0   : > { %4870 = vmatmul.msk.bf16.vlgmr.msra.gmra.mxu0 %vm932_vm3, %v3504_v48 }
0x11a1   : > { %3648 = vmatpush.bf16.msrb.mxu0 %v6488_v50  ;;  %3908 = vmatpush.bf16.msrb.mxu2 %v4926_v49  ;;  %v5126_v50 = vld [vmem:[#allocation7 + $0xc4] sm:$0xf]  ;;  %v5133_v49 = vld [vmem:[#allocation7 + $0xf4] sm:$0xf0] }
0x11a5   : > { %3649 = vmatpush.bf16.msrb.mxu0 %v6491_v1  ;;  %v4918_v1 = vor.u32 %v5126_v50, %v4915_v0  ;;  %v4929_v0 = vld [vmem:[#allocation7 + $0xe0] sm:$0xf] }
0x11a7   : > { %3909 = vmatpush.bf16.msrb.mxu2 %v4918_v1 }
0x11aa   : > { %v3676_v37 = vpop.xlane.xlu0 %3675 }
0x11ab   : > { %3910 = vmatpush.bf16.msrb.mxu2 %v4910_v3  ;;  %v3683_v39 = vmul.f32 %v3676_v37, %v6152_v60 }
0x11ad   : > { %v3703_v4 = vmul.f32 %v3683_v39, %v3683_v39  ;;  %v3715_v18 = vsub.f32 %v6549_v43, %v3683_v39 }
0x11af   : > { %3911 = vmatpush.bf16.msrb.mxu2 %v4902_v58  ;;  %v4897_v58 = vld [vmem:[#allocation7 + $0xa0] sm:$0xf] }
0x11b2   : > { %v3694_v40 = vpop.xlane.xlu0 %3693 }
0x11b3   : > { %v3700_v44 = vmul.f32 %v3694_v40, %v6152_v60  ;;  %3912 = vmatpush.bf16.msrb.mxu2 %v4894_v19  ;;  %v4898_v19 = vor.u32 %v5123_v13, %v4897_v58 }
0x11b6   : > { %v3678_v22 = vpop.xlane.xlu2 %3677 }
0x11b7   : > { %v3684_v32 = vmul.f32 %v3678_v22, %v6152_v60  ;;  %3913 = vmatpush.bf16.msrb.mxu2 %v4886_v5  ;;  %v4938_v22 = vor.u32 %v5133_v49, %v4937_v36  ;;  %v5121_v5 = vld [vmem:[#allocation7 + $0x94] sm:$0xf0]  ;;  %v5136_v49 = vld [vmem:[#allocation8 + $0x90] sm:$0xff] }
0x11b8   : > { %v5137_v36 = vld [vmem:[#allocation8 + $0x98] sm:$0xff] }
0x11b9   : > { %v3704_v62 = vmul.f32 %v3684_v32, %v3684_v32  ;;  %v3716_v30 = vsub.f32 %v6553_v53, %v3684_v32  ;;  %v5131_v32 = vld [vmem:[#allocation7 + $0xe4] sm:$0xf0] }
0x11ba   : > { %v4930_v1 = vor.u32 %v5131_v32, %v4929_v0 }
0x11bb   : > { %v3708_v10 = vsub.f32 %v3700_v44, %v3704_v62  ;;  %v4921_v44 = vld [vmem:[#allocation7 + $0xd0] sm:$0xf]  ;;  %v5129_v62 = vld [vmem:[#allocation7 + $0xd4] sm:$0xf0] }
0x11bc   : > { %v4922_v21 = vor.u32 %v5129_v62, %v4921_v44 }
0x11bd   : > { %v3712_v8 = vmax.f32 %v3708_v10, 0.0  ;;  %v5127_v10 = vld [vmem:[#allocation7 + $0xc4] sm:$0xf0] }
0x11be   : > { %v4914_v3 = vor.u32 %v5127_v10, %v4913_v12 }
0x11bf   : > { %v3720_v7 = vadd.f32 1e-05, %v3712_v8  ;;  %v4905_v8 = vld [vmem:[#allocation7 + $0xb0] sm:$0xf] }
0x11c0   : > { %v4906_v33 = vor.u32 %v5125_v59, %v4905_v8 }
0x11c1   : > { %5410 = vrsqrt.f32 %v3720_v7  ;;  %vm3739_vm1 = vweird.f32 %v3720_v7 }
0x11c7   : > { %v5411_v28 = vpop.eup %5410  ;;  %v3692_v9 = vpop.xlane.xlu1 %3691 }
0x11c8   : > { %v3734_v35 = vmul.f32 %v5411_v28, %v3720_v7  ;;  %v3699_v61 = vmul.f32 %v3692_v9, %v6152_v60  ;;  %vm3740_vm3 = vweird.f32 %v5411_v28  ;;  %v5149_v7 = vld [vmem:[#allocation8 + $0xf8] sm:$0xff]  ;;  %v4890_v9 = vor.u32 %v5121_v5, %v4889_v52 }
0x11c9   : > { %vm3741_vm4 = vmor %vm3739_vm1, %vm3740_vm3  ;;  %4090 = vmatpush.bf16.msra.mxu0 %v5149_v7 }
0x11ca   : > { %v3707_v51 = vsub.f32 %v3699_v61, %v3703_v4  ;;  %v3735_v17 = vmul.f32 %v5411_v28, %v3734_v35  ;;  %v4881_v4 = vld [vmem:[#allocation7 + $0x80] sm:$0xf]  ;;  %v5119_v35 = vld [vmem:[#allocation7 + $0x84] sm:$0xf0] }
0x11cb   : > { %v5146_v61 = vld [vmem:[#allocation8 + $0xe0] sm:$0xff] }
0x11cc   : > { %v3711_v29 = vmax.f32 %v3707_v51, 0.0  ;;  %v3736_v45 = vmul.f32 0.5, %v3735_v17 }
0x11cd   : > { %4091 = vmatpush.bf16.msra.mxu0 %v5148_v46 }
0x11ce   : > { %v3719_v11 = vadd.f32 1e-05, %v3711_v29  ;;  %v3737_v47 = vsub.f32 1.5, %v3736_v45  ;;  %v4882_v29 = vor.u32 %v5119_v35, %v4881_v4 }
0x11d0   : > { %5412 = vrsqrt.f32 %v3719_v11  ;;  %v3738_v31 = vmul.f32 %v5411_v28, %v3737_v47  ;;  %vm3729_vm6 = vweird.f32 %v3719_v11  ;;  %v5145_v47 = vld [vmem:[#allocation8 + $0xd8] sm:$0xff] }
0x11d2   : > { %v3742_v23 = vsel %vm3741_vm4, %v5411_v28, %v3738_v31  ;;  %v5147_v28 = vld [vmem:[#allocation8 + $0xe8] sm:$0xff] }
0x11d3   : > { %v3764_v34 = vmul.f32 %v3742_v23, %v3716_v30  ;;  %4092 = vmatpush.bf16.msra.mxu0 %v5147_v28  ;;  %v5143_v31 = vld [vmem:[#allocation8 + $0xc8] sm:$0xff] }
0x11d5   : > { %v3771_v53 = vmul.f32 %v6619_v27, %v3764_v34 }
0x11d6   : > { %v5413_v20 = vpop.eup %5412 }
0x11d7   : > { %v3724_v15 = vmul.f32 %v5413_v20, %v3719_v11  ;;  %vm3730_vm5 = vweird.f32 %v5413_v20  ;;  %v6630_v26 = vadd.f32 %v6625_v42, %v3771_v53  ;;  %4093 = vmatpush.bf16.msra.mxu0 %v5146_v61  ;;  %v5141_v53 = vld [vmem:[#allocation8 + $0xb8] sm:$0xff] }
0x11d8   : > { %vm3731_vm7 = vmor %vm3729_vm6, %vm3730_vm5  ;;  %4071 = vmatpush.bf16.msra.mxu3 %v5141_v53 }
0x11d9   : > { %v3725_v16 = vmul.f32 %v5413_v20, %v3724_v15  ;;  %v5142_v15 = vld [vmem:[#allocation8 + $0xc0] sm:$0xff] }
0x11db   : > { %v3726_v25 = vmul.f32 0.5, %v3725_v16  ;;  %4094 = vmatpush.bf16.msra.mxu0 %v5145_v47  ;;  %v4878_v16 = vld [vmem:[%s6805_s10 + $0x2] sm:$0x3] }
0x11dd   : > { %v3727_v14 = vsub.f32 1.5, %v3726_v25  ;;  %v6643_v25 = vperm.slane %v4878_v16, 1 }
0x11df   : > { %v3728_v48 = vmul.f32 %v5413_v20, %v3727_v14 }
0x11e1   : > { %v3732_v24 = vsel %vm3731_vm7, %v5413_v20, %v3728_v48  ;;  %v5144_v20 = vld [vmem:[#allocation8 + $0xd0] sm:$0xff] }
0x11e2   : > { %v3763_v37 = vmul.f32 %v3732_v24, %v3715_v18  ;;  %4095 = vmatpush.bf16.msra.mxu0 %v5144_v20 }
0x11e4   : > { %v3770_v38 = vmul.f32 %v6619_v27, %v3763_v37  ;;  %v5140_v37 = vld [vmem:[#allocation8 + $0xb0] sm:$0xff] }
0x11e5   : > { %4072 = vmatpush.bf16.msra.mxu3 %v5140_v37 }
0x11e6   : > { %v6633_v41 = vadd.f32 %v6625_v42, %v3770_v38  ;;  %4096 = vmatpush.bf16.msra.mxu0 %v5143_v31  ;;  %v5139_v38 = vld [vmem:[#allocation8 + $0xa8] sm:$0xff] }
0x11e8   : > { %v3781_v43 = vpack.c.bf16 %v6630_v26, %v6633_v41 }
0x11e9   : > { %4073 = vmatpush.bf16.msra.mxu3 %v5139_v38 }
0x11ea   : > { %3914 = vmatmul.bf16.vlgmr.msrb.gmra.mxu2 %v3781_v43  ;;  %4097 = vmatpush.bf16.msra.mxu0 %v5142_v15 }
0x1200   : > { %v3392_v6 = vpop.f32.mrf.mxu0 }
0x1208   : > { %v3394_v40 = vpop.f32.mrf.mxu0 }
0x1209   : > { %v3397_v50 = vpack.c.bf16 %v3394_v40, %v3392_v6 }
0x120b   : > { %4867 = vmatmul.msk.bf16.vlgmr.msra.gmra.mxu1 %vm911_vm2, %v3397_v50  ;;  %v5134_v50 = vld [vmem:[#allocation8 + $0x80] sm:$0xff] }
0x120c   : > { %3887 = vmatpush.bf16.msra.mxu1 %v4938_v22  ;;  %v5135_v22 = vld [vmem:[#allocation8 + $0x88] sm:$0xff] }
0x1210   : > { %3888 = vmatpush.bf16.msra.mxu1 %v4930_v1 }
0x1214   : > { %3889 = vmatpush.bf16.msra.mxu1 %v4922_v21 }
0x1218   : > { %3890 = vmatpush.bf16.msra.mxu1 %v4914_v3 }
0x121c   : > { %3891 = vmatpush.bf16.msra.mxu1 %v4906_v33 }
0x121d   : > { %v3520_v39 = vpop.f32.mrf.mxu0  ;;  %v3633_v55 = vpop.f32.mrf.mxu3 }
0x1220   : > { %3892 = vmatpush.bf16.msra.mxu1 %v4898_v19  ;;  %v6653_v19 = vperm.slane %v4878_v16, 0 }
0x1224   : > { %3893 = vmatpush.bf16.msra.mxu1 %v4890_v9 }
0x1225   : > { %v3522_v51 = vpop.f32.mrf.mxu0  ;;  %v3635_v17 = vpop.f32.mrf.mxu3 }
0x1226   : > { %v3525_v11 = vpack.c.bf16 %v3522_v51, %v3520_v39  ;;  %v3638_v45 = vpack.c.bf16 %v3635_v17, %v3633_v55 }
0x1228   : > { %4871 = vmatmul.msk.bf16.vlgmr.msrb.gmra.mxu1 %vm911_vm2, %v3525_v11  ;;  %4874 = vmatmul.msk.bf16.vlgmr.msrb.gmra.mxu0 %vm911_vm2, %v3638_v45 }
0x1229   : > { %3894 = vmatpush.bf16.msra.mxu1 %v4882_v29 }
0x1238   : > { %3895 = vmatmul.bf16.vlgmr.msra.gmra.mxu1 %v3781_v43  ;;  %v5138_v43 = vld [vmem:[#allocation8 + $0xa0] sm:$0xff] }
0x1239   : > { %4074 = vmatpush.bf16.msra.mxu3 %v5138_v43 }
0x123d   : > { %4075 = vmatpush.bf16.msra.mxu3 %v5137_v36 }
0x1241   : > { %4076 = vmatpush.bf16.msra.mxu3 %v5136_v49 }
0x1245   : > { %4077 = vmatpush.bf16.msra.mxu3 %v5135_v22 }
0x1249   : > { %4078 = vmatpush.bf16.msra.mxu3 %v5134_v50 }
0x126d   : > { %v3915_v23 = vpop.f32.mrf.mxu2 }
0x126e   : > { %v3916_v30 = vadd.f32 %v3915_v23, %v6643_v25 }
0x1270   : > { %v3926_v48 = vmax.f32 %v3916_v30, 0.0 }
0x1275   : > { %v3917_v14 = vpop.f32.mrf.mxu2 }
0x1276   : > { %v3918_v34 = vadd.f32 %v3917_v14, %v6643_v25 }
0x1278   : > { %v3928_v18 = vmax.f32 %v3918_v34, 0.0 }
0x127a   : > { %v3934_v24 = vpack.c.bf16 %v3928_v18, %v3926_v48 }
0x127c   : > { %4098 = vmatmul.bf16.vlgmr.msra.gmra.mxu0 %v3934_v24 }
0x1288   : > { %v3410_v6 = vpop.f32.mrf.mxu1 }
0x1289   : > { %v3428_v0 = vadd.f32 %v6494_v57, %v3410_v6 }
0x1290   : > { %v3412_v40 = vpop.f32.mrf.mxu1 }
0x1291   : > { %v3430_v12 = vadd.f32 %v6496_v2, %v3412_v40  ;;  %v6664_v40 = vld [vmem:[%s6807_s12 + $0x1] ss:$0 sm:$0xff] }
0x12a5   : > { %v3538_v32 = vpop.f32.mrf.mxu1  ;;  %v3651_v1 = vpop.f32.mrf.mxu0 }
0x12a6   : > { %v3543_v44 = vadd.f32 %v3538_v32, %v3428_v0 }
0x12a8   : > { %v3656_v62 = vadd.f32 %v3651_v1, %v3543_v44 }
0x12aa   : > { %v3665_v21 = vadd.f32 %v6543_v63, %v3656_v62 }
0x12ac   : > { %v3669_v10 = vadd.f32 %v3665_v21, %v6332_v54 }
0x12ad   : > { %v3540_v3 = vpop.f32.mrf.mxu1  ;;  %v3653_v33 = vpop.f32.mrf.mxu0 }
0x12ae   : > { %v3544_v8 = vadd.f32 %v3540_v3, %v3430_v12  ;;  %3679 = vadd.xlane.f32.xlu2 %v3669_v10  ;;  %v3689_v59 = vmul.f32 %v3669_v10, %v3669_v10 }
0x12b0   : > { %v3657_v7 = vadd.f32 %v3653_v33, %v3544_v8  ;;  %3695 = vadd.xlane.f32.xlu1 %v3689_v59 }
0x12b2   : > { %v3666_v58 = vadd.f32 %v6543_v63, %v3657_v7 }
0x12b4   : > { %v3670_v57 = vadd.f32 %v3666_v58, %v6335_v56 }
0x12b5   : > { %v3896_v13 = vpop.f32.mrf.mxu1 }
0x12b6   : > { %3681 = vadd.xlane.f32.xlu0 %v3670_v57  ;;  %v3690_v46 = vmul.f32 %v3670_v57, %v3670_v57  ;;  %v3897_v2 = vadd.f32 %v3896_v13, %v6653_v19 }
0x12b8   : > { %3697 = vadd.xlane.f32.xlu2 %v3690_v46  ;;  %v3925_v55 = vmax.f32 %v3897_v2, 0.0 }
0x12bd   : > { %v3898_v54 = vpop.f32.mrf.mxu1 }
0x12be   : > { %v3899_v39 = vadd.f32 %v3898_v54, %v6653_v19 }
0x12c0   : > { %v3927_v52 = vmax.f32 %v3899_v39, 0.0 }
0x12c2   : > { %v3933_v5 = vpack.c.bf16 %v3927_v52, %v3925_v55 }
0x12c4   : > { %4079 = vmatmul.bf16.vlgmr.msra.gmra.mxu3 %v3933_v5 }
0x12f9   : > { %v4099_v0 = vpop.f32.mrf.mxu0 }
0x1321   : > { %v3680_v28 = vpop.xlane.xlu2 %3679 }
0x1322   : > { %v3685_v63 = vmul.f32 %v3680_v28, %v6152_v60 }
0x1323   : > { %v3696_v9 = vpop.xlane.xlu1 %3695 }
0x1324   : > { %v3705_v56 = vmul.f32 %v3685_v63, %v3685_v63  ;;  %v3701_v4 = vmul.f32 %v3696_v9, %v6152_v60  ;;  %v3717_v43 = vsub.f32 %v3669_v10, %v3685_v63 }
0x1326   : > { %v3709_v35 = vsub.f32 %v3701_v4, %v3705_v56 }
0x1328   : > { %v3713_v61 = vmax.f32 %v3709_v35, 0.0 }
0x1329   : > { %v3682_v51 = vpop.xlane.xlu0 %3681 }
0x132a   : > { %v3721_v17 = vadd.f32 1e-05, %v3713_v61  ;;  %v3686_v29 = vmul.f32 %v3682_v51, %v6152_v60 }
0x132b   : > { %v3698_v11 = vpop.xlane.xlu2 %3697 }
0x132c   : > { %5414 = vrsqrt.f32 %v3721_v17  ;;  %v3706_v45 = vmul.f32 %v3686_v29, %v3686_v29  ;;  %v3702_v47 = vmul.f32 %v3698_v11, %v6152_v60  ;;  %vm3749_vm8 = vweird.f32 %v3721_v17 }
0x132d   : > { %v3718_v22 = vsub.f32 %v3670_v57, %v3686_v29 }
0x132e   : > { %v3710_v20 = vsub.f32 %v3702_v47, %v3706_v45 }
0x1330   : > { %v3714_v31 = vmax.f32 %v3710_v20, 0.0 }
0x1332   : > { %v5415_v15 = vpop.eup %5414  ;;  %v3722_v23 = vadd.f32 1e-05, %v3714_v31 }
0x1333   : > { %v3744_v16 = vmul.f32 %v5415_v15, %v3721_v17  ;;  %vm3750_vm2 = vweird.f32 %v5415_v15 }
0x1334   : > { %5416 = vrsqrt.f32 %v3722_v23  ;;  %vm3751_vm9 = vmor %vm3749_vm8, %vm3750_vm2  ;;  %vm3759_vm11 = vweird.f32 %v3722_v23 }
0x1335   : > { %v3745_v30 = vmul.f32 %v5415_v15, %v3744_v16 }
0x1337   : > { %v3746_v14 = vmul.f32 0.5, %v3745_v30 }
0x1339   : > { %v3747_v34 = vsub.f32 1.5, %v3746_v14  ;;  %v6701_v14 = vld [vmem:[%s6852_s19 + $0x1] ss:$0 sm:$0xff] }
0x133a   : > { %v5417_v48 = vpop.eup %5416 }
0x133b   : > { %v3748_v18 = vmul.f32 %v5415_v15, %v3747_v34  ;;  %v3754_v24 = vmul.f32 %v5417_v48, %v3722_v23  ;;  %vm3760_vm10 = vweird.f32 %v5417_v48 }
0x133c   : > { %vm3761_vm12 = vmor %vm3759_vm11, %vm3760_vm10 }
0x133d   : > { %v3755_v53 = vmul.f32 %v5417_v48, %v3754_v24  ;;  %v3752_v38 = vsel %vm3751_vm9, %v5415_v15, %v3748_v18 }
0x133e   : > { %v3765_v36 = vmul.f32 %v3752_v38, %v3717_v43 }
0x133f   : > { %v3756_v37 = vmul.f32 0.5, %v3755_v53 }
0x1340   : > { %v3772_v44 = vmul.f32 %v6619_v27, %v3765_v36 }
0x1341   : > { %v3757_v6 = vsub.f32 1.5, %v3756_v37 }
0x1342   : > { %v6670_v10 = vadd.f32 %v6625_v42, %v3772_v44 }
0x1343   : > { %v3758_v49 = vmul.f32 %v5417_v48, %v3757_v6 }
0x1345   : > { %v3762_v50 = vsel %vm3761_vm12, %v5417_v48, %v3758_v49 }
0x1346   : > { %v3766_v1 = vmul.f32 %v3762_v50, %v3718_v22 }
0x1347   : > { %v4080_v32 = vpop.f32.mrf.mxu3 }
0x1348   : > { %v4081_v62 = vadd.f32 %v6664_v40, %v4080_v32  ;;  %v3773_v21 = vmul.f32 %v6619_v27, %v3766_v1  ;;  %v4101_v27 = vpop.f32.mrf.mxu0 }
0x134a   : > { %v4100_v12 = vadd.f32 %v4099_v0, %v4081_v62  ;;  %v6673_v3 = vadd.f32 %v6625_v42, %v3773_v21 }
0x134c   : > { %v4109_v8 = vadd.f32 %v4100_v12, %v6633_v41  ;;  %v3782_v59 = vpack.c.bf16 %v6673_v3, %v6670_v10 }
0x134e   : > { %4117 = vadd.xlane.f32.xlu0 %v4109_v8  ;;  %v4129_v33 = vmul.f32 %v4109_v8, %v4109_v8  ;;  %3900 = vmatmul.bf16.gmra.mxu1 %v3782_v59 }
0x134f   : > { %3919 = vmatmul.bf16.gmra.mxu2 %v3782_v59  ;;  %v4082_v7 = vpop.f32.mrf.mxu3 }
0x1350   : > { %v4083_v58 = vadd.f32 %v6664_v40, %v4082_v7  ;;  %4133 = vadd.xlane.f32.xlu1 %v4129_v33 }
0x1352   : > { %v4102_v57 = vadd.f32 %v4101_v27, %v4083_v58 }
0x1354   : > { %v6680_v13 = vadd.f32 %v4102_v57, %v6630_v26 }
0x1356   : > { %v4130_v0 = vmul.f32 %v6680_v13, %v6680_v13 }
0x1358   : > { %4119 = vadd.xlane.f32.xlu1 %v6680_v13 }
0x13c1   : > { %v4118_v42 = vpop.xlane.xlu0 %4117 }
0x13c2   : > { %v4125_v41 = vmul.f32 %v4118_v42, %v6152_v60 }
0x13c3   : > { %v4134_v46 = vpop.xlane.xlu1 %4133 }
0x13c4   : > { %v4145_v2 = vmul.f32 %v4125_v41, %v4125_v41  ;;  %v4141_v54 = vmul.f32 %v4134_v46, %v6152_v60  ;;  %v4157_v15 = vsub.f32 %v4109_v8, %v4125_v41 }
0x13c6   : > { %v4149_v39 = vsub.f32 %v4141_v54, %v4145_v2 }
0x13c8   : > { %v4153_v55 = vmax.f32 %v4149_v39, 0.0 }
0x13ca   : > { %v4161_v52 = vadd.f32 1e-05, %v4153_v55 }
0x13cb   : > { %v3901_v5 = vpop.f32.mrf.mxu1  ;;  %v4120_v44 = vpop.xlane.xlu1 %4119 }
0x13cc   : > { %5418 = vrsqrt.f32 %v4161_v52  ;;  %v3902_v26 = vadd.f32 %v3901_v5, %v6653_v19  ;;  %vm4171_vm14 = vweird.f32 %v4161_v52  ;;  %v4126_v62 = vmul.f32 %v4120_v44, %v6152_v60 }
0x13ce   : > { %v3929_v51 = vmax.f32 %v3902_v26, 0.0 }
0x13d2   : > { %v5419_v28 = vpop.eup %5418  ;;  %v3920_v63 = vpop.f32.mrf.mxu2 }
0x13d3   : > { %v4166_v9 = vmul.f32 %v5419_v28, %v4161_v52  ;;  %v3903_v56 = vpop.f32.mrf.mxu1  ;;  %vm4172_vm13 = vweird.f32 %v5419_v28  ;;  %v3921_v11 = vadd.f32 %v3920_v63, %v6643_v25 }
0x13d4   : > { %v3904_v35 = vadd.f32 %v3903_v56, %v6653_v19  ;;  %v6695_v19 = vld [vmem:[%s6851_s0 + $0x1] ss:$0 sm:$0xff]  ;;  %vm4173_vm15 = vmor %vm4171_vm14, %vm4172_vm13 }
0x13d5   : > { %v4167_v4 = vmul.f32 %v5419_v28, %v4166_v9  ;;  %v3930_v23 = vmax.f32 %v3921_v11, 0.0 }
0x13d6   : > { %v3931_v17 = vmax.f32 %v3904_v35, 0.0 }
0x13d7   : > { %v4168_v61 = vmul.f32 0.5, %v4167_v4 }
0x13d8   : > { %v3935_v45 = vpack.c.bf16 %v3931_v17, %v3929_v51 }
0x13d9   : > { %v4169_v29 = vsub.f32 1.5, %v4168_v61 }
0x13da   : > { %v3922_v47 = vpop.f32.mrf.mxu2  ;;  %4084 = vmatmul.bf16.gmra.mxu3 %v3935_v45 }
0x13db   : > { %v4170_v20 = vmul.f32 %v5419_v28, %v4169_v29  ;;  %v3923_v31 = vadd.f32 %v3922_v47, %v6643_v25  ;;  %v4158_v47 = vsub.f32 %v6680_v13, %v4126_v62 }
0x13dd   : > { %v4174_v16 = vsel %vm4173_vm15, %v5419_v28, %v4170_v20  ;;  %v3932_v30 = vmax.f32 %v3923_v31, 0.0 }
0x13de   : > { %v4205_v34 = vmul.f32 %v4174_v16, %v4157_v15 }
0x13df   : > { %v3936_v48 = vpack.c.bf16 %v3932_v30, %v3930_v23 }
0x13e0   : > { %v4212_v25 = vmul.f32 %v6695_v19, %v4205_v34 }
0x13e1   : > { %4103 = vmatmul.bf16.gmra.mxu0 %v3936_v48 }
0x13e2   : > { %v6705_v18 = vadd.f32 %v6701_v14, %v4212_v25 }
0x13e4   : > { %4223 = vst [vmem:[%s6707_s28] sm:$0xff] %v6705_v18 }
0x145d   : > { %v4085_v24 = vpop.f32.mrf.mxu3 }
0x145e   : > { %v4104_v53 = vpop.f32.mrf.mxu0  ;;  %v4086_v37 = vadd.f32 %v6664_v40, %v4085_v24 }
0x1460   : > { %v4105_v38 = vadd.f32 %v4104_v53, %v4086_v37 }
0x1462   : > { %v6713_v43 = vadd.f32 %v4105_v38, %v6670_v10  ;;  %v4146_v10 = vmul.f32 %v4126_v62, %v4126_v62 }
0x1464   : > { %4121 = vadd.xlane.f32.xlu2 %v6713_v43  ;;  %v4131_v1 = vmul.f32 %v6713_v43, %v6713_v43 }
0x1465   : > { %v4087_v6 = vpop.f32.mrf.mxu3 }
0x1466   : > { %v4088_v36 = vadd.f32 %v6664_v40, %v4087_v6  ;;  %v4106_v49 = vpop.f32.mrf.mxu0 }
0x1468   : > { %v4107_v22 = vadd.f32 %v4106_v49, %v4088_v36 }
0x146a   : > { %v6718_v50 = vadd.f32 %v4107_v22, %v6673_v3 }
0x146c   : > { %4123 = vadd.xlane.f32.xlu0 %v6718_v50  ;;  %4135 = vadd.xlane.f32.xlu2 %v4130_v0  ;;  %v4132_v32 = vmul.f32 %v6718_v50, %v6718_v50 }
0x146e   : > { %4139 = vadd.xlane.f32.xlu1 %v4132_v32 }
0x1474   : > { %4137 = vadd.xlane.f32.xlu0 %v4131_v1 }
0x14d7   : > { %v4122_v40 = vpop.xlane.xlu2 %4121 }
0x14d8   : > { %v4127_v27 = vmul.f32 %v4122_v40, %v6152_v60 }
0x14da   : > { %v4147_v54 = vmul.f32 %v4127_v27, %v4127_v27  ;;  %v4159_v38 = vsub.f32 %v6713_v43, %v4127_v27 }
0x14df   : > { %v4124_v21 = vpop.xlane.xlu0 %4123  ;;  %v4136_v12 = vpop.xlane.xlu2 %4135 }
0x14e0   : > { %v4128_v3 = vmul.f32 %v4124_v21, %v6152_v60  ;;  %v4142_v8 = vmul.f32 %v4136_v12, %v6152_v60 }
0x14e1   : > { %v4140_v59 = vpop.xlane.xlu1 %4139 }
0x14e2   : > { %v4148_v33 = vmul.f32 %v4128_v3, %v4128_v3  ;;  %v4150_v7 = vsub.f32 %v4142_v8, %v4146_v10  ;;  %v4144_v58 = vmul.f32 %v4140_v59, %v6152_v60  ;;  %v4160_v16 = vsub.f32 %v6718_v50, %v4128_v3 }
0x14e4   : > { %v4154_v57 = vmax.f32 %v4150_v7, 0.0  ;;  %v4152_v42 = vsub.f32 %v4144_v58, %v4148_v33 }
0x14e6   : > { %v4162_v41 = vadd.f32 1e-05, %v4154_v57  ;;  %v4156_v46 = vmax.f32 %v4152_v42, 0.0 }
0x14e7   : > { %v4138_v2 = vpop.xlane.xlu0 %4137 }
0x14e8   : > { %5420 = vrsqrt.f32 %v4162_v41  ;;  %v4164_v39 = vadd.f32 1e-05, %v4156_v46  ;;  %v4143_v55 = vmul.f32 %v4138_v2, %v6152_v60  ;;  %vm4181_vm3 = vweird.f32 %v4162_v41 }
0x14ea   : > { %5422 = vrsqrt.f32 %v4164_v39  ;;  %v4151_v52 = vsub.f32 %v4143_v55, %v4147_v54  ;;  %vm4201_vm5 = vweird.f32 %v4164_v39 }
0x14ec   : > { %v4155_v5 = vmax.f32 %v4151_v52, 0.0 }
0x14ee   : > { %v5421_v28 = vpop.eup %5420  ;;  %v4163_v63 = vadd.f32 1e-05, %v4155_v5 }
0x14ef   : > { %v4176_v9 = vmul.f32 %v5421_v28, %v4162_v41  ;;  %vm4182_vm0 = vweird.f32 %v5421_v28 }
0x14f0   : > { %v5423_v26 = vpop.eup %5422  ;;  %5424 = vrsqrt.f32 %v4163_v63  ;;  %vm4183_vm4 = vmor %vm4181_vm3, %vm4182_vm0  ;;  %vm4191_vm2 = vweird.f32 %v4163_v63 }
0x14f1   : > { %v4177_v56 = vmul.f32 %v5421_v28, %v4176_v9  ;;  %v4196_v4 = vmul.f32 %v5423_v26, %v4164_v39  ;;  %vm4202_vm1 = vweird.f32 %v5423_v26 }
0x14f2   : > { %vm4203_vm6 = vmor %vm4201_vm5, %vm4202_vm1 }
0x14f3   : > { %v4178_v35 = vmul.f32 0.5, %v4177_v56  ;;  %v4197_v61 = vmul.f32 %v5423_v26, %v4196_v4 }
0x14f5   : > { %v4179_v51 = vsub.f32 1.5, %v4178_v35  ;;  %v4198_v17 = vmul.f32 0.5, %v4197_v61 }
0x14f6   : > { %v5425_v29 = vpop.eup %5424 }
0x14f7   : > { %v4180_v11 = vmul.f32 %v5421_v28, %v4179_v51  ;;  %v4199_v45 = vsub.f32 1.5, %v4198_v17  ;;  %v4186_v60 = vmul.f32 %v5425_v29, %v4163_v63  ;;  %vm4192_vm7 = vweird.f32 %v5425_v29 }
0x14f8   : > { %vm4193_vm8 = vmor %vm4191_vm2, %vm4192_vm7 }
0x14f9   : > { %v4184_v20 = vsel %vm4183_vm4, %v5421_v28, %v4180_v11  ;;  %v4200_v31 = vmul.f32 %v5423_v26, %v4199_v45  ;;  %v4187_v15 = vmul.f32 %v5425_v29, %v4186_v60 }
0x14fa   : > { %v4206_v23 = vmul.f32 %v4184_v20, %v4158_v47 }
0x14fb   : > { %v4204_v30 = vsel %vm4203_vm6, %v5423_v26, %v4200_v31  ;;  %v4188_v34 = vmul.f32 0.5, %v4187_v15 }
0x14fc   : > { %v4213_v48 = vmul.f32 %v6695_v19, %v4206_v23  ;;  %v4208_v25 = vmul.f32 %v4204_v30, %v4160_v16 }
0x14fd   : > { %v4189_v24 = vsub.f32 1.5, %v4188_v34 }
0x14fe   : > { %v4220_v13 = vadd.f32 %v6701_v14, %v4213_v48  ;;  %v4215_v53 = vmul.f32 %v6695_v19, %v4208_v25 }
0x14ff   : > { %v4190_v37 = vmul.f32 %v5425_v29, %v4189_v24 }
0x1500   : > { %4224 = vst [vmem:[%s6707_s28 + $0x8] sm:$0xff] %v4220_v13  ;;  %v4225_v6 = vadd.f32 %v4220_v13, %v6705_v18  ;;  %v4222_v36 = vadd.f32 %v6701_v14, %v4215_v53 }
0x1501   : > { %v4194_v49 = vsel %vm4193_vm8, %v5425_v29, %v4190_v37 }
0x1502   : > { %v4226_v22 = vrot.slane %v4225_v6, 4  ;;  %5011 = vst [vmem:[%s6707_s28 + $0x18] sm:$0xff] %v4222_v36  ;;  %v4207_v50 = vmul.f32 %v4194_v49, %v4159_v38 }
0x1504   : > { %v4227_v0 = vadd.f32 %v4226_v22, %v4225_v6  ;;  %v4214_v32 = vmul.f32 %v6695_v19, %v4207_v50 }
0x1506   : > { %v4228_v43 = vrot.slane %v4227_v0, 2  ;;  %v4221_v18 = vadd.f32 %v6701_v14, %v4214_v32 }
0x1508   : > { %v4229_v1 = vadd.f32 %v4228_v43, %v4227_v0  ;;  %5010 = vst [vmem:[%s6707_s28 + $0x10] sm:$0xff] %v4221_v18  ;;  %v4237_v40 = vadd.f32 %v4222_v36, %v4221_v18 }
0x1509   : > { %5573 = shalt.err (!%p5570_p8)
}
0x150a   : > { %s5668_s28 = smov 128   ;;  %s5669_s29 = smov 8   ;;  %v4238_v19 = vrot.slane %v4237_v40, 4  ;;  %v4230_v14 = vrot.slane %v4229_v1, 1 }
0x150b   : > { %5168 = dma.vmem_to_hbm [thread:$0]  (%p5795_p5), %s4267_s25, 512, %s4269_s15, %s4248_s16, %s5668_s28, %s5668_s28, %s5669_s29  }
0x150c   : > { %s4434_s20 = sshll.u32 %s6689_s24, 1  ;;  %v4239_v44 = vadd.f32 %v4238_v19, %v4237_v40  ;;  %v4231_v62 = vadd.f32 %v4230_v14, %v4229_v1  ;;  %s6862_s21 = sld [smem:[#allocation32_spill]] }
0x150d   : > { %s595_s17 = scalar_lea.vmem [#allocation11], %s4434_s20  ;;  %s4253_s25 = scalar_lea.sflag [#allocation12], %s6689_s24 }
0x150e   : > { %v4240_v21 = vrot.slane %v4239_v44, 2  ;;  %v4232_v12 = vmul.f32 0.0625, %v4231_v62  ;;  %s4282_s27 = sshll.u32 %s595_s17, 4  ;;  %s4283_s27 = int_to_ptr.vmem [resolvable:$true] %s4282_s27 }
0x1510   : > { %v4241_v10 = vadd.f32 %v4240_v21, %v4239_v44  ;;  %4233 = vst [vmem:[%s595_s17] sm:$0x1] %v4232_v12 }
0x1512   : > { %s6863_s30 = smov %s6862_s21  ;;  %s4281_s22 = scalar_lea.hbm %s6862_s21, %s5853_s3  ;;  %v4242_v3 = vrot.slane %v4241_v10, 1 }
0x1513   : > { %s4284_s18 = sshll.u32 %s4281_s22, 4  ;;  %s5594_s28 = scalar_lea.hbm %s6863_s30, 4  ;;  %s4285_s18 = int_to_ptr.hbm [resolvable:$true] %s4284_s18 }
0x1514   : > { %v4243_v8 = vadd.f32 %v4242_v3, %v4241_v10  ;;  %s5588_s15 = sshra.s32 %s4285_s18, 4  ;;  %s5589_s15 = int_to_ptr.hbm [resolvable:$true] %s5588_s15 }
0x1515   : > { %s5590_s16 = scalar_lea.hbm %s5589_s15, 2  ;;  %p5595_p12 = scmp.lt.s32.totalorder %s5589_s15, %s6863_s30 }
0x1516   : > { %v4244_v59 = vmul.f32 0.0625, %v4243_v8  ;;  %p5591_p9 = scmp.ne.s32.totalorder %s5589_s15, %s5590_s16  ;;  %p5596_p13 = scmp.lt.s32.totalorder %s5594_s28, %s5590_s16 }
0x1518   : > { %5012 = vst [vmem:[%s595_s17 + $0x1] sm:$0x1] %v4244_v59  ;;  %p5592_p10 = pnand %p5591_p9, %p5795_p5  ;;  %p5597_p0 = por %p5596_p13, %p5595_p12 }
0x151a   : > { %p5593_p11 = pneg %p5592_p10 }
0x151c   : > { %p5598_p1 = pnand %p5597_p0, %p5593_p11 }
0x151e   : > { %5601 = shalt.err (!%p5598_p1)
}
0x151f   : > { %s5670_s24 = smov 16   ;;  %s5671_s23 = smov 1  }
0x1520   : > { %5169 = dma.vmem_to_hbm [thread:$0]  (%p5795_p5), %s4283_s27, 32, %s4285_s18, %s4253_s25, %s5670_s24, %s5670_s24, %s5671_s23  }
0x1521 PF: > { %s6864_s13 = sld [smem:[#allocation21_spill]] }
0x1522   : > { %s6865_s21 = sld [smem:[#allocation18_spill]] }
0x1527   : > { %p5200_p2 = scmp.ge.s32.totalorder %s6864_s13, 2 }
0x1528   : > { %s4299_s17 = sand.u32 1, %s6865_s21  }
0x1529   : > { %p5186_p3 = pnand %p5200_p2, %p5799_p6  ;;  %s4300_s3 = scalar_lea.sflag [#allocation4], %s4299_s17 }
0x152b   : > { %p5187_p4 = pneg %p5186_p3 }
0x152d   : > { %5631 = dma.done.wait (%p5187_p4), %s4300_s3, 512  }
0x152e   : > { %5633 = vsyncadd (%p5187_p4), %s4300_s3, 4294966784  ;;  %s4310_s15 = scalar_lea.sflag [#allocation12], %s4299_s17 }
0x152f   : > { %5635 = dma.done.wait (%p5187_p4), %s4310_s15, 32  }
0x1530   : > { %5637 = vsyncadd (%p5187_p4), %s4310_s15, 4294967264  ;;  %s6867_s24 = sld [smem:[#allocation22_spill]] }
0x1531   : > { %s6868_s21 = sld [smem:[#allocation19_spill]] }
0x1532   : > { %s6869_s22 = sld [smem:[#allocation20_spill]] }
0x1533   : > { %s6870_s23 = sld [smem:[#allocation23_spill]] }
0x1536   : > { %p33_p5 = scmp.ge.s32.totalorder %s6867_s24, 4  }
0x1538   :  { %35 = sbr.rel (!%p33_p5) target bundleno = 16 (0x10), region = 164 }
0x153d   :  { %4316 = vsyncpa [#allocation3], 1 }
0x153e   :  { %4318 = vsyncpa [#allocation3 + $0x1], 1 }
0x153f   :  { %4319 = vsyncpa [#allocation6], 1 }
0x1540   :  { %4320 = vsyncpa [#allocation9], 1 }
0x1541   :  { %4321 = vsyncpa [#allocation4], 1 }
0x1542   :  { %4323 = vsyncpa [#allocation4 + $0x1], 1 }
0x1543   :  { %4324 = vsyncpa [#allocation12], 1 }
0x1544   :  { %4326 = vsyncpa [#allocation12 + $0x1], 1 }

</bundles_post_ra>
